<compile_context>
chip_gen: v5e
topology: v5e:2x2
jax: 0.10.0
libtpu: 0.0.40
codegen_flags: <defaults>
</compile_context>

<pallas_src>
import functools
import math

import jax
import jax.numpy as jnp
from jax.experimental import pallas as pl
from jax.experimental.pallas import tpu as pltpu


# ----------------------------- kernel -------------------------------------- #

def _siren_mlp_kernel(apply_sin, x_ref, *refs):
    """Fused SIREN MLP on one (features, spatial) tile.

    x_ref block:   (1, dim_in, TILE)           -- spatial on lanes
    refs = (w0, b0, w1, b1, ..., wL, bL, out_ref)
      w_i: (dout_i, din_i)  float32  (PyTorch F.linear layout; w0 pre-folded
                                      into sine-layer weights)
      b_i: (dout_i, 1)      float32  (w0 pre-folded for sine layers)
    out_ref block: (1, dim_out, TILE)
    apply_sin[i] is True for sine-activated layers, False for the final
    identity layer.
    """
    out_ref = refs[-1]
    wb = refs[:-1]
    h = x_ref[0].astype(jnp.float32)                     # (din, TILE)
    for i, do_sin in enumerate(apply_sin):
        w = wb[2 * i][...]                               # (dout, din)
        b = wb[2 * i + 1][...]                           # (dout, 1) broadcasts over lanes
        h = jnp.dot(w, h, preferred_element_type=jnp.float32) + b
        if do_sin:
            h = jnp.sin(h)                               # EUP; w0 already folded into w, b
    out_ref[0] = h.astype(out_ref.dtype)


# ----------------------------- wrapper -------------------------------------- #

def siren_mlp(x, weights, biases, w0s, *, tile=8192):
    """Apply the SIREN MLP with spatial on lanes.

    x:        (bs, dim_in, S) float32   (S = lat*lon)
    weights:  list of (dout_i, din_i) arrays (PyTorch F.linear convention)
    biases:   list of (dout_i,) arrays
    w0s:      per-layer sine frequencies (None => identity activation)
    returns:  (bs, dim_out, S) float32
    """
    bs, din, S = x.shape
    dim_out = weights[-1].shape[0]

    # Glue on tiny parameter tensors: fold w0 into sine-layer params
    # (sin(w0*(Wx+b)) == sin((w0*W)x + (w0*b))) and make biases column vectors
    # so they broadcast across the spatial (lane) axis.
    flat_params = []
    apply_sin = []
    for w, b, w0 in zip(weights, biases, w0s):
        w = jnp.asarray(w, jnp.float32)
        b = jnp.asarray(b, jnp.float32).reshape(-1, 1)
        if w0 is not None:
            w = w0 * w
            b = w0 * b
            apply_sin.append(True)
        else:
            apply_sin.append(False)
        flat_params.extend([w, b])

    # Spatial (lane) tile: full axis when it fits, otherwise a 128-aligned tile.
    # Partial trailing blocks are handled by Pallas edge masking (pointwise over
    # lanes, so padded lanes never pollute valid output).
    tile_s = S if S <= tile else tile
    grid = (bs, pl.cdiv(S, tile_s))

    in_specs = [pl.BlockSpec((1, din, tile_s), lambda b_, s_: (b_, 0, s_))]
    for p in flat_params:
        # Constant index_map -> Pallas only DMAs these small params once.
        in_specs.append(pl.BlockSpec(p.shape, lambda b_, s_: (0, 0)))

    kernel = functools.partial(_siren_mlp_kernel, tuple(apply_sin))

    return pl.pallas_call(
        kernel,
        out_shape=jax.ShapeDtypeStruct((bs, dim_out, S), jnp.float32),
        grid_spec=pltpu.PrefetchScalarGridSpec(
            num_scalar_prefetch=0,
            grid=grid,
            in_specs=in_specs,
            out_specs=pl.BlockSpec((1, dim_out, tile_s),
                                   lambda b_, s_: (b_, 0, s_)),
        ),
        compiler_params=pltpu.CompilerParams(
            dimension_semantics=("parallel", "parallel")),
    )(x, *flat_params)


# ------------------------------ forward ------------------------------------- #

def siren_state_forward(state, weights, biases, w0s, *, tile=8192):
    """SirenState.forward: (bs, t, lat, lon) -> (bs, dim_out, lat, lon).

    No host-side transposes: the NCHW per-batch slab is already (t, lat*lon),
    i.e. exactly the (features, spatial) layout the kernel consumes, and the
    kernel writes (dim_out, lat*lon) which is already the NCHW output layout.
    """
    bs, t, lat, lon = state.shape
    dim_out = weights[-1].shape[0]
    x = state.reshape(bs, t, lat * lon)
    y = siren_mlp(x, weights, biases, w0s, tile=tile)
    return y.reshape(bs, dim_out, lat, lon)


# -------------------------- parameter init ---------------------------------- #

def init_siren_net_params(key, dim_in, dim_hidden, dim_out, num_layers,
                          w0=1.0, w0_initial=30.0, c=6.0):
    """Deterministic init matching SirenNet.__init__ (uniform(-w_std, w_std))."""
    weights, biases, w0s = [], [], []
    layer_dims = []
    for ind in range(num_layers):
        is_first = ind == 0
        layer_w0 = w0_initial if is_first else w0
        layer_din = dim_in if is_first else dim_hidden
        layer_dims.append((layer_din, dim_hidden, layer_w0, is_first))
    layer_dims.append((dim_hidden, dim_out, w0, False))   # last layer: identity act

    for (din, dout, layer_w0, is_first) in layer_dims:
        key, kw, kb = jax.random.split(key, 3)
        w_std = (1.0 / din) if is_first else (math.sqrt(c / din) / layer_w0)
        w = jax.random.uniform(kw, (dout, din), jnp.float32, -w_std, w_std)
        b = jax.random.uniform(kb, (dout,), jnp.float32, -w_std, w_std)
        weights.append(w)
        biases.append(b)
        w0s.append(layer_w0)
    act_w0s = w0s[:-1] + [None]   # hidden layers: Sine(w0); last: Identity
    return weights, biases, act_w0s


# -------------------------- pure-JAX reference ------------------------------- #

def siren_state_ref(state, weights, biases, w0s):
    bs, t, lat, lon = state.shape
    x = jnp.transpose(state, (0, 2, 3, 1))
    h = x.astype(jnp.float32)
    for w, b, w0 in zip(weights, biases, w0s):
        h = h @ w.T + b
        if w0 is not None:
            h = jnp.sin(w0 * h)
    return jnp.transpose(h, (0, 3, 1, 2))


# --------------------------------- main -------------------------------------- #

if __name__ == "__main__":
    # hparams: shape_state = (4, 16, 16), shape_data[0] = 4,
    #          siren_dim_hidden = 32, siren_num_layers = 3
    # TODO(synk): the optional `siren_state_with_pos` positional-coordinate branch
    # (off by default) is not implemented; `state_init` is an unused parameter in
    # forward and is constructed only for parity with the module.
    bs, t, lat, lon = 2, 4, 16, 16
    dim_hidden, dim_out, num_layers = 32, 4, 3

    key = jax.random.PRNGKey(0)
    key, k_state, k_params = jax.random.split(key, 3)

    # self.state_init = nn.Parameter(torch.rand(shape_state))  (unused in forward)
    state_init = jax.random.uniform(k_state, (t, lat, lon), jnp.float32)

    weights, biases, w0s = init_siren_net_params(
        k_params, dim_in=t, dim_hidden=dim_hidden, dim_out=dim_out,
        num_layers=num_layers, w0=1.0, w0_initial=30.0, c=6.0)

    key, k_in = jax.random.split(key)
    state = jax.random.normal(k_in, (bs, t, lat, lon), jnp.float32)

    out = siren_state_forward(state, weights, biases, w0s)
    out = jax.block_until_ready(out)

    ref = siren_state_ref(state, weights, biases, w0s)
    assert out.shape == (bs, dim_out, lat, lon)
    # Slightly looser tolerance than bit-exact: folding w0 into W/b reassociates
    # the sine arguments (sin(30x) amplifies ~1-ulp input differences).
    assert jnp.allclose(out, ref, atol=1e-4, rtol=1e-4), float(
        jnp.max(jnp.abs(out - ref)))

    print("KERNEL_OK")
</pallas_src>

<mosaic_0001>
module attributes {stable_mosaic.version = 11 : i64} {
  func.func @_siren_mlp_kernel(%arg0: i32, %arg1: i32, %arg2: memref<1x4x256xf32, #tpu.memory_space<vmem>>, %arg3: memref<32x4xf32, #tpu.memory_space<vmem>>, %arg4: memref<32x1xf32, #tpu.memory_space<vmem>>, %arg5: memref<32x32xf32, #tpu.memory_space<vmem>>, %arg6: memref<32x1xf32, #tpu.memory_space<vmem>>, %arg7: memref<32x32xf32, #tpu.memory_space<vmem>>, %arg8: memref<32x1xf32, #tpu.memory_space<vmem>>, %arg9: memref<4x32xf32, #tpu.memory_space<vmem>>, %arg10: memref<4x1xf32, #tpu.memory_space<vmem>>, %arg11: memref<1x4x256xf32, #tpu.memory_space<vmem>>) attributes {dimension_semantics = [#tpu.dimension_semantics<parallel>, #tpu.dimension_semantics<parallel>], iteration_bounds = array<i64: 2, 1>, scalar_prefetch = 0 : i64, scratch_operands = 0 : i64, tpu.core_type = #tpu.core_type<tc>, window_params = [{transform_indices = @transform_0, window_bounds = array<i64: 1, 4, 256>}, {pipeline_mode = #tpu.pipeline_mode<synchronous>, transform_indices = @transform_1, window_bounds = array<i64: 32, 4>}, {pipeline_mode = #tpu.pipeline_mode<synchronous>, transform_indices = @transform_2, window_bounds = array<i64: 32, 1>}, {pipeline_mode = #tpu.pipeline_mode<synchronous>, transform_indices = @transform_3, window_bounds = array<i64: 32, 32>}, {pipeline_mode = #tpu.pipeline_mode<synchronous>, transform_indices = @transform_4, window_bounds = array<i64: 32, 1>}, {pipeline_mode = #tpu.pipeline_mode<synchronous>, transform_indices = @transform_5, window_bounds = array<i64: 32, 32>}, {pipeline_mode = #tpu.pipeline_mode<synchronous>, transform_indices = @transform_6, window_bounds = array<i64: 32, 1>}, {pipeline_mode = #tpu.pipeline_mode<synchronous>, transform_indices = @transform_7, window_bounds = array<i64: 4, 32>}, {pipeline_mode = #tpu.pipeline_mode<synchronous>, transform_indices = @transform_8, window_bounds = array<i64: 4, 1>}, {transform_indices = @transform_9, window_bounds = array<i64: 1, 4, 256>}]} {
    %c0 = arith.constant 0 : index
    %c0_0 = arith.constant 0 : index
    %c0_1 = arith.constant 0 : index
    %0 = vector.load %arg2[%c0, %c0_0, %c0_1] : memref<1x4x256xf32, #tpu.memory_space<vmem>>, vector<1x4x256xf32>
    %1 = vector.shape_cast %0 : vector<1x4x256xf32> to vector<4x256xf32>
    %c0_2 = arith.constant 0 : index
    %c0_3 = arith.constant 0 : index
    %2 = vector.load %arg3[%c0_2, %c0_3] : memref<32x4xf32, #tpu.memory_space<vmem>>, vector<32x4xf32>
    %c0_4 = arith.constant 0 : index
    %c0_5 = arith.constant 0 : index
    %3 = vector.load %arg4[%c0_4, %c0_5] : memref<32x1xf32, #tpu.memory_space<vmem>>, vector<32x1xf32>
    %cst = arith.constant dense<0.000000e+00> : vector<32x256xf32>
    %4 = tpu.matmul %2, %1, %cst {dimension_numbers = #tpu.dot_dimension_numbers<[1], [0], [0], [1], [0, 0, 1, 1], [], []>} : vector<32x4xf32>, vector<4x256xf32>, vector<32x256xf32> -> vector<32x256xf32>
    %5 = vector.broadcast %3 : vector<32x1xf32> to vector<32x256xf32>
    %6 = arith.addf %4, %5 : vector<32x256xf32>
    %7 = math.sin %6 : vector<32x256xf32>
    %c0_6 = arith.constant 0 : index
    %c0_7 = arith.constant 0 : index
    %8 = vector.load %arg5[%c0_6, %c0_7] : memref<32x32xf32, #tpu.memory_space<vmem>>, vector<32x32xf32>
    %c0_8 = arith.constant 0 : index
    %c0_9 = arith.constant 0 : index
    %9 = vector.load %arg6[%c0_8, %c0_9] : memref<32x1xf32, #tpu.memory_space<vmem>>, vector<32x1xf32>
    %cst_10 = arith.constant dense<0.000000e+00> : vector<32x256xf32>
    %10 = tpu.matmul %8, %7, %cst_10 {dimension_numbers = #tpu.dot_dimension_numbers<[1], [0], [0], [1], [0, 0, 1, 1], [], []>} : vector<32x32xf32>, vector<32x256xf32>, vector<32x256xf32> -> vector<32x256xf32>
    %11 = vector.broadcast %9 : vector<32x1xf32> to vector<32x256xf32>
    %12 = arith.addf %10, %11 : vector<32x256xf32>
    %13 = math.sin %12 : vector<32x256xf32>
    %c0_11 = arith.constant 0 : index
    %c0_12 = arith.constant 0 : index
    %14 = vector.load %arg7[%c0_11, %c0_12] : memref<32x32xf32, #tpu.memory_space<vmem>>, vector<32x32xf32>
    %c0_13 = arith.constant 0 : index
    %c0_14 = arith.constant 0 : index
    %15 = vector.load %arg8[%c0_13, %c0_14] : memref<32x1xf32, #tpu.memory_space<vmem>>, vector<32x1xf32>
    %cst_15 = arith.constant dense<0.000000e+00> : vector<32x256xf32>
    %16 = tpu.matmul %14, %13, %cst_15 {dimension_numbers = #tpu.dot_dimension_numbers<[1], [0], [0], [1], [0, 0, 1, 1], [], []>} : vector<32x32xf32>, vector<32x256xf32>, vector<32x256xf32> -> vector<32x256xf32>
    %17 = vector.broadcast %15 : vector<32x1xf32> to vector<32x256xf32>
    %18 = arith.addf %16, %17 : vector<32x256xf32>
    %19 = math.sin %18 : vector<32x256xf32>
    %c0_16 = arith.constant 0 : index
    %c0_17 = arith.constant 0 : index
    %20 = vector.load %arg9[%c0_16, %c0_17] : memref<4x32xf32, #tpu.memory_space<vmem>>, vector<4x32xf32>
    %c0_18 = arith.constant 0 : index
    %c0_19 = arith.constant 0 : index
    %21 = vector.load %arg10[%c0_18, %c0_19] : memref<4x1xf32, #tpu.memory_space<vmem>>, vector<4x1xf32>
    %cst_20 = arith.constant dense<0.000000e+00> : vector<4x256xf32>
    %22 = tpu.matmul %20, %19, %cst_20 {dimension_numbers = #tpu.dot_dimension_numbers<[1], [0], [0], [1], [0, 0, 1, 1], [], []>} : vector<4x32xf32>, vector<32x256xf32>, vector<4x256xf32> -> vector<4x256xf32>
    %23 = vector.broadcast %21 : vector<4x1xf32> to vector<4x256xf32>
    %24 = arith.addf %22, %23 : vector<4x256xf32>
    %c0_21 = arith.constant 0 : index
    %c0_22 = arith.constant 0 : index
    %c0_23 = arith.constant 0 : index
    %25 = vector.load %arg11[%c0_21, %c0_22, %c0_23] : memref<1x4x256xf32, #tpu.memory_space<vmem>>, vector<1x4x256xf32>
    %26 = vector.shape_cast %25 : vector<1x4x256xf32> to vector<4x256xf32>
    %27 = vector.shape_cast %24 : vector<4x256xf32> to vector<1x4x256xf32>
    tpu.vector_store %arg11[%c0_21, %c0_22, %c0_23], %27 {strides = array<i32>} : memref<1x4x256xf32, #tpu.memory_space<vmem>>, vector<1x4x256xf32>,
    return
  }
  func.func @transform_0(%arg0: i32, %arg1: i32) -> (i32, i32, i32) {
    %c0_i32 = arith.constant 0 : i32
    %c0_i32_0 = arith.constant 0 : i32
    return %arg0, %c0_i32, %arg1 : i32, i32, i32
  }
  func.func @transform_1(%arg0: i32, %arg1: i32) -> (i32, i32) {
    %c0_i32 = arith.constant 0 : i32
    %c0_i32_0 = arith.constant 0 : i32
    %c0_i32_1 = arith.constant 0 : i32
    return %c0_i32, %c0_i32_0 : i32, i32
  }
  func.func @transform_2(%arg0: i32, %arg1: i32) -> (i32, i32) {
    %c0_i32 = arith.constant 0 : i32
    %c0_i32_0 = arith.constant 0 : i32
    %c0_i32_1 = arith.constant 0 : i32
    return %c0_i32, %c0_i32_0 : i32, i32
  }
  func.func @transform_3(%arg0: i32, %arg1: i32) -> (i32, i32) {
    %c0_i32 = arith.constant 0 : i32
    %c0_i32_0 = arith.constant 0 : i32
    %c0_i32_1 = arith.constant 0 : i32
    return %c0_i32, %c0_i32_0 : i32, i32
  }
  func.func @transform_4(%arg0: i32, %arg1: i32) -> (i32, i32) {
    %c0_i32 = arith.constant 0 : i32
    %c0_i32_0 = arith.constant 0 : i32
    %c0_i32_1 = arith.constant 0 : i32
    return %c0_i32, %c0_i32_0 : i32, i32
  }
  func.func @transform_5(%arg0: i32, %arg1: i32) -> (i32, i32) {
    %c0_i32 = arith.constant 0 : i32
    %c0_i32_0 = arith.constant 0 : i32
    %c0_i32_1 = arith.constant 0 : i32
    return %c0_i32, %c0_i32_0 : i32, i32
  }
  func.func @transform_6(%arg0: i32, %arg1: i32) -> (i32, i32) {
    %c0_i32 = arith.constant 0 : i32
    %c0_i32_0 = arith.constant 0 : i32
    %c0_i32_1 = arith.constant 0 : i32
    return %c0_i32, %c0_i32_0 : i32, i32
  }
  func.func @transform_7(%arg0: i32, %arg1: i32) -> (i32, i32) {
    %c0_i32 = arith.constant 0 : i32
    %c0_i32_0 = arith.constant 0 : i32
    %c0_i32_1 = arith.constant 0 : i32
    return %c0_i32, %c0_i32_0 : i32, i32
  }
  func.func @transform_8(%arg0: i32, %arg1: i32) -> (i32, i32) {
    %c0_i32 = arith.constant 0 : i32
    %c0_i32_0 = arith.constant 0 : i32
    %c0_i32_1 = arith.constant 0 : i32
    return %c0_i32, %c0_i32_0 : i32, i32
  }
  func.func @transform_9(%arg0: i32, %arg1: i32) -> (i32, i32, i32) {
    %c0_i32 = arith.constant 0 : i32
    %c0_i32_0 = arith.constant 0 : i32
    return %arg0, %c0_i32, %arg1 : i32, i32, i32
  }
}

</mosaic_0001>

<bundles_post_ra>
// kernel: tpu_custom_call.1
= control target key start
LH: loop header
LB: loop body
LE: loop exit
PB: predicated region body
PF: predicated region fallthrough
CT: control target
= control target key end

     0   :  { %14 = vsyncpa [#allocation3], 0  ;;  %s8441_s0 = inlined_call_operand.vmem [shape: f32[2,4,256], index: 0, kind: input, shape index: {}]   ;;  %s8442_s1 = inlined_call_operand.vmem [shape: f32[32,4], index: 1, kind: input, shape index: {}]   ;;  %s8443_s2 = inlined_call_operand.vmem [shape: f32[32,1], index: 2, kind: input, shape index: {}]   ;;  %s8444_s3 = inlined_call_operand.vmem [shape: f32[32,32], index: 3, kind: input, shape index: {}]   ;;  %s8445_s4 = inlined_call_operand.vmem [shape: f32[32,1], index: 4, kind: input, shape index: {}]   ;;  %s8446_s5 = inlined_call_operand.vmem [shape: f32[32,32], index: 5, kind: input, shape index: {}]   ;;  %s8447_s6 = inlined_call_operand.vmem [shape: f32[32,1], index: 6, kind: input, shape index: {}]   ;;  %s8448_s7 = inlined_call_operand.vmem [shape: f32[4,32], index: 7, kind: input, shape index: {}]   ;;  %s8449_s8 = inlined_call_operand.vmem [shape: f32[4,1], index: 8, kind: input, shape index: {}]   ;;  %s8450_s9 = inlined_call_operand.hbm [shape: f32[2,4,256], index: 9, kind: output, shape index: {}]  }
   0x1   :  { %16 = vsyncpa [#allocation3 + $0x1], 0  ;;  %s4858_s30 = smov 0   ;;  %s4860_s10 = smov 0  }
   0x2   :  { %s4862_s11 = smov 0   ;;  %s4864_s12 = smov 0  }
   0x3   :  { %s4866_s13 = smov 0   ;;  %s4868_s14 = smov 0  }
   0x4 LB: > { %s4539_s15 = sadd.s32 4294967295, %s4799_s14   ;;  %s4540_s16 = sadd.s32 4294967294, %s4799_s14   ;;  %s4799_s14 = sphi %s4868_s14, %s22_s14   ;;  %s4795_s13 = sphi %s4866_s13, %s8901_s13   ;;  %s4791_s12 = sphi %s4864_s12, %s8900_s12   ;;  %s4787_s11 = sphi %s4862_s11, %s8899_s11   ;;  %s4783_s10 = sphi %s4860_s10, %s8898_s10   ;;  %s4779_s30 = sphi %s4858_s30, %s8897_s30  }
   0x5   : > { %s34_s17 = sadd.s32 1, %s4795_s13  ;;  %s239_s18 = sadd.s32 1, %s4787_s11 }
   0x6   : > { %p36_p0 = scmp.ge.s32.totalorder %s34_s17, 2  ;;  %p249_p1 = scmp.ne.s32.totalorder %s4787_s11, %s4783_s10 }
   0x7   : > { %p250_p2 = scmp.eq.s32.totalorder %s4539_s15, 1  ;;  %p255_p3 = scmp.ne.s32.totalorder %s4783_s10, %s4779_s30 }
   0x8   : > { %s8903_s17 = smov (%p36_p0, %s34_s17), 0  ;;  %p256_p5 = scmp.eq.s32.totalorder %s4540_s16, 1 }
   0x9   : > { %p4898_p4 = por %p250_p2, %p249_p1  ;;  %s234_s20 = ssub.s32 %s4795_s13, %s8903_s17 }
   0xa   : > { %p4543_p6 = scmp.ge.s32.totalorder %s4799_s14, 1  ;;  %p237_p7 = scmp.eq.s32.totalorder %s234_s20, 0 }
   0xb   : > { %p4905_p8 = por %p256_p5, %p255_p3  ;;  %p311_p9 = scmp.lt.s32.totalorder %s4799_s14, 3 }
   0xc   : > { %s4911_s22 = scalar_select %p237_p7, %s4787_s11, %s239_s18  }
   0xd   : > { %p312_p10 = pnand %p4543_p6, %p311_p9 }
   0xf   : > { %315 = sbr.rel (%p312_p10) target bundleno = 1567 (0x61f), region = 56 }
  0x14   : > { %v370_v0 = vld [vmem:[%s8443_s2 + $0x18] sm:$0xff]  ;;  %v368_v1 = vld [vmem:[%s8443_s2 + $0x8] sm:$0xff]  ;;  %p352_p11 = scmp.lt.s32.totalorder %s4791_s12, 1  ;;  %v8460_v2 = vmov 0   ;;  %v369_v4 = vld [vmem:[%s8443_s2 + $0x10] sm:$0xff]  ;;  %vm8557_vm0 = vcmask 1043456  }
  0x15   : > { %4718 = vset.pattern.permute.xlu0 %v8460_v2  ;;  %4719 = vset.pattern.permute.xlu1 %v8460_v2  ;;  %v367_v5 = vld [vmem:[%s8443_s2] sm:$0xff]  ;;  %vm395_vm1 = vcmask 31744   ;;  %v366_v7 = vld [vmem:[%s8442_s1 + $0x18] sm:$0xff]  ;;  %v1716_v10 = vld [vmem:[%s8445_s4 + $0x8] sm:$0xff]  ;;  %s348_s25 = sand.u32 1, %s4783_s10  }
  0x16   : > { %388 = vperm.xlu0 %4718, %v370_v0   ;;  %378 = vperm.xlu1 %4719, %v368_v1   ;;  %s353_s27 = scalar_select %p352_p11, %s4791_s12, 1  ;;  %v363_v6 = vld [vmem:[%s8442_s1] sm:$0xff]  ;;  %v364_v12 = vld [vmem:[%s8442_s1 + $0x8] sm:$0xff]  ;;  %v3056_v13 = vld [vmem:[%s8447_s6 + $0x10] sm:$0xff] }
  0x17   : > { %4720 = vset.pattern.permute.xlu2 %v8460_v2  ;;  %v1715_v11 = vld [vmem:[%s8445_s4] sm:$0xff]  ;;  %v3055_v14 = vld [vmem:[%s8447_s6 + $0x8] sm:$0xff]  ;;  %v365_v15 = vld [vmem:[%s8442_s1 + $0x10] sm:$0xff]  ;;  %s4544_s26 = sshll.u32 %s348_s25, 3 }
  0x18   : > { %s4652_s28 = sshll.u32 %s353_s27, 3  ;;  %v4389_v16 = vld [vmem:[%s8449_s8] sm:$0xf]  ;;  %s4653_s27 = sshll.u32 %s4791_s12, 3 }
  0x19   : > { %s359_s16 = scalar_lea.vmem %s8441_s0, %s4652_s28  ;;  %s4458_s15 = scalar_lea.hbm %s8450_s9, %s4653_s27 }
  0x1a   : > { %v362_v3 = vld [vmem:[%s359_s16] sm:$0xff]  ;;  %s350_s16 = scalar_lea.vmem [#allocation2], %s4544_s26  ;;  %s4462_s20 = sshll.u32 %s4458_s15, 4  ;;  %s4463_s20 = int_to_ptr.hbm [resolvable:$true] %s4462_s20 }
  0x1b   : > { %392 = vst [vmem:[#allocation1] ss:$2 sm:$0xff] %v362_v3  ;;  %s4460_s18 = sshll.u32 %s350_s16, 4  ;;  %s4445_s12 = scalar_lea.sflag [#allocation3], %s348_s25  ;;  %s4461_s18 = int_to_ptr.vmem [resolvable:$true] %s4460_s18 }
  0x1c   : > { %s4735_s23 = sshra.s32 %s4463_s20, 4  ;;  %s4741_s26 = scalar_lea.hbm %s8450_s9, 16  ;;  %s4736_s23 = int_to_ptr.hbm [resolvable:$true] %s4735_s23 }
  0x1d   : > { %s4737_s24 = scalar_lea.hbm %s4736_s23, 8  ;;  %p4742_p1 = scmp.lt.s32.totalorder %s4736_s23, %s8450_s9 }
  0x1e   : > { %383 = vperm.xlu0 %4718, %v369_v4   ;;  %373 = vperm.xlu1 %4719, %v367_v5   ;;  %p4738_p12 = scmp.ne.s32.totalorder %s4736_s23, %s4737_s24  ;;  %p4743_p2 = scmp.lt.s32.totalorder %s4741_s26, %s4737_s24 }
  0x20   : > { %p4739_p13 = pnand %p4738_p12, %p4898_p4  ;;  %p4744_p3 = por %p4743_p2, %p4742_p1 }
  0x22   : > { %v393_v8 = vld.sshfl [vmem:[#allocation1] sm:$0xff pattern:$0x75316420]  ;;  %v394_v9 = vld.sshfl [vmem:[#allocation1 + $0x8] sm:$0xff pattern:$0x75316420]  ;;  %p4740_p0 = pneg %p4739_p13 }
  0x23   : > { %4547 = vmatpush.msk.msra.mxu0 %vm8557_vm0, %v393_v8  ;;  %4654 = vmatpush.msk.msra.mxu2 %vm8557_vm0, %v393_v8 }
  0x24   : > { %4552 = vmatpush.msk.msra.mxu1 %vm8557_vm0, %v394_v9  ;;  %4655 = vmatpush.msk.msra.mxu3 %vm8557_vm0, %v394_v9  ;;  %p4745_p5 = pnand %p4744_p3, %p4740_p0 }
  0x25   : > { %4548 = vmatmul.msk.f32.vlgmr.msra.gmra.mxu0 %vm395_vm1, %v363_v6  ;;  %4551 = vmatmul.msk.f32.vlgmr.msra.gmra.mxu2 %vm395_vm1, %v366_v7 }
  0x26   : > { %4553 = vmatmul.msk.f32.vlgmr.msra.gmra.mxu1 %vm395_vm1, %v363_v6  ;;  %4556 = vmatmul.msk.f32.vlgmr.msra.gmra.mxu3 %vm395_vm1, %v366_v7 }
  0x27   : > { %1726 = vperm.xlu0 %4718, %v1716_v10   ;;  %1721 = vperm.xlu1 %4719, %v1715_v11  }
  0x2d   : > { %4549 = vmatmul.msk.f32.gmra.mxu0 %vm395_vm1, %v364_v12 }
  0x2e   : > { %4554 = vmatmul.msk.f32.gmra.mxu1 %vm395_vm1, %v364_v12  ;;  %v8454_v12 = vmov 2102212464  }
  0x2f   : > { %3070 = vperm.xlu0 %4718, %v3056_v13   ;;  %3065 = vperm.xlu1 %4719, %v3055_v14   ;;  %v8465_v14 = vmov 920167782  }
  0x35   : > { %4550 = vmatmul.msk.f32.gmra.mxu0 %vm395_vm1, %v365_v15 }
  0x36   : > { %4555 = vmatmul.msk.f32.gmra.mxu1 %vm395_vm1, %v365_v15 }
  0x37   : > { %4392 = vperm.xlu0 %4718, %v4389_v16  }
  0x88   : > { %v379_v17 = vpop.permute.xlu1 %378  ;;  %v389_v24 = vpop.permute.xlu0 %388 }
  0x90   : > { %v374_v18 = vpop.permute.xlu1 %373  ;;  %v384_v59 = vpop.permute.xlu0 %383 }
  0xa2   : > { %v430_v19 = vpop.f32.mrf.mxu0 }
  0xa3   : > { %v4972_v20 = vadd.f32 %v430_v19, %v374_v18  ;;  %v459_v21 = vpop.f32.mrf.mxu1 }
  0xa4   : > { %v4975_v23 = vadd.f32 %v459_v21, %v374_v18 }
  0xa5   : > { %8602 = vst [vmem:[#allocation5_spill] sm:$0xff] %v4972_v20  ;;  %v474_v22 = vand.u32 2139095040, %v4972_v20 }
  0xa6   : > { %8603 = vst [vmem:[#allocation6_spill] sm:$0xff] %v4975_v23  ;;  %v629_v29 = vand.u32 2139095040, %v4975_v23 }
  0xa7   : > { %v475_v25 = vshrl.u32 %v474_v22, 23 }
  0xa8   : > { %v439_v26 = vpop.f32.mrf.mxu2  ;;  %v630_v37 = vshrl.u32 %v629_v29, 23  ;;  %v8471_v29 = vmov 1326507024  }
  0xa9   : > { %v4977_v27 = vadd.f32 %v439_v26, %v389_v24  ;;  %v468_v28 = vpop.f32.mrf.mxu3  ;;  %v4557_v34 = vadd.s32 4294967169, %v475_v25 }
  0xaa   : > { %v4980_v30 = vadd.f32 %v468_v28, %v389_v24  ;;  %v433_v31 = vpop.f32.mrf.mxu0  ;;  %v4560_v45 = vadd.s32 4294967169, %v630_v37 }
  0xab   : > { %v1404_v32 = vand.u32 2139095040, %v4977_v27  ;;  %v4983_v33 = vadd.f32 %v433_v31, %v379_v17  ;;  %v462_v39 = vpop.f32.mrf.mxu1  ;;  %v481_v42 = vadd.s32 1, %v4557_v34  ;;  %v8451_v10 = vand.u32 2147483647, %v4977_v27 }
  0xac   : > { %v1559_v35 = vand.u32 2139095040, %v4980_v30  ;;  %v4987_v44 = vadd.f32 %v462_v39, %v379_v17  ;;  %v636_v50 = vadd.s32 1, %v4560_v45 }
  0xad   : > { %8604 = vst [vmem:[#allocation7_spill] sm:$0xff] %v4983_v33  ;;  %v1405_v36 = vshrl.u32 %v1404_v32, 23  ;;  %v784_v41 = vand.u32 2139095040, %v4983_v33  ;;  %vm482_vm2 = vcmp.gt.s32.totalorder %v481_v42, 0 }
  0xae   : > { %v1560_v38 = vshrl.u32 %v1559_v35, 23  ;;  %8605 = vst [vmem:[#allocation8_spill] sm:$0xff] %v4987_v44  ;;  %v939_v49 = vand.u32 2139095040, %v4987_v44  ;;  %v483_v52 = vsel %vm482_vm2, %v481_v42, 0  ;;  %vm637_vm5 = vcmp.gt.s32.totalorder %v636_v50, 0 }
  0xaf   : > { %v4575_v40 = vadd.s32 4294967169, %v1405_v36  ;;  %v785_v48 = vshrl.u32 %v784_v41, 23  ;;  %v4992_v58 = vand.u32 31, %v483_v52  ;;  %v638_v1 = vsel %vm637_vm5, %v636_v50, 0 }
  0xb0   : > { %v4578_v43 = vadd.s32 4294967169, %v1560_v38  ;;  %v940_v56 = vshrl.u32 %v939_v49, 23  ;;  %v5007_v8 = vshrl.u32 %v483_v52, 5  ;;  %v5013_v11 = vshrl.u32 %v638_v1, 5 }
  0xb1   : > { %v1411_v46 = vadd.s32 1, %v4575_v40  ;;  %v4563_v53 = vadd.s32 4294967169, %v785_v48  ;;  %8606 = vst [vmem:[#allocation9_spill] sm:$0xff] %v4992_v58  ;;  %v5002_v4 = vsub.s32 32, %v4992_v58  ;;  %v497_v17 = vshll.u32 %v8454_v12, %v4992_v58 }
  0xb2   : > { %v1566_v47 = vadd.s32 1, %v4578_v43  ;;  %v436_v57 = vpop.f32.mrf.mxu0  ;;  %v4566_v3 = vadd.s32 4294967169, %v940_v56  ;;  %8608 = vst [vmem:[#allocation11_spill] sm:$0xff] %v5007_v8  ;;  %v5021_v18 = vand.u32 31, %v638_v1  ;;  %v5040_v35 = vshll.u32 %v8465_v14, %v4992_v58 }
  0xb3   : > { %vm1412_vm3 = vcmp.gt.s32.totalorder %v1411_v46, 0  ;;  %v791_v61 = vadd.s32 1, %v4563_v53  ;;  %v465_v62 = vpop.f32.mrf.mxu1  ;;  %v4999_v0 = vadd.f32 %v436_v57, %v384_v59  ;;  %8607 = vst [vmem:[#allocation10_spill] sm:$0xff] %v5002_v4  ;;  %v498_v22 = vshrl.u32 %v8465_v14, %v5002_v4 }
  0xb4   : > { %vm1567_vm4 = vcmp.gt.s32.totalorder %v1566_v47, 0  ;;  %v1413_v51 = vsel %vm1412_vm3, %v1411_v46, 0  ;;  %v5005_v7 = vadd.f32 %v465_v62, %v384_v59  ;;  %8609 = vst [vmem:[#allocation12_spill] sm:$0xff] %v5013_v11  ;;  %v946_v21 = vadd.s32 1, %v4566_v3 }
  0xb5   : > { %v4990_v54 = vand.u32 31, %v1413_v51  ;;  %v1568_v55 = vsel %vm1567_vm4, %v1566_v47, 0  ;;  %vm792_vm6 = vcmp.gt.s32.totalorder %v791_v61, 0  ;;  %v1094_v6 = vand.u32 2139095040, %v4999_v0  ;;  %8610 = vst [vmem:[#allocation13_spill] sm:$0xff] %v5021_v18 }
  0xb6   : > { %v4994_v60 = vand.u32 31, %v1568_v55  ;;  %v793_v5 = vsel %vm792_vm6, %v791_v61, 0  ;;  %v5027_v24 = vshrl.u32 %v1413_v51, 5  ;;  %v1249_v26 = vand.u32 2139095040, %v5005_v7  ;;  %8612 = vst [vmem:[#allocation15_spill] sm:$0xff] %v5040_v35 }
  0xb7   : > { %v4997_v63 = vsub.s32 32, %v4990_v54  ;;  %v1427_v13 = vshll.u32 %v8454_v12, %v4990_v54  ;;  %v1095_v16 = vshrl.u32 %v1094_v6, 23  ;;  %v5023_v19 = vand.u32 31, %v793_v5 }
  0xb8   : > { %v5010_v9 = vsub.s32 32, %v4994_v60  ;;  %v1430_v28 = vshll.u32 %v8465_v14, %v4990_v54  ;;  %v1582_v32 = vshll.u32 %v8454_v12, %v4994_v60  ;;  %v1585_v37 = vshll.u32 %v8465_v14, %v4994_v60 }
  0xb9   : > { %v1428_v15 = vshrl.u32 %v8465_v14, %v4997_v63  ;;  %8611 = vst [vmem:[#allocation14_spill] sm:$0xff] %v5023_v19  ;;  %v4569_v25 = vadd.s32 4294967169, %v1095_v16  ;;  %v1431_v31 = vshrl.u32 %v8471_v29, %v4997_v63  ;;  %v5049_v39 = vsub.s32 32, %v5023_v19 }
  0xba   : > { %v1583_v34 = vshrl.u32 %v8465_v14, %v5010_v9  ;;  %v1586_v38 = vshrl.u32 %v8471_v29, %v5010_v9  ;;  %vm947_vm7 = vcmp.gt.s32.totalorder %v946_v21, 0  ;;  %v1250_v41 = vshrl.u32 %v1249_v26, 23 }
  0xbb   : > { %v5042_v36 = vor.u32 %v1428_v15, %v1427_v13  ;;  %8613 = vst [vmem:[#allocation16_spill] sm:$0xff] %v5049_v39  ;;  %v1101_v40 = vadd.s32 1, %v4569_v25  ;;  %v5051_v42 = vor.u32 %v498_v22, %v497_v17  ;;  %v5055_v43 = vshrl.u32 %v8471_v29, %v5002_v4 }
  0xbc   : > { %v5058_v45 = vsub.s32 32, %v5021_v18  ;;  %v5062_v46 = vshll.u32 %v8454_v12, %v5021_v18  ;;  %v1432_v47 = vor.u32 %v1431_v31, %v1430_v28  ;;  %vm1436_vm8 = vcmp.lt.s32.totalorder %v5027_v24, 4 }
  0xbd   : > { %8614 = vst [vmem:[#allocation17_spill] sm:$0xff] %v5051_v42  ;;  %v5065_v48 = vshrl.u32 %v1568_v55, 5  ;;  %v5067_v49 = vor.u32 %v1583_v34, %v1582_v32  ;;  %v1442_v50 = vsel %vm1436_vm8, %v5042_v36, 920167782  ;;  %v1587_v51 = vor.u32 %v1586_v38, %v1585_v37 }
  0xbe   : > { %8615 = vst [vmem:[#allocation18_spill] sm:$0xff] %v5055_v43  ;;  %v5072_v52 = vshrl.u32 %v793_v5, 5  ;;  %v948_v53 = vsel %vm947_vm7, %v946_v21, 0  ;;  %v807_v56 = vshll.u32 %v8454_v12, %v5023_v19  ;;  %v808_v57 = vshrl.u32 %v8465_v14, %v5049_v39 }
  0xbf   : > { %8616 = vst [vmem:[#allocation19_spill] sm:$0xff] %v5058_v45  ;;  %vm1102_vm9 = vcmp.gt.s32.totalorder %v1101_v40, 0  ;;  %v4572_v59 = vadd.s32 4294967169, %v1250_v41  ;;  %v8458_v55 = vmov 683565275   ;;  %vm1591_vm10 = vcmp.lt.s32.totalorder %v5065_v48, 4 }
  0xc0   : > { %8617 = vst [vmem:[#allocation20_spill] sm:$0xff] %v5062_v46  ;;  %v1418_v61 = vshll.u32 %v8458_v55, %v4990_v54  ;;  %v8456_v62 = vmov 2475754826   ;;  %v8452_v5 = vmov 2131351028   ;;  %v5089_v15 = vand.u32 31, %v948_v53 }
  0xc1   : > { %v1419_v1 = vshrl.u32 %v8456_v62, %v4997_v63  ;;  %v1421_v3 = vshll.u32 %v8456_v62, %v4990_v54  ;;  %v1422_v6 = vshrl.u32 %v8452_v5, %v4997_v63  ;;  %v1446_v13 = vsel %vm1436_vm8, %v1432_v47, 1326507024 }
  0xc2   : > { %8618 = vst [vmem:[#allocation21_spill] sm:$0xff] %v5089_v15  ;;  %v1408_v16 = vand.u32 8388607, %v8451_v10  ;;  %v5096_v17 = vsel %vm1591_vm10, %v5067_v49, 920167782  ;;  %v5100_v21 = vshll.u32 %v8465_v14, %v5023_v19  ;;  %v5104_v22 = vshrl.u32 %v8471_v29, %v5049_v39 }
  0xc3   : > { %v1103_v25 = vsel %vm1102_vm9, %v1101_v40, 0  ;;  %v5109_v26 = vsel %vm1591_vm10, %v1587_v51, 1326507024  ;;  %v5111_v28 = vor.u32 %v808_v57, %v807_v56  ;;  %vm816_vm11 = vcmp.lt.s32.totalorder %v5072_v52, 4 }
  0xc4   : > { %v1256_v31 = vadd.s32 1, %v4572_v59  ;;  %v1420_v32 = vor.u32 %v1419_v1, %v1418_v61  ;;  %v1423_v34 = vor.u32 %v1422_v6, %v1421_v3  ;;  %v1424_v37 = vshll.u32 %v8452_v5, %v4990_v54 }
  0xc5   : > { %8619 = vst [vmem:[#allocation22_spill] sm:$0xff] %v5111_v28  ;;  %v1425_v38 = vshrl.u32 %v8454_v12, %v4997_v63  ;;  %v5118_v41 = vshrl.u32 %v948_v53, 5  ;;  %v5121_v40 = vsub.s32 32, %v5089_v15  ;;  %v5123_v47 = vand.u32 31, %v1103_v25 }
  0xc6   : > { %v1409_v51 = vor.u32 8388608, %v1408_v16  ;;  %v5129_v57 = vshll.u32 %v8454_v12, %v5089_v15  ;;  %v1417_v54 = vshrl.u32 %v8458_v55, %v4997_v63  ;;  %v5136_v53 = vsel %vm816_vm11, %v5111_v28, 920167782 }
  0xc7   : > { %8620 = vst [vmem:[#allocation23_spill] sm:$0xff] %v5118_v41  ;;  %v1426_v59 = vor.u32 %v1425_v38, %v1424_v37  ;;  %v5140_v61 = vshll.u32 %v8465_v14, %v5089_v15  ;;  %vm1433_vm12 = vcmp.lt.s32.totalorder %v5027_v24, 1  ;;  %vm1435_vm13 = vcmp.lt.s32.totalorder %v5027_v24, 3 }
  0xc8   : > { %8621 = vst [vmem:[#allocation24_spill] sm:$0xff] %v5136_v53  ;;  %vm1257_vm14 = vcmp.gt.s32.totalorder %v1256_v31, 0  ;;  %vm1434_vm15 = vcmp.lt.s32.totalorder %v5027_v24, 2  ;;  %v1441_v63 = vsel %vm1433_vm12, %v1420_v32, %v1423_v34  ;;  %v5151_v3 = vshrl.u32 %v8465_v14, %v5121_v40 }
  0xc9   : > { %v1443_v1 = vsel %vm1435_vm13, %v1426_v59, %v1442_v50  ;;  %v5153_v6 = vshrl.u32 %v1103_v25, 5  ;;  %v5156_v16 = vsub.s32 32, %v5123_v47  ;;  %v5162_v38 = vshll.u32 %v8454_v12, %v5123_v47 }
  0xca   : > { %v1444_v37 = vsel %vm1434_vm15, %v1441_v63, %v1443_v1  ;;  %v1445_v56 = vsel %vm1433_vm12, %v1423_v34, %v1426_v59  ;;  %v1447_v50 = vsel %vm1435_vm13, %v5042_v36, %v1446_v13  ;;  %v5169_v10 = vshll.u32 %v1409_v51, 8 }
  0xcb   : > { %v5171_v25 = vsel %vm1257_vm14, %v1256_v31, 0  ;;  %v1438_v5 = vsel %vm1436_vm8, %v1426_v59, 2102212464  ;;  %v1448_v63 = vsel %vm1434_vm15, %v1445_v56, %v1447_v50  ;;  %v1474_v1 = vand.u32 65535, %v1444_v37 }
  0xcc   : > { %v1450_v12 = vand.u32 65535, %v5169_v10  ;;  %v1451_v62 = vshrl.u32 %v5169_v10, 16  ;;  %v1452_v55 = vand.u32 65535, %v1448_v63  ;;  %v1453_v2 = vshrl.u32 %v1448_v63, 16 }
  0xcd   : > { %v5181_v36 = vshrl.u32 %v8465_v14, %v5156_v16  ;;  %v5185_v13 = vshll.u32 %v8465_v14, %v5123_v47  ;;  %v5189_v31 = vshrl.u32 %v8471_v29, %v5156_v16  ;;  %v1475_v51 = vshrl.u32 %v1444_v37, 16 }
  0xce   : > { %v5192_v56 = vand.u32 31, %v5171_v25  ;;  %v1437_v59 = vsel %vm1433_vm12, %v1417_v54, %v1420_v32  ;;  %v1455_v50 = vmul.u32 %v1453_v2, %v1450_v12  ;;  %v1456_v63 = vmul.u32 %v1452_v55, %v1451_v62 }
  0xcf   : > { %v1439_v23 = vsel %vm1435_vm13, %v1423_v34, %v1438_v5  ;;  %v1477_v46 = vmul.u32 %v1475_v51, %v1450_v12  ;;  %v1478_v11 = vmul.u32 %v1474_v1, %v1451_v62  ;;  %v8482_v14 = vand.u32 2147483647, %v4980_v30 }
  0xd0   : > { %v1454_v4 = vmul.u32 %v1452_v55, %v1450_v12  ;;  %v1457_v58 = vmul.u32 %v1453_v2, %v1451_v62  ;;  %v1458_v29 = vshll.u32 %v1455_v50, 16  ;;  %v1476_v20 = vmul.u32 %v1474_v1, %v1450_v12 }
  0xd1   : > { %v1459_v37 = vshrl.u32 %v1455_v50, 16  ;;  %v1460_v42 = vshll.u32 %v1456_v63, 16  ;;  %v1479_v18 = vmul.u32 %v1475_v51, %v1451_v62  ;;  %v1480_v45 = vshll.u32 %v1477_v46, 16 }
  0xd2   : > { %v1461_v43 = vshrl.u32 %v1456_v63, 16  ;;  %vm1462_vm1 = vc.u32 %v1454_v4, %v1458_v29  ;;  %v1464_v32 = vadd.s32 %v1458_v29, %v1454_v4  ;;  %v1482_v54 = vshll.u32 %v1478_v11, 16 }
  0xd3   : > { %v8622_v35 = vmov 0   ;;  %vm1484_vm2 = vc.u32 %v1476_v20, %v1480_v45  ;;  %v1486_v5 = vadd.s32 %v1480_v45, %v1476_v20  ;;  %v1563_v34 = vand.u32 8388607, %v8482_v14 }
  0xd4   : > { %v1463_v8 = vsel %vm1462_vm1, 1, %v8622_v35  ;;  %vm1466_vm3 = vc.u32 %v1464_v32, %v1460_v42  ;;  %v1481_v2 = vshrl.u32 %v1477_v46, 16  ;;  %v1485_v12 = vsel %vm1484_vm2, 1, %v8622_v35 }
  0xd5   : > { %v1465_v15 = vadd.s32 %v1463_v8, %v1457_v58  ;;  %v1467_v55 = vsel %vm1466_vm3, 1, %v8622_v35  ;;  %v1483_v62 = vshrl.u32 %v1478_v11, 16  ;;  %v1487_v1 = vadd.s32 %v1485_v12, %v1479_v18 }
  0xd6   : > { %vm1488_vm4 = vc.u32 %v1486_v5, %v1482_v54  ;;  %v1564_v29 = vor.u32 8388608, %v1563_v34  ;;  %v8623_v50 = vmov 683565275   ;;  %v8624_v63 = vmov 2475754826  }
  0xd7   : > { %v1469_v51 = vadd.s32 %v1467_v55, %v1465_v15  ;;  %v1489_v4 = vsel %vm1488_vm4, 1, %v8622_v35  ;;  %v1573_v20 = vshll.u32 %v8623_v50, %v4994_v60  ;;  %v1574_v58 = vshrl.u32 %v8624_v63, %v5010_v9 }
  0xd8   : > { %v1491_v45 = vadd.s32 %v1489_v4, %v1487_v1  ;;  %v1576_v8 = vshll.u32 %v8624_v63, %v4994_v60  ;;  %v8625_v42 = vmov 2131351028   ;;  %v5213_v18 = vadd.s32 %v1486_v5, %v1482_v54 }
  0xd9   : > { %v1577_v46 = vshrl.u32 %v8625_v42, %v5010_v9  ;;  %v1470_v11 = vadd.s32 %v1469_v51, %v1459_v37  ;;  %v1579_v15 = vshll.u32 %v8625_v42, %v4994_v60  ;;  %v8626_v32 = vmov 2102212464  }
  0xda   : > { %v1580_v34 = vshrl.u32 %v8626_v32, %v5010_v9  ;;  %v1492_v12 = vadd.s32 %v1491_v45, %v1481_v2  ;;  %v5219_v55 = vor.u32 %v1574_v58, %v1573_v20  ;;  %vm1588_vm5 = vcmp.lt.s32.totalorder %v5065_v48, 1 }
  0xdb   : > { %v5221_v1 = vor.u32 %v1577_v46, %v1576_v8  ;;  %v5224_v4 = vadd.s32 %v1470_v11, %v1461_v43  ;;  %vm1590_vm6 = vcmp.lt.s32.totalorder %v5065_v48, 3  ;;  %v5227_v37 = vshll.u32 %v1564_v29, 8 }
  0xdc   : > { %v1581_v14 = vor.u32 %v1580_v34, %v1579_v15  ;;  %v1440_v60 = vsel %vm1434_vm15, %v1437_v59, %v1439_v23  ;;  %v1493_v54 = vadd.s32 %v1492_v12, %v1483_v62  ;;  %v1602_v43 = vsel %vm1590_vm6, %v5067_v49, %v5109_v26 }
  0xdd   : > { %v1596_v5 = vsel %vm1588_vm5, %v5219_v55, %v5221_v1  ;;  %v5240_v2 = vshrl.u32 %v5171_v25, 5  ;;  %vm1496_vm7 = vc.u32 %v5224_v4, %v5213_v18  ;;  %vm1589_vm8 = vcmp.lt.s32.totalorder %v5065_v48, 2 }
  0xde   : > { %v1598_v23 = vsel %vm1590_vm6, %v1581_v14, %v5096_v17  ;;  %v5249_v24 = vsub.s32 32, %v5192_v56  ;;  %v1497_v59 = vadd.s32 1, %v1493_v54  ;;  %v1600_v49 = vsel %vm1588_vm5, %v5221_v1, %v1581_v14 }
  0xdf   : > { %v1599_v62 = vsel %vm1589_vm8, %v1596_v5, %v1598_v23  ;;  %v1494_v26 = vmul.u32 %v5169_v10, %v1440_v60  ;;  %v1603_v25 = vsel %vm1589_vm8, %v1600_v49, %v1602_v43  ;;  %v1605_v51 = vand.u32 65535, %v5227_v37 }
  0xe0   : > { %v1606_v17 = vshrl.u32 %v5227_v37, 16  ;;  %v1498_v29 = vsel %vm1496_vm7, %v1497_v59, %v1493_v54  ;;  %v1607_v20 = vand.u32 65535, %v1603_v25  ;;  %v1608_v45 = vshrl.u32 %v1603_v25, 16 }
  0xe1   : > { %v1629_v58 = vand.u32 65535, %v1599_v62  ;;  %v5263_v8 = vor.u32 %v5181_v36, %v5162_v38  ;;  %v1122_v46 = vor.u32 %v5189_v31, %v5185_v13  ;;  %v1499_v11 = vadd.s32 %v1498_v29, %v1494_v26 }
  0xe2   : > { %v1630_v10 = vshrl.u32 %v1599_v62, 16  ;;  %v1272_v15 = vshll.u32 %v8626_v32, %v5192_v56  ;;  %v8627_v34 = vmov 920167782   ;;  %v1610_v60 = vmul.u32 %v1608_v45, %v1605_v51 }
  0xe3   : > { %v5271_v12 = vshll.u32 %v8627_v34, %v5192_v56  ;;  %v1611_v54 = vmul.u32 %v1607_v20, %v1606_v17  ;;  %v1273_v5 = vshrl.u32 %v8627_v34, %v5249_v24  ;;  %v1500_v43 = vadd.s32 536870912, %v1499_v11 }
  0xe4   : > { %v1632_v38 = vmul.u32 %v1630_v10, %v1605_v51  ;;  %v1633_v36 = vmul.u32 %v1629_v58, %v1606_v17  ;;  %vm1126_vm9 = vcmp.lt.s32.totalorder %v5153_v6, 4  ;;  %v1572_v13 = vshrl.u32 %v8623_v50, %v5010_v9 }
  0xe5   : > { %v1593_v31 = vsel %vm1591_vm10, %v1581_v14, 2102212464  ;;  %v1609_v23 = vmul.u32 %v1607_v20, %v1605_v51  ;;  %v1613_v59 = vshll.u32 %v1610_v60, 16  ;;  %v1501_v62 = vshrl.u32 %v1500_v43, 30 }
  0xe6   : > { %v1612_v49 = vmul.u32 %v1608_v45, %v1606_v17  ;;  %v1631_v26 = vmul.u32 %v1629_v58, %v1605_v51  ;;  %v1635_v25 = vshll.u32 %v1632_v38, 16  ;;  %v1615_v29 = vshll.u32 %v1611_v54, 16 }
  0xe7   : > { %vm1617_vm12 = vc.u32 %v1609_v23, %v1613_v59  ;;  %v1619_v34 = vadd.s32 %v1613_v59, %v1609_v23  ;;  %v1634_v44 = vmul.u32 %v1630_v10, %v1606_v17  ;;  %vm1403_vm13 = vcmp.lt.s32.totalorder %v4977_v27, 0 }
  0xe8   : > { %v1502_v53 = vshll.u32 %v1501_v62, 30  ;;  %v1618_v28 = vsel %vm1617_vm12, 1, %v8622_v35  ;;  %v1637_v39 = vshll.u32 %v1633_v36, 16  ;;  %vm1639_vm14 = vc.u32 %v1631_v26, %v1635_v25 }
  0xe9   : > { %v1620_v9 = vadd.s32 %v1618_v28, %v1612_v49  ;;  %vm1621_vm15 = vc.u32 %v1619_v34, %v1615_v29  ;;  %v1640_v14 = vsel %vm1639_vm14, 1, %v8622_v35  ;;  %v1641_v20 = vadd.s32 %v1635_v25, %v1631_v26 }
  0xea   : > { %v1503_v43 = vsub.s32 %v1499_v11, %v1502_v53  ;;  %v1592_v51 = vsel %vm1588_vm5, %v1572_v13, %v5219_v55  ;;  %v1622_v45 = vsel %vm1621_vm15, 1, %v8622_v35  ;;  %v1642_v17 = vadd.s32 %v1640_v14, %v1634_v44 }
  0xeb   : > { %v1594_v58 = vsel %vm1590_vm6, %v5221_v1, %v1593_v31  ;;  %v1614_v10 = vshrl.u32 %v1610_v60, 16  ;;  %v1624_v23 = vadd.s32 %v1622_v45, %v1620_v9  ;;  %vm1643_vm10 = vc.u32 %v1641_v20, %v1637_v39 }
  0xec   : > { %v8628_v28 = vand.u32 2147483647, %v4977_v27  ;;  %vm1504_vm2 = vcmp.lt.s32.totalorder %v1503_v43, 0  ;;  %v1505_v53 = vsub.s32 0, %v1503_v43  ;;  %v1616_v11 = vshrl.u32 %v1611_v54, 16 }
  0xed   : > { %v1644_v55 = vsel %vm1643_vm10, 1, %v8622_v35  ;;  %v1525_v13 = vsub.s32 4, %v1501_v62  ;;  %v1625_v44 = vadd.s32 %v1624_v23, %v1614_v10  ;;  %v1636_v59 = vshrl.u32 %v1632_v38, 16 }
  0xee   : > { %vm5292_vm1 = vcmp.le.f32.partialorder %v8628_v28, 0.7853982  ;;  %v1646_v49 = vadd.s32 %v1644_v55, %v1642_v17  ;;  %v1132_v1 = vsel %vm1126_vm9, %v5263_v8, 920167782  ;;  %v1136_v60 = vsel %vm1126_vm9, %v1122_v46, 1326507024 }
  0xef   : > { %v1506_v31 = vsel %vm1504_vm2, %v1505_v53, %v1503_v43  ;;  %v8489_v26 = vand.u32 2147483647, %v4999_v0  ;;  %v1626_v29 = vadd.s32 %v1625_v44, %v1616_v11  ;;  %v1638_v9 = vshrl.u32 %v1633_v36, 16 }
  0xf0   : > { %v1507_v25 = vclz %v1506_v31  ;;  %v1647_v54 = vadd.s32 %v1646_v49, %v1636_v59  ;;  %v5303_v14 = vor.u32 %v1273_v5, %v1272_v15  ;;  %v8631_v45 = vmov 1326507024  }
  0xf1   : > { %v5307_v38 = vshrl.u32 %v8631_v45, %v5249_v24  ;;  %v1595_v17 = vsel %vm1589_vm8, %v1592_v51, %v1594_v58  ;;  %v1645_v10 = vadd.s32 %v1641_v20, %v1637_v39  ;;  %v1495_v46 = vadd.s32 %v5213_v18, %v5224_v4 }
  0xf2   : > { %v4576_v23 = vadd.s32 4294967294, %v1507_v25  ;;  %v1526_v28 = vsel %vm1403_vm13, %v1525_v13, %v1501_v62  ;;  %v1648_v53 = vadd.s32 %v1647_v54, %v1638_v9  ;;  %v1098_v15 = vand.u32 8388607, %v8489_v26 }
  0xf3   : > { %vm1651_vm3 = vc.u32 %v1626_v29, %v1645_v10  ;;  %v1111_v5 = vshll.u32 %v8624_v63, %v5123_v47  ;;  %v1112_v48 = vshrl.u32 %v8625_v42, %v5156_v16  ;;  %v1649_v39 = vmul.u32 %v5227_v37, %v1595_v17 }
  0xf4   : > { %vm4577_vm4 = vcmp.lt.s32.totalorder %v4576_v23, 0  ;;  %v1652_v36 = vadd.s32 1, %v1648_v53  ;;  %v1115_v18 = vshrl.u32 %v8626_v32, %v5156_v16  ;;  %v1109_v62 = vshrl.u32 %v8624_v63, %v5156_v16 }
  0xf5   : > { %v1510_v4 = vsel %vm4577_vm4, 0, %v4576_v23  ;;  %v5326_v20 = vor.u32 %v1112_v48, %v1111_v5  ;;  %v1114_v51 = vshll.u32 %v8625_v42, %v5123_v47  ;;  %v1528_v55 = vsel %vm5292_vm1, 0, %v1526_v28 }
  0xf6   : > { %v1511_v58 = vsub.s32 32, %v1510_v4  ;;  %v1515_v11 = vsub.s32 4294967266, %v1510_v4  ;;  %v1653_v13 = vsel %vm1651_vm3, %v1652_v36, %v1648_v53  ;;  %v1099_v44 = vor.u32 8388608, %v1098_v15 }
  0xf7   : > { %v1654_v37 = vadd.s32 %v1653_v13, %v1649_v39  ;;  %v1108_v59 = vshll.u32 %v8623_v50, %v5123_v47  ;;  %v1116_v49 = vor.u32 %v1115_v18, %v1114_v51  ;;  %v1512_v31 = vshll.u32 %v1503_v43, %v1510_v4 }
  0xf8   : > { %v1513_v25 = vshrl.u32 %v1495_v46, %v1511_v58  ;;  %v1516_v9 = vadd.s32 127, %v1515_v11  ;;  %vm1123_vm5 = vcmp.lt.s32.totalorder %v5153_v6, 1  ;;  %v1545_v5 = vadd.s32 3, %v1528_v55 }
  0xf9   : > { %v1655_v17 = vadd.s32 536870912, %v1654_v37  ;;  %v1110_v23 = vor.u32 %v1109_v62, %v1108_v59  ;;  %v1135_v28 = vsel %vm1123_vm5, %v5326_v20, %v1116_v49  ;;  %vm1125_vm6 = vcmp.lt.s32.totalorder %v5153_v6, 3 }
  0xfa   : > { %v1514_v53 = vor.u32 %v1513_v25, %v1512_v31  ;;  %v1517_v15 = vshll.u32 %v1516_v9, 23  ;;  %vm1124_vm7 = vcmp.lt.s32.totalorder %v5153_v6, 2  ;;  %v1137_v43 = vsel %vm1125_vm6, %v5263_v8, %v1136_v60 }
  0xfb   : > { %v1656_v47 = vshrl.u32 %v1655_v17, 30  ;;  %v5345_v46 = vshll.u32 %v1099_v44, 8  ;;  %vm1558_vm8 = vcmp.lt.s32.totalorder %v4980_v30, 0  ;;  %v1107_v39 = vshrl.u32 %v8623_v50, %v5156_v16 }
  0xfc   : > { %v1518_v48 = vor.u32 4788187, %v1517_v15  ;;  %v1138_v36 = vsel %vm1124_vm7, %v1135_v28, %v1137_v43  ;;  %v1521_v18 = vcvt.s32.f32 %v1514_v53  ;;  %v1131_v62 = vsel %vm1123_vm5, %v1110_v23, %v5326_v20 }
  0xfd   : > { %v1657_v4 = vshll.u32 %v1656_v47, 30  ;;  %v1133_v8 = vsel %vm1125_vm6, %v1116_v49, %v1132_v1  ;;  %v1140_v51 = vand.u32 65535, %v5345_v46  ;;  %v1142_v58 = vand.u32 65535, %v1138_v36 }
  0xfe   : > { %v1519_v60 = vand.u32 2147483647, %v1518_v48  ;;  %v1143_v11 = vshrl.u32 %v1138_v36, 16  ;;  %v5358_v55 = vand.u32 3, %v1545_v5  ;;  %v1650_v16 = vadd.s32 %v1645_v10, %v1626_v29 }
  0xff   : > { %v5360_v13 = vsub.s32 %v1654_v37, %v1657_v4  ;;  %v1141_v44 = vshrl.u32 %v5345_v46, 16  ;;  %v1127_v31 = vsel %vm1123_vm5, %v1107_v39, %v1110_v23  ;;  %v1134_v25 = vsel %vm1124_vm7, %v1131_v62, %v1133_v8 }
 0x100   : > { %v1522_v59 = vmul.f32 %v1521_v18, %v1519_v60  ;;  %v1145_v1 = vmul.u32 %v1143_v11, %v1140_v51  ;;  %v1680_v17 = vsub.s32 4, %v1656_v47  ;;  %v1128_v10 = vsel %vm1126_vm9, %v1116_v49, 2102212464 }
 0x101   : > { %vm1659_vm12 = vcmp.lt.s32.totalorder %v5360_v13, 0  ;;  %v1660_v9 = vsub.s32 0, %v5360_v13  ;;  %v5369_v28 = vmul.u32 %v1142_v58, %v1141_v44  ;;  %v1144_v37 = vmul.u32 %v1142_v58, %v1140_v51 }
 0x102   : > { %v1523_v29 = vxor.u32 2147483648, %v1522_v59  ;;  %v1148_v53 = vshll.u32 %v1145_v1, 16  ;;  %v1164_v5 = vand.u32 65535, %v1134_v25  ;;  %v1165_v43 = vshrl.u32 %v1134_v25, 16 }
 0x103   : > { %v1661_v15 = vsel %vm1659_vm12, %v1660_v9, %v5360_v13  ;;  %v1150_v23 = vshll.u32 %v5369_v28, 16  ;;  %v5384_v49 = vsel %vm1558_vm8, %v1680_v17, %v1656_v47  ;;  %v1129_v4 = vsel %vm1125_vm6, %v5326_v20, %v1128_v10 }
 0x104   : > { %v1524_v48 = vsel %vm1403_vm13, %v1523_v29, %v1522_v59  ;;  %v1662_v39 = vclz %v1661_v15  ;;  %vm1152_vm14 = vc.u32 %v1144_v37, %v1148_v53  ;;  %v1154_v36 = vadd.s32 %v1148_v53, %v1144_v37 }
 0x105   : > { %v5380_v18 = vsel %vm5292_vm1, %v4977_v27, %v1524_v48  ;;  %v1147_v62 = vmul.u32 %v1143_v11, %v1141_v44  ;;  %v1153_v58 = vsel %vm1152_vm14, 1, %v8622_v35  ;;  %v8632_v34 = vand.u32 2147483647, %v4980_v30 }
 0x106   : > { %v1529_v8 = vmul.f32 %v5380_v18, %v5380_v18  ;;  %v4579_v60 = vadd.s32 4294967294, %v1662_v39  ;;  %vm1156_vm9 = vc.u32 %v1154_v36, %v1150_v23  ;;  %v1167_v9 = vmul.u32 %v1165_v43, %v1140_v51 }
 0x107   : > { %vm5394_vm13 = vcmp.le.f32.partialorder %v8632_v34, 0.7853982  ;;  %v1155_v47 = vadd.s32 %v1153_v58, %v1147_v62  ;;  %v1157_v25 = vsel %vm1156_vm9, 1, %v8622_v35  ;;  %v1168_v17 = vmul.u32 %v1164_v5, %v1141_v44 }
 0x108   : > { %v1530_v20 = vmul.f32 -0.001358992, %v1529_v8  ;;  %v1537_v11 = vmul.f32 -0.00019511016, %v1529_v8  ;;  %vm4580_vm15 = vcmp.lt.s32.totalorder %v4579_v60, 0  ;;  %v1166_v29 = vmul.u32 %v1164_v5, %v1140_v51 }
 0x109   : > { %v1665_v10 = vsel %vm4580_vm15, 0, %v4579_v60  ;;  %v1149_v37 = vshrl.u32 %v1145_v1, 16  ;;  %v1159_v53 = vadd.s32 %v1157_v25, %v1155_v47  ;;  %v1170_v15 = vshll.u32 %v1167_v9, 16 }
 0x10a   : > { %v1531_v23 = vadd.f32 0.041655596, %v1530_v20  ;;  %v1538_v48 = vadd.f32 0.008332121, %v1537_v11  ;;  %v1666_v39 = vsub.s32 32, %v1665_v10  ;;  %v1169_v36 = vmul.u32 %v1165_v43, %v1141_v44 }
 0x10b   : > { %v1667_v34 = vshll.u32 %v5360_v13, %v1665_v10  ;;  %v1670_v26 = vsub.s32 4294967266, %v1665_v10  ;;  %v1172_v62 = vshll.u32 %v1168_v17, 16  ;;  %vm1174_vm10 = vc.u32 %v1166_v29, %v1170_v15 }
 0x10c   : > { %v1532_v58 = vmul.f32 %v1531_v23, %v1529_v8  ;;  %v1539_v54 = vmul.f32 %v1538_v48, %v1529_v8  ;;  %v1668_v19 = vshrl.u32 %v1650_v16, %v1666_v39  ;;  %v1175_v33 = vsel %vm1174_vm10, 1, %v8622_v35 }
 0x10d   : > { %v1671_v41 = vadd.s32 127, %v1670_v26  ;;  %v1160_v51 = vadd.s32 %v1159_v53, %v1149_v37  ;;  %v1176_v5 = vadd.s32 %v1170_v15, %v1166_v29  ;;  %v1177_v1 = vadd.s32 %v1175_v33, %v1169_v36 }
 0x10e   : > { %v1533_v60 = vadd.f32 -0.4999988, %v1532_v58  ;;  %v1540_v47 = vadd.f32 -0.16666654, %v1539_v54  ;;  %vm1551_vm1 = vcmp.eq.s32.totalorder %v5358_v55, 2  ;;  %v1130_v44 = vsel %vm1124_vm7, %v1127_v31, %v1129_v4 }
 0x10f   : > { %vm1548_vm2 = vcmp.eq.s32.totalorder %v5358_v55, 0  ;;  %v1669_v13 = vor.u32 %v1668_v19, %v1667_v34  ;;  %v1672_v43 = vshll.u32 %v1671_v41, 23  ;;  %v1151_v25 = vshrl.u32 %v5369_v28, 16 }
 0x110   : > { %vm1178_vm3 = vc.u32 %v1176_v5, %v1172_v62  ;;  %v1534_v16 = vmul.f32 %v1533_v60, %v1529_v8  ;;  %v1541_v20 = vmul.f32 %v1540_v47, %v1529_v8  ;;  %vm1547_vm4 = vcmp.lt.s32.totalorder %v5358_v55, 2 }
 0x111   : > { %v1683_v33 = vsel %vm5394_vm13, 0, %v5384_v49  ;;  %v1179_v26 = vsel %vm1178_vm3, 1, %v8622_v35  ;;  %vm1544_vm5 = vweird.f32 %v4977_v27  ;;  %v1673_v6 = vor.u32 4788187, %v1672_v43 }
 0x112   : > { %v5412_v54 = vadd.s32 %v1160_v51, %v1151_v25  ;;  %v1171_v19 = vshrl.u32 %v1167_v9, 16  ;;  %v1181_v41 = vadd.s32 %v1179_v26, %v1177_v1  ;;  %vm1281_vm6 = vcmp.lt.s32.totalorder %v5240_v2, 4 }
 0x113   : > { %v1535_v31 = vadd.f32 1.0, %v1534_v16  ;;  %v1542_v28 = vadd.f32 1.0, %v1541_v20  ;;  %v1173_v4 = vshrl.u32 %v1168_v17, 16  ;;  %v1246_v8 = vand.u32 2147483647, %v5005_v7 }
 0x114   : > { %v1674_v11 = vand.u32 2147483647, %v1673_v6  ;;  %v1676_v29 = vcvt.s32.f32 %v1669_v13  ;;  %v5416_v10 = vadd.s32 %v1176_v5, %v1172_v62  ;;  %v1182_v49 = vadd.s32 %v1181_v41, %v1171_v19 }
 0x115   : > { %v1543_v37 = vmul.f32 %v1542_v28, %v5380_v18  ;;  %v1552_v53 = vxor.u32 2147483648, %v1535_v31  ;;  %v1184_v15 = vmul.u32 %v5345_v46, %v1130_v44  ;;  %v1253_v9 = vand.u32 8388607, %v1246_v8 }
 0x116   : > { %v1677_v23 = vmul.f32 %v1676_v29, %v1674_v11  ;;  %v1183_v48 = vadd.s32 %v1182_v49, %v1173_v4  ;;  %vm1186_vm7 = vc.u32 %v5412_v54, %v5416_v10  ;;  %v1264_v17 = vshrl.u32 %v8624_v63, %v5249_v24 }
 0x117   : > { %v1549_v39 = vxor.u32 2147483648, %v1543_v37  ;;  %v1263_v36 = vshll.u32 %v8623_v50, %v5192_v56  ;;  %v1266_v18 = vshll.u32 %v8624_v63, %v5192_v56  ;;  %v1267_v46 = vshrl.u32 %v8625_v42, %v5249_v24 }
 0x118   : > { %v1553_v34 = vsel %vm1551_vm1, %v1552_v53, %v1543_v37  ;;  %v1678_v62 = vxor.u32 2147483648, %v1677_v23  ;;  %v1187_v58 = vadd.s32 1, %v1183_v48  ;;  %v1254_v51 = vor.u32 8388608, %v1253_v9 }
 0x119   : > { %v1550_v5 = vsel %vm1548_vm2, %v1535_v31, %v1549_v39  ;;  %v5436_v1 = vor.u32 %v1267_v46, %v1266_v18  ;;  %v1269_v60 = vshll.u32 %v8625_v42, %v5192_v56  ;;  %v1270_v47 = vshrl.u32 %v8626_v32, %v5249_v24 }
 0x11a   : > { %v1554_v44 = vsel %vm1547_vm4, %v1550_v5, %v1553_v34  ;;  %v1679_v13 = vsel %vm1558_vm8, %v1678_v62, %v1677_v23  ;;  %v1188_v43 = vsel %vm1186_vm7, %v1187_v58, %v1183_v48  ;;  %v5449_v25 = vor.u32 %v1264_v17, %v1263_v36 }
 0x11b   : > { %v1555_v16 = vsel %vm1544_vm5, nan, %v1554_v44  ;;  %v5456_v56 = vsel %vm5394_vm13, %v4980_v30, %v1679_v13  ;;  %v1189_v20 = vadd.s32 %v1188_v43, %v1184_v15  ;;  %v1271_v55 = vor.u32 %v1270_v47, %v1269_v60 }
 0x11c   : > { %v5460_v26 = vshrl.u32 %v8631_v45, %v5121_v40  ;;  %v8635_v6 = vor.u32 %v5307_v38, %v5271_v12  ;;  %1764 = vmatpush.msrb.mxu2 %v1555_v16  ;;  %v1684_v27 = vmul.f32 %v5456_v56, %v5456_v56  ;;  %vm1278_vm8 = vcmp.lt.s32.totalorder %v5240_v2, 1 }
 0x11d   : > { %v1287_v59 = vsel %vm1281_vm6, %v5303_v14, 920167782  ;;  %v1700_v41 = vadd.s32 3, %v1683_v33  ;;  %v1190_v31 = vadd.s32 536870912, %v1189_v20  ;;  %v1290_v28 = vsel %vm1278_vm8, %v5436_v1, %v1271_v55 }
 0x11e   : > { %v1291_v19 = vsel %vm1281_vm6, %v8635_v6, 1326507024  ;;  %v1685_v12 = vmul.f32 -0.001358992, %v1684_v27  ;;  %v1692_v38 = vmul.f32 -0.00019511016, %v1684_v27  ;;  %v1286_v11 = vsel %vm1278_vm8, %v5449_v25, %v5436_v1 }
 0x11f   : > { %vm1279_vm12 = vcmp.lt.s32.totalorder %v5240_v2, 2  ;;  %vm1280_vm14 = vcmp.lt.s32.totalorder %v5240_v2, 3  ;;  %v1191_v4 = vshrl.u32 %v1190_v31, 30  ;;  %v5485_v29 = vshll.u32 %v1254_v51, 8 }
 0x120   : > { %v1292_v33 = vsel %vm1280_vm14, %v5303_v14, %v1291_v19  ;;  %v1686_v49 = vadd.f32 0.041655596, %v1685_v12  ;;  %v1693_v37 = vadd.f32 0.008332121, %v1692_v38  ;;  %v1288_v53 = vsel %vm1280_vm14, %v1271_v55, %v1287_v59 }
 0x121   : > { %v1293_v15 = vsel %vm1279_vm12, %v1290_v28, %v1292_v33  ;;  %v8636_v9 = vor.u32 %v5104_v22, %v5100_v21  ;;  %v5500_v14 = vor.u32 %v5151_v3, %v5129_v57  ;;  %v1701_v48 = vand.u32 3, %v1700_v41 }
 0x122   : > { %v1192_v17 = vshll.u32 %v1191_v4, 30  ;;  %v967_v39 = vor.u32 %v5460_v26, %v5140_v61  ;;  %v1687_v36 = vmul.f32 %v1686_v49, %v1684_v27  ;;  %v1694_v18 = vmul.f32 %v1693_v37, %v1684_v27 }
 0x123   : > { %v5496_v23 = vsel %vm816_vm11, %v8636_v9, 1326507024  ;;  %v1298_v46 = vshrl.u32 %v1293_v15, 16  ;;  %v5508_v21 = vsel %vm1279_vm12, %v1286_v11, %v1288_v53  ;;  %v1295_v22 = vand.u32 65535, %v5485_v29 }
 0x124   : > { %v5504_v34 = vsub.s32 %v1189_v20, %v1192_v17  ;;  %v1297_v62 = vand.u32 65535, %v1293_v15  ;;  %v1688_v58 = vadd.f32 -0.4999988, %v1687_v36  ;;  %v1695_v57 = vadd.f32 -0.16666654, %v1694_v18 }
 0x125   : > { %vm1093_vm9 = vcmp.lt.s32.totalorder %v4999_v0, 0  ;;  %v1215_v3 = vsub.s32 4, %v1191_v4  ;;  %vm1703_vm13 = vcmp.eq.s32.totalorder %v1701_v48, 0  ;;  %vm1706_vm15 = vcmp.eq.s32.totalorder %v1701_v48, 2 }
 0x126   : > { %vm1194_vm10 = vcmp.lt.s32.totalorder %v5504_v34, 0  ;;  %v1195_v51 = vsub.s32 0, %v5504_v34  ;;  %v1296_v5 = vshrl.u32 %v5485_v29, 16  ;;  %v1300_v60 = vmul.u32 %v1298_v46, %v1295_v22 }
 0x127   : > { %v1689_v47 = vmul.f32 %v1688_v58, %v1684_v27  ;;  %v1696_v44 = vmul.f32 %v1695_v57, %v1684_v27  ;;  %vm1702_vm1 = vcmp.lt.s32.totalorder %v1701_v48, 2  ;;  %v1185_v13 = vadd.s32 %v5416_v10, %v5412_v54 }
 0x128   : > { %v1319_v43 = vand.u32 65535, %v5508_v21  ;;  %vm1699_vm2 = vweird.f32 %v4980_v30  ;;  %v1196_v16 = vsel %vm1194_vm10, %v1195_v51, %v5504_v34  ;;  %v5520_v20 = vmul.u32 %v1297_v62, %v1296_v5 }
 0x129   : > { %v1303_v6 = vshll.u32 %v1300_v60, 16  ;;  %v1320_v19 = vshrl.u32 %v5508_v21, 16  ;;  %v1690_v59 = vadd.f32 1.0, %v1689_v47  ;;  %v1697_v41 = vadd.f32 1.0, %v1696_v44 }
 0x12a   : > { %v1197_v31 = vclz %v1196_v16  ;;  %v1299_v28 = vmul.u32 %v1297_v62, %v1295_v22  ;;  %v5525_v27 = vsel %vm1093_vm9, %v1215_v3, %v1191_v4  ;;  %v1262_v54 = vshrl.u32 %v8623_v50, %v5249_v24 }
 0x12b   : > { %v1283_v10 = vsel %vm1281_vm6, %v1271_v55, 2102212464  ;;  %v1302_v12 = vmul.u32 %v1298_v46, %v1296_v5  ;;  %v1698_v38 = vmul.f32 %v1697_v41, %v5456_v56  ;;  %v1707_v11 = vxor.u32 2147483648, %v1690_v59 }
 0x12c   : > { %v4570_v33 = vadd.s32 4294967294, %v1197_v31  ;;  %vm1307_vm3 = vc.u32 %v1299_v28, %v1303_v6  ;;  %v8637_v49 = vand.u32 2147483647, %v4999_v0  ;;  %v1305_v4 = vshll.u32 %v5520_v20, 16 }
 0x12d   : > { %v1308_v53 = vsel %vm1307_vm3, 1, %v8622_v35  ;;  %v1309_v24 = vadd.s32 %v1303_v6, %v1299_v28  ;;  %v1322_v15 = vmul.u32 %v1320_v19, %v1295_v22  ;;  %v1704_v9 = vxor.u32 2147483648, %v1698_v38  ;;  %v8640_v6 = vld [vmem:[#allocation23_spill] sm:$0xff] }
 0x12e   : > { %vm5534_vm4 = vcmp.le.f32.partialorder %v8637_v49, 0.7853982  ;;  %vm4571_vm5 = vcmp.lt.s32.totalorder %v4570_v33, 0  ;;  %v1310_v55 = vadd.s32 %v1308_v53, %v1302_v12  ;;  %v1321_v17 = vmul.u32 %v1319_v43, %v1295_v22  ;;  %v8641_v53 = vld [vmem:[#allocation7_spill] sm:$0xff] }
 0x12f   : > { %v1200_v56 = vsel %vm4571_vm5, 0, %v4570_v33  ;;  %vm1311_vm6 = vc.u32 %v1309_v24, %v1305_v4  ;;  %v1323_v36 = vmul.u32 %v1319_v43, %v1296_v5  ;;  %v1325_v18 = vshll.u32 %v1322_v15, 16 }
 0x130   : > { %v1705_v46 = vsel %vm1703_vm13, %v1690_v59, %v1704_v9  ;;  %v1708_v21 = vsel %vm1706_vm15, %v1707_v11, %v1698_v38  ;;  %v1201_v62 = vsub.s32 32, %v1200_v56  ;;  %v1205_v58 = vsub.s32 4294967266, %v1200_v56 }
 0x131   : > { %v1709_v57 = vsel %vm1702_vm1, %v1705_v46, %v1708_v21  ;;  %v1202_v3 = vshll.u32 %v5504_v34, %v1200_v56  ;;  %v1304_v51 = vshrl.u32 %v1300_v60, 16  ;;  %v1312_v47 = vsel %vm1311_vm6, 1, %v8622_v35 }
 0x132   : > { %v1710_v22 = vsel %vm1699_vm2, nan, %v1709_v57  ;;  %v1203_v44 = vshrl.u32 %v1185_v13, %v1201_v62  ;;  %v1206_v16 = vadd.s32 127, %v1205_v58  ;;  %v1314_v43 = vadd.s32 %v1312_v47, %v1310_v55 }
 0x133   : > { %vm971_vm7 = vcmp.lt.s32.totalorder %v8640_v6, 4  ;;  %1793 = vmatpush.msrb.mxu3 %v1710_v22  ;;  %v1324_v59 = vmul.u32 %v1320_v19, %v1296_v5  ;;  %v1327_v41 = vshll.u32 %v1323_v36, 16  ;;  %vm1329_vm13 = vc.u32 %v1321_v17, %v1325_v18 }
 0x134   : > { %v1331_v31 = vadd.s32 %v1325_v18, %v1321_v17  ;;  %v1204_v48 = vor.u32 %v1203_v44, %v1202_v3  ;;  %v1207_v28 = vshll.u32 %v1206_v16, 23  ;;  %v1315_v12 = vadd.s32 %v1314_v43, %v1304_v51  ;;  %v8643_v17 = vld [vmem:[#allocation16_spill] sm:$0xff] }
 0x135   : > { %v1330_v34 = vsel %vm1329_vm13, 1, %v8622_v35  ;;  %v1282_v30 = vsel %vm1278_vm8, %v1262_v54, %v5449_v25  ;;  %v1284_v60 = vsel %vm1280_vm14, %v5436_v1, %v1283_v10  ;;  %v1218_v5 = vsel %vm5534_vm4, 0, %v5525_v27  ;;  %v8642_v27 = vld [vmem:[#allocation14_spill] sm:$0xff] }
 0x136   : > { %v1332_v13 = vadd.s32 %v1330_v34, %v1324_v59  ;;  %vm1333_vm15 = vc.u32 %v1331_v31, %v1327_v41  ;;  %v1208_v38 = vor.u32 4788187, %v1207_v28  ;;  %v1306_v19 = vshrl.u32 %v5520_v20, 16  ;;  %v8644_v28 = vld [vmem:[#allocation22_spill] sm:$0xff] }
 0x137   : > { %v1334_v11 = vsel %vm1333_vm15, 1, %v8622_v35  ;;  %v1326_v33 = vshrl.u32 %v1322_v15, 16  ;;  %v1328_v49 = vshrl.u32 %v1323_v36, 16  ;;  %v781_v25 = vand.u32 2147483647, %v8641_v53 }
 0x138   : > { %v1336_v4 = vadd.s32 %v1334_v11, %v1332_v13  ;;  %v1209_v54 = vand.u32 2147483647, %v1208_v38  ;;  %v1211_v24 = vcvt.s32.f32 %v1204_v48  ;;  %v5561_v9 = vadd.s32 %v1315_v12, %v1306_v19  ;;  %v8645_v13 = vld [vmem:[#allocation24_spill] sm:$0xff] }
 0x139   : > { %v5563_v1 = vadd.s32 %v1331_v31, %v1327_v41  ;;  %v788_v55 = vand.u32 8388607, %v781_v25  ;;  %v798_v20 = vshll.u32 %v8623_v50, %v8642_v27  ;;  %v799_v15 = vshrl.u32 %v8624_v63, %v8643_v17 }
 0x13a   : > { %v1337_v10 = vadd.s32 %v1336_v4, %v1326_v33  ;;  %v1212_v56 = vmul.f32 %v1211_v24, %v1209_v54  ;;  %v801_v36 = vshll.u32 %v8624_v63, %v8642_v27  ;;  %v802_v18 = vshrl.u32 %v8625_v42, %v8643_v17 }
 0x13b   : > { %v804_v46 = vshll.u32 %v8625_v42, %v8642_v27  ;;  %v1285_v21 = vsel %vm1279_vm12, %v1282_v30, %v1284_v60  ;;  %v789_v58 = vor.u32 8388608, %v788_v55  ;;  %v805_v57 = vshrl.u32 %v8626_v32, %v8643_v17 }
 0x13c   : > { %v1338_v62 = vadd.s32 %v1337_v10, %v1328_v49  ;;  %v5584_v3 = vsel %vm971_vm7, %v5500_v14, 920167782  ;;  %v1213_v51 = vxor.u32 2147483648, %v1212_v56  ;;  %v1235_v47 = vadd.s32 3, %v1218_v5 }
 0x13d   : > { %vm1341_vm8 = vc.u32 %v5561_v9, %v5563_v1  ;;  %v800_v44 = vor.u32 %v799_v15, %v798_v20  ;;  %v803_v16 = vor.u32 %v802_v18, %v801_v36  ;;  %v806_v2 = vor.u32 %v805_v57, %v804_v46 }
 0x13e   : > { %v1342_v22 = vadd.s32 1, %v1338_v62  ;;  %v1214_v43 = vsel %vm1093_vm9, %v1213_v51, %v1212_v56  ;;  %v1339_v59 = vmul.u32 %v5485_v29, %v1285_v21  ;;  %v797_v41 = vshrl.u32 %v8623_v50, %v8643_v17 }
 0x13f   : > { %vm815_vm12 = vcmp.lt.s32.totalorder %v5072_v52, 3  ;;  %v1217_v31 = vsel %vm5534_vm4, %v4999_v0, %v1214_v43  ;;  %v5601_v34 = vshll.u32 %v789_v58, 8  ;;  %vm813_vm14 = vcmp.lt.s32.totalorder %v5072_v52, 1 }
 0x140   : > { %v1343_v48 = vsel %vm1341_vm8, %v1342_v22, %v1338_v62  ;;  %v827_v12 = vsel %vm815_vm12, %v8644_v28, %v5496_v23  ;;  %v1219_v30 = vmul.f32 %v1217_v31, %v1217_v31  ;;  %vm814_vm9 = vcmp.lt.s32.totalorder %v5072_v52, 2 }
 0x141   : > { %v1344_v60 = vadd.s32 %v1343_v48, %v1339_v59  ;;  %v818_v29 = vsel %vm816_vm11, %v806_v2, 2102212464  ;;  %v821_v37 = vsel %vm813_vm14, %v800_v44, %v803_v16  ;;  %v823_v38 = vsel %vm815_vm12, %v806_v2, %v8645_v13 }
 0x142   : > { %v825_v23 = vsel %vm813_vm14, %v803_v16, %v806_v2  ;;  %v1220_v5 = vmul.f32 -0.001358992, %v1219_v30  ;;  %v1227_v19 = vmul.f32 -0.00019511016, %v1219_v30  ;;  %v830_v49 = vand.u32 65535, %v5601_v34 }
 0x143   : > { %v1345_v11 = vadd.s32 536870912, %v1344_v60  ;;  %v828_v33 = vsel %vm814_vm9, %v825_v23, %v827_v12  ;;  %v831_v4 = vshrl.u32 %v5601_v34, 16  ;;  %v824_v20 = vsel %vm814_vm9, %v821_v37, %v823_v38 }
 0x144   : > { %v832_v54 = vand.u32 65535, %v828_v33  ;;  %v833_v24 = vshrl.u32 %v828_v33, 16  ;;  %v1221_v10 = vadd.f32 0.041655596, %v1220_v5  ;;  %v1228_v55 = vadd.f32 0.008332121, %v1227_v19 }
 0x145   : > { %v5618_v27 = vshrl.u32 %v1345_v11, 30  ;;  %v817_v17 = vsel %vm813_vm14, %v797_v41, %v800_v44  ;;  %v819_v15 = vsel %vm815_vm12, %v803_v16, %v818_v29  ;;  %v5633_v18 = vsel %vm971_vm7, %v967_v39, 1326507024 }
 0x146   : > { %v835_v56 = vmul.u32 %v833_v24, %v830_v49  ;;  %v5626_v36 = vmul.u32 %v832_v54, %v831_v4  ;;  %v1222_v46 = vmul.f32 %v1221_v10, %v1219_v30  ;;  %v1229_v21 = vmul.f32 %v1228_v55, %v1219_v30 }
 0x147   : > { %v1347_v62 = vshll.u32 %v5618_v27, 30  ;;  %v1236_v58 = vand.u32 3, %v1235_v47  ;;  %v834_v57 = vmul.u32 %v832_v54, %v830_v49  ;;  %v855_v22 = vshrl.u32 %v824_v20, 16 }
 0x148   : > { %v838_v51 = vshll.u32 %v835_v56, 16  ;;  %v1223_v44 = vadd.f32 -0.4999988, %v1222_v46  ;;  %v1230_v16 = vadd.f32 -0.16666654, %v1229_v21  ;;  %v5640_v43 = vsel %vm814_vm9, %v817_v17, %v819_v15 }
 0x149   : > { %v5636_v2 = vsub.s32 %v1344_v60, %v1347_v62  ;;  %v837_v61 = vmul.u32 %v833_v24, %v831_v4  ;;  %v840_v26 = vshll.u32 %v5626_v36, 16  ;;  %vm1234_vm1 = vweird.f32 %v4999_v0 }
 0x14a   : > { %vm842_vm11 = vc.u32 %v834_v57, %v838_v51  ;;  %v844_v39 = vadd.s32 %v838_v51, %v834_v57  ;;  %v1224_v59 = vmul.f32 %v1223_v44, %v1219_v30  ;;  %v1231_v41 = vmul.f32 %v1230_v16, %v1219_v30 }
 0x14b   : > { %vm1349_vm10 = vcmp.lt.s32.totalorder %v5636_v2, 0  ;;  %v1350_v47 = vsub.s32 0, %v5636_v2  ;;  %v843_v48 = vsel %vm842_vm11, 1, %v8622_v35  ;;  %v854_v28 = vand.u32 65535, %v824_v20 }
 0x14c   : > { %vm846_vm2 = vc.u32 %v844_v39, %v840_v26  ;;  %v857_v52 = vmul.u32 %v855_v22, %v830_v49  ;;  %v1225_v12 = vadd.f32 1.0, %v1224_v59  ;;  %v1232_v60 = vadd.f32 1.0, %v1231_v41  ;;  %v8648_v26 = vld [vmem:[#allocation8_spill] sm:$0xff] }
 0x14d   : > { %v1351_v29 = vsel %vm1349_vm10, %v1350_v47, %v5636_v2  ;;  %v845_v37 = vadd.s32 %v843_v48, %v837_v61  ;;  %vm1237_vm3 = vcmp.lt.s32.totalorder %v1236_v58, 2  ;;  %vm1238_vm4 = vcmp.eq.s32.totalorder %v1236_v58, 0 }
 0x14e   : > { %vm1248_vm5 = vcmp.lt.s32.totalorder %v5005_v7, 0  ;;  %v1352_v30 = vclz %v1351_v29  ;;  %v847_v13 = vsel %vm846_vm2, 1, %v8622_v35  ;;  %v1233_v38 = vmul.f32 %v1232_v60, %v1217_v31 }
 0x14f   : > { %vm1241_vm6 = vcmp.eq.s32.totalorder %v1236_v58, 2  ;;  %v1242_v23 = vxor.u32 2147483648, %v1225_v12  ;;  %v849_v5 = vadd.s32 %v847_v13, %v845_v37  ;;  %v1340_v19 = vadd.s32 %v5563_v1, %v5561_v9  ;;  %v8656_v1 = vld [vmem:[#allocation17_spill] sm:$0xff] }
 0x150   : > { %v4573_v11 = vadd.s32 4294967294, %v1352_v30  ;;  %v858_v33 = vmul.u32 %v854_v28, %v831_v4  ;;  %v874_v54 = vmul.u32 %v5601_v34, %v5640_v43  ;;  %v1239_v24 = vxor.u32 2147483648, %v1233_v38  ;;  %v8655_v43 = vld [vmem:[#allocation13_spill] sm:$0xff] }
 0x151   : > { %v839_v10 = vshrl.u32 %v835_v56, 16  ;;  %v856_v55 = vmul.u32 %v854_v28, %v830_v49  ;;  %v860_v20 = vshll.u32 %v857_v52, 16  ;;  %v1243_v17 = vsel %vm1241_vm6, %v1242_v23, %v1233_v38 }
 0x152   : > { %vm4574_vm13 = vcmp.lt.s32.totalorder %v4573_v11, 0  ;;  %v1370_v15 = vsub.s32 4, %v5618_v27  ;;  %v859_v31 = vmul.u32 %v855_v22, %v831_v4  ;;  %v1240_v46 = vsel %vm1238_vm4, %v1225_v12, %v1239_v24 }
 0x153   : > { %v1355_v21 = vsel %vm4574_vm13, 0, %v4573_v11  ;;  %v850_v62 = vadd.s32 %v849_v5, %v839_v10  ;;  %vm864_vm15 = vc.u32 %v856_v55, %v860_v20  ;;  %v1244_v9 = vsel %vm1237_vm3, %v1240_v46, %v1243_v17 }
 0x154   : > { %vm5659_vm8 = vcmp.le.f32.partialorder %v1246_v8, 0.7853982  ;;  %v1356_v49 = vsub.s32 32, %v1355_v21  ;;  %v1360_v56 = vsub.s32 4294967266, %v1355_v21  ;;  %v862_v57 = vshll.u32 %v858_v33, 16 }
 0x155   : > { %v1245_v51 = vsel %vm1234_vm1, nan, %v1244_v9  ;;  %v1357_v4 = vshll.u32 %v5636_v2, %v1355_v21  ;;  %v865_v22 = vsel %vm864_vm15, 1, %v8622_v35  ;;  %v866_v44 = vadd.s32 %v860_v20, %v856_v55 }
 0x156   : > { %1765 = vmatpush.msrb.mxu2 %v1245_v51  ;;  %v1358_v58 = vshrl.u32 %v1340_v19, %v1356_v49  ;;  %v1361_v16 = vadd.s32 127, %v1360_v56  ;;  %v867_v61 = vadd.s32 %v865_v22, %v859_v31  ;;  %v936_v8 = vand.u32 2147483647, %v8648_v26  ;;  %v8650_v19 = vld [vmem:[#allocation11_spill] sm:$0xff] }
 0x157   : > { %v1371_v39 = vsel %vm1248_vm5, %v1370_v15, %v5618_v27  ;;  %v841_v59 = vshrl.u32 %v5626_v36, 16  ;;  %v861_v41 = vshrl.u32 %v857_v52, 16  ;;  %vm868_vm12 = vc.u32 %v866_v44, %v862_v57  ;;  %v8649_v27 = vld [vmem:[#allocation21_spill] sm:$0xff]  ;;  %v8651_v51 = vld [vmem:[#allocation15_spill] sm:$0xff] }
 0x158   : > { %v1359_v0 = vor.u32 %v1358_v58, %v1357_v4  ;;  %v1362_v47 = vshll.u32 %v1361_v16, 23  ;;  %v863_v2 = vshrl.u32 %v858_v33, 16  ;;  %v869_v48 = vsel %vm868_vm12, 1, %v8622_v35  ;;  %v8652_v4 = vld [vmem:[#allocation18_spill] sm:$0xff] }
 0x159   : > { %v5673_v28 = vadd.s32 %v850_v62, %v841_v59  ;;  %v5675_v12 = vadd.s32 %v866_v44, %v862_v57  ;;  %v871_v60 = vadd.s32 %v869_v48, %v867_v61  ;;  %v943_v29 = vand.u32 8388607, %v936_v8 }
 0x15a   : > { %v1363_v37 = vor.u32 4788187, %v1362_v47  ;;  %v1366_v30 = vcvt.s32.f32 %v1359_v0  ;;  %v953_v36 = vshll.u32 %v8623_v50, %v8649_v27  ;;  %v954_v52 = vshrl.u32 %v8624_v63, %v5121_v40  ;;  %v8653_v47 = vld [vmem:[#allocation19_spill] sm:$0xff] }
 0x15b   : > { %v872_v13 = vadd.s32 %v871_v60, %v861_v41  ;;  %v944_v38 = vor.u32 8388608, %v943_v29  ;;  %v956_v23 = vshll.u32 %v8624_v63, %v8649_v27  ;;  %v957_v5 = vshrl.u32 %v8625_v42, %v5121_v40 }
 0x15c   : > { %vm506_vm14 = vcmp.lt.s32.totalorder %v8650_v19, 4  ;;  %v1364_v11 = vand.u32 2147483647, %v1363_v37  ;;  %v5688_v33 = vor.u32 %v954_v52, %v953_v36  ;;  %v959_v24 = vshll.u32 %v8625_v42, %v8649_v27 }
 0x15d   : > { %v960_v10 = vshrl.u32 %v8626_v32, %v5121_v40  ;;  %v1373_v55 = vsel %vm5659_vm8, 0, %v1371_v39  ;;  %v873_v20 = vadd.s32 %v872_v13, %v863_v2  ;;  %vm876_vm9 = vc.u32 %v5673_v28, %v5675_v12 }
 0x15e   : > { %v5698_v17 = vor.u32 %v957_v5, %v956_v23  ;;  %v1367_v15 = vmul.f32 %v1366_v30, %v1364_v11  ;;  %vm968_vm11 = vcmp.lt.s32.totalorder %v8640_v6, 1  ;;  %vm970_vm10 = vcmp.lt.s32.totalorder %v8640_v6, 3 }
 0x15f   : > { %v961_v31 = vor.u32 %v960_v10, %v959_v24  ;;  %v877_v46 = vadd.s32 1, %v873_v20  ;;  %v982_v62 = vsel %vm970_vm10, %v5500_v14, %v5633_v18  ;;  %v5710_v9 = vshll.u32 %v944_v38, 8 }
 0x160   : > { %v976_v21 = vsel %vm968_vm11, %v5688_v33, %v5698_v17  ;;  %v1368_v49 = vxor.u32 2147483648, %v1367_v15  ;;  %vm969_vm1 = vcmp.lt.s32.totalorder %v8640_v6, 2  ;;  %v502_v22 = vor.u32 %v8652_v4, %v8651_v51 }
 0x161   : > { %v978_v56 = vsel %vm970_vm10, %v961_v31, %v5584_v3  ;;  %v980_v57 = vsel %vm968_vm11, %v5698_v17, %v961_v31  ;;  %v1390_v44 = vadd.s32 3, %v1373_v55  ;;  %v878_v14 = vsel %vm876_vm9, %v877_v46, %v873_v20 }
 0x162   : > { %v983_v18 = vsel %vm969_vm1, %v980_v57, %v982_v62  ;;  %v1369_v58 = vsel %vm1248_vm5, %v1368_v49, %v1367_v15  ;;  %v879_v3 = vadd.s32 %v878_v14, %v874_v54  ;;  %v5733_v16 = vsel %vm969_vm1, %v976_v21, %v978_v56 }
 0x163   : > { %v985_v61 = vand.u32 65535, %v5710_v9  ;;  %v5739_v39 = vsel %vm5659_vm8, %v5005_v7, %v1369_v58  ;;  %v5742_v59 = vshrl.u32 %v5710_v9, 16  ;;  %v987_v41 = vand.u32 65535, %v983_v18 }
 0x164   : > { %v988_v0 = vshrl.u32 %v983_v18, 16  ;;  %v8654_v2 = vmov 920167782   ;;  %v1374_v48 = vmul.f32 %v5739_v39, %v5739_v39  ;;  %v880_v60 = vadd.s32 536870912, %v879_v3 }
 0x165   : > { %v5746_v34 = vshrl.u32 %v8654_v2, %v8653_v47  ;;  %v5750_v54 = vshll.u32 %v8654_v2, %v8655_v43  ;;  %v5757_v29 = vsel %vm506_vm14, %v8656_v1, 920167782  ;;  %v5760_v30 = vmul.u32 %v987_v41, %v5742_v59 }
 0x166   : > { %v990_v37 = vmul.u32 %v988_v0, %v985_v61  ;;  %v1010_v27 = vshrl.u32 %v5733_v16, 16  ;;  %v5765_v36 = vshrl.u32 %v8631_v45, %v8653_v47  ;;  %v1375_v52 = vmul.f32 -0.001358992, %v1374_v48 }
 0x167   : > { %v1382_v13 = vmul.f32 -0.00019511016, %v1374_v48  ;;  %v5767_v38 = vshrl.u32 %v880_v60, 30  ;;  %v5771_v23 = vsel %vm506_vm14, %v502_v22, 1326507024  ;;  %v5773_v5 = vand.u32 3, %v1390_v44 }
 0x168   : > { %v989_v11 = vmul.u32 %v987_v41, %v985_v61  ;;  %v993_v24 = vshll.u32 %v990_v37, 16  ;;  %v1376_v10 = vadd.f32 0.041655596, %v1375_v52  ;;  %v952_v15 = vshrl.u32 %v8623_v50, %v5121_v40 }
 0x169   : > { %v1383_v55 = vadd.f32 0.008332121, %v1382_v13  ;;  %v882_v20 = vshll.u32 %v5767_v38, 30  ;;  %v995_v46 = vshll.u32 %v5760_v30, 16  ;;  %v5779_v62 = vmul.u32 %v1010_v27, %v985_v61 }
 0x16a   : > { %vm997_vm2 = vc.u32 %v989_v11, %v993_v24  ;;  %v999_v21 = vadd.s32 %v993_v24, %v989_v11  ;;  %v1377_v49 = vmul.f32 %v1376_v10, %v1374_v48  ;;  %v1009_v51 = vand.u32 65535, %v5733_v16 }
 0x16b   : > { %v1384_v56 = vmul.f32 %v1383_v55, %v1374_v48  ;;  %v5781_v57 = vsub.s32 %v879_v3, %v882_v20  ;;  %v875_v4 = vadd.s32 %v5675_v12, %v5673_v28  ;;  %v992_v22 = vmul.u32 %v988_v0, %v5742_v59 }
 0x16c   : > { %v998_v44 = vsel %vm997_vm2, 1, %v8622_v35  ;;  %vm1001_vm3 = vc.u32 %v999_v21, %v995_v46  ;;  %v1378_v40 = vadd.f32 -0.4999988, %v1377_v49  ;;  %vm1396_vm4 = vcmp.eq.s32.totalorder %v5773_v5, 2 }
 0x16d   : > { %v1385_v14 = vadd.f32 -0.16666654, %v1384_v56  ;;  %vm884_vm5 = vcmp.lt.s32.totalorder %v5781_v57, 0  ;;  %v885_v18 = vsub.s32 0, %v5781_v57  ;;  %vm1393_vm6 = vcmp.eq.s32.totalorder %v5773_v5, 0 }
 0x16e   : > { %v973_v58 = vsel %vm971_vm7, %v961_v31, 2102212464  ;;  %v1000_v3 = vadd.s32 %v998_v44, %v992_v22  ;;  %v1002_v28 = vsel %vm1001_vm3, 1, %v8622_v35  ;;  %v1015_v12 = vshll.u32 %v5779_v62, 16 }
 0x16f   : > { %v1379_v16 = vmul.f32 %v1378_v40, %v1374_v48  ;;  %v1386_v41 = vmul.f32 %v1385_v14, %v1374_v48  ;;  %vm1392_vm13 = vcmp.lt.s32.totalorder %v5773_v5, 2  ;;  %v886_v0 = vsel %vm884_vm5, %v885_v18, %v5781_v57 }
 0x170   : > { %v1011_v60 = vmul.u32 %v1009_v51, %v985_v61  ;;  %vm1389_vm15 = vweird.f32 %v5005_v7  ;;  %v887_v52 = vclz %v886_v0  ;;  %v972_v13 = vsel %vm968_vm11, %v952_v15, %v5688_v33  ;;  %v8659_v0 = vld [vmem:[#allocation5_spill] sm:$0xff] }
 0x171   : > { %v1004_v31 = vadd.s32 %v1002_v28, %v1000_v3  ;;  %v1013_v11 = vmul.u32 %v1009_v51, %v5742_v59  ;;  %v1380_v24 = vadd.f32 1.0, %v1379_v16  ;;  %v1387_v10 = vadd.f32 1.0, %v1386_v41 }
 0x172   : > { %v994_v55 = vshrl.u32 %v990_v37, 16  ;;  %vm1019_vm7 = vc.u32 %v1011_v60, %v1015_v12  ;;  %vm783_vm8 = vcmp.lt.s32.totalorder %v8641_v53, 0  ;;  %v4564_v48 = vadd.s32 4294967294, %v887_v52 }
 0x173   : > { %v974_v61 = vsel %vm970_vm10, %v5698_v17, %v973_v58  ;;  %v996_v20 = vshrl.u32 %v5760_v30, 16  ;;  %v1014_v46 = vmul.u32 %v1010_v27, %v5742_v59  ;;  %v1388_v33 = vmul.f32 %v1387_v10, %v5739_v39  ;;  %v8660_v10 = vld [vmem:[#allocation9_spill] sm:$0xff] }
 0x174   : > { %v1397_v15 = vxor.u32 2147483648, %v1380_v24  ;;  %v1005_v21 = vadd.s32 %v1004_v31, %v994_v55  ;;  %v1020_v49 = vsel %vm1019_vm7, 1, %v8622_v35  ;;  %vm4565_vm12 = vcmp.lt.s32.totalorder %v4564_v48, 0 }
 0x175   : > { %v1017_v37 = vshll.u32 %v1013_v11, 16  ;;  %v1021_v56 = vadd.s32 %v1015_v12, %v1011_v60  ;;  %v1022_v51 = vadd.s32 %v1020_v49, %v1014_v46  ;;  %v1394_v22 = vxor.u32 2147483648, %v1388_v33 }
 0x176   : > { %v890_v44 = vsel %vm4565_vm12, 0, %v4564_v48  ;;  %v905_v40 = vsub.s32 4, %v5767_v38  ;;  %v1016_v17 = vshrl.u32 %v5779_v62, 16  ;;  %v1398_v30 = vsel %vm1396_vm4, %v1397_v15, %v1388_v33  ;;  %v8662_v33 = vld [vmem:[#allocation12_spill] sm:$0xff] }
 0x177   : > { %v891_v59 = vsub.s32 32, %v890_v44  ;;  %v895_v27 = vsub.s32 4294967266, %v890_v44  ;;  %vm1023_vm9 = vc.u32 %v1021_v56, %v1017_v37  ;;  %v1395_v39 = vsel %vm1393_vm6, %v1380_v24, %v1394_v22 }
 0x178   : > { %v892_v14 = vshll.u32 %v5781_v57, %v890_v44  ;;  %v5818_v18 = vadd.s32 %v1005_v21, %v996_v20  ;;  %v1024_v58 = vsel %vm1023_vm9, 1, %v8622_v35  ;;  %v1399_v3 = vsel %vm1392_vm13, %v1395_v39, %v1398_v30  ;;  %v8661_v20 = vld [vmem:[#allocation10_spill] sm:$0xff] }
 0x179   : > { %v893_v28 = vshrl.u32 %v875_v4, %v891_v59  ;;  %v896_v62 = vadd.s32 127, %v895_v27  ;;  %v1026_v12 = vadd.s32 %v1024_v58, %v1022_v51  ;;  %v1400_v16 = vsel %vm1389_vm15, nan, %v1399_v3 }
 0x17a   : > { %vm5827_vm11 = vcmp.le.f32.partialorder %v781_v25, 0.7853982  ;;  %v1018_v57 = vshrl.u32 %v1013_v11, 16  ;;  %v471_v60 = vand.u32 2147483647, %v8659_v0  ;;  %1794 = vmatpush.msrb.mxu3 %v1400_v16  ;;  %v5832_v5 = vadd.s32 %v1021_v56, %v1017_v37 }
 0x17b   : > { %v894_v52 = vor.u32 %v893_v28, %v892_v14  ;;  %v897_v31 = vshll.u32 %v896_v62, 23  ;;  %v1027_v4 = vadd.s32 %v1026_v12, %v1016_v17  ;;  %v906_v7 = vsel %vm783_vm8, %v905_v40, %v5767_v38 }
 0x17c   : > { %v975_v24 = vsel %vm969_vm1, %v972_v13, %v974_v61  ;;  %v478_v25 = vand.u32 8388607, %v471_v60  ;;  %v488_v11 = vshll.u32 %v8623_v50, %v8660_v10  ;;  %vm1031_vm10 = vc.u32 %v5818_v18, %v5832_v5 }
 0x17d   : > { %v898_v55 = vor.u32 4788187, %v897_v31  ;;  %v1028_v48 = vadd.s32 %v1027_v4, %v1018_v57  ;;  %v489_v46 = vshrl.u32 %v8624_v63, %v8661_v20  ;;  %vm661_vm2 = vcmp.lt.s32.totalorder %v8662_v33, 4 }
 0x17e   : > { %v479_v38 = vor.u32 8388608, %v478_v25  ;;  %v491_v6 = vshll.u32 %v8624_v63, %v8660_v10  ;;  %v492_v13 = vshrl.u32 %v8625_v42, %v8661_v20  ;;  %v494_v61 = vshll.u32 %v8625_v42, %v8660_v10 }
 0x17f   : > { %v899_v15 = vand.u32 2147483647, %v898_v55  ;;  %v901_v21 = vcvt.s32.f32 %v894_v52  ;;  %v1032_v49 = vadd.s32 1, %v1028_v48  ;;  %v495_v37 = vshrl.u32 %v8626_v32, %v8661_v20 }
 0x180   : > { %v908_v56 = vsel %vm5827_vm11, 0, %v906_v7  ;;  %v1029_v51 = vmul.u32 %v5710_v9, %v975_v24  ;;  %v490_v22 = vor.u32 %v489_v46, %v488_v11  ;;  %v493_v44 = vor.u32 %v492_v13, %v491_v6  ;;  %v8663_v9 = vld [vmem:[#allocation20_spill] sm:$0xff] }
 0x181   : > { %v902_v40 = vmul.f32 %v901_v21, %v899_v15  ;;  %v1033_v17 = vsel %vm1031_vm10, %v1032_v49, %v1028_v48  ;;  %v496_v30 = vor.u32 %v495_v37, %v494_v61  ;;  %vm505_vm1 = vcmp.lt.s32.totalorder %v8650_v19, 3 }
 0x182   : > { %v1034_v59 = vadd.s32 %v1033_v17, %v1029_v51  ;;  %vm503_vm3 = vcmp.lt.s32.totalorder %v8650_v19, 1  ;;  %v517_v27 = vsel %vm505_vm1, %v8656_v1, %v5771_v23  ;;  %v5868_v39 = vshll.u32 %v479_v38, 8 }
 0x183   : > { %v5872_v14 = vor.u32 %v5746_v34, %v8663_v9  ;;  %v903_v58 = vxor.u32 2147483648, %v902_v40  ;;  %vm504_vm4 = vcmp.lt.s32.totalorder %v8650_v19, 2  ;;  %v515_v3 = vsel %vm503_vm3, %v493_v44, %v496_v30 }
 0x184   : > { %v925_v28 = vadd.s32 3, %v908_v56  ;;  %v1035_v62 = vadd.s32 536870912, %v1034_v59  ;;  %v487_v12 = vshrl.u32 %v8623_v50, %v8661_v20  ;;  %v518_v1 = vsel %vm504_vm4, %v515_v3, %v517_v27 }
 0x185   : > { %v904_v23 = vsel %vm783_vm8, %v903_v58, %v902_v40  ;;  %v511_v34 = vsel %vm503_vm3, %v490_v22, %v493_v44  ;;  %v513_v16 = vsel %vm505_vm1, %v496_v30, %v5757_v29  ;;  %v5889_v57 = vand.u32 65535, %v5868_v39 }
 0x186   : > { %v907_v52 = vsel %vm5827_vm11, %v8641_v53, %v904_v23  ;;  %v5894_v31 = vshrl.u32 %v1035_v62, 30  ;;  %v522_v4 = vand.u32 65535, %v518_v1  ;;  %v523_v7 = vshrl.u32 %v518_v1, 16 }
 0x187   : > { %v657_v24 = vor.u32 %v5765_v36, %v5750_v54  ;;  %v5901_v25 = vsel %vm661_vm2, %v5872_v14, 920167782  ;;  %v909_v29 = vmul.f32 %v907_v52, %v907_v52  ;;  %v508_v11 = vsel %vm506_vm14, %v496_v30, 2102212464 }
 0x188   : > { %v1037_v10 = vshll.u32 %v5894_v31, 30  ;;  %v521_v41 = vshrl.u32 %v5868_v39, 16  ;;  %v525_v55 = vmul.u32 %v523_v7, %v5889_v57  ;;  %v5908_v46 = vand.u32 3, %v925_v28 }
 0x189   : > { %v910_v48 = vmul.f32 -0.001358992, %v909_v29  ;;  %v917_v20 = vmul.f32 -0.00019511016, %v909_v29  ;;  %v514_v54 = vsel %vm504_vm4, %v511_v34, %v513_v16  ;;  %v507_v38 = vsel %vm503_vm3, %v487_v12, %v490_v22 }
 0x18a   : > { %v5912_v36 = vsub.s32 %v1034_v59, %v1037_v10  ;;  %v5916_v6 = vmul.u32 %v522_v4, %v521_v41  ;;  %v528_v13 = vshll.u32 %v525_v55, 16  ;;  %v509_v21 = vsel %vm505_vm1, %v493_v44, %v508_v11 }
 0x18b   : > { %v911_v61 = vadd.f32 0.041655596, %v910_v48  ;;  %v918_v15 = vadd.f32 0.008332121, %v917_v20  ;;  %v524_v49 = vmul.u32 %v522_v4, %v5889_v57  ;;  %v527_v56 = vmul.u32 %v523_v7, %v521_v41 }
 0x18c   : > { %vm1039_vm14 = vcmp.lt.s32.totalorder %v5912_v36, 0  ;;  %v1040_v37 = vsub.s32 0, %v5912_v36  ;;  %v544_v51 = vand.u32 65535, %v514_v54  ;;  %v530_v59 = vshll.u32 %v5916_v6, 16 }
 0x18d   : > { %v912_v40 = vmul.f32 %v911_v61, %v909_v29  ;;  %v919_v17 = vmul.f32 %v918_v15, %v909_v29  ;;  %vm532_vm5 = vc.u32 %v524_v49, %v528_v13  ;;  %v534_v22 = vadd.s32 %v528_v13, %v524_v49 }
 0x18e   : > { %v1041_v30 = vsel %vm1039_vm14, %v1040_v37, %v5912_v36  ;;  %v533_v27 = vsel %vm532_vm5, 1, %v8622_v35  ;;  %v545_v9 = vshrl.u32 %v514_v54, 16  ;;  %v5928_v62 = vsel %vm661_vm2, %v657_v24, 1326507024 }
 0x18f   : > { %v913_v44 = vadd.f32 -0.4999988, %v912_v40  ;;  %v920_v58 = vadd.f32 -0.16666654, %v919_v17  ;;  %v1042_v3 = vclz %v1041_v30  ;;  %v535_v28 = vadd.s32 %v533_v27, %v527_v56 }
 0x190   : > { %vm928_vm6 = vcmp.eq.s32.totalorder %v5908_v46, 0  ;;  %vm931_vm13 = vcmp.eq.s32.totalorder %v5908_v46, 2  ;;  %vm536_vm15 = vc.u32 %v534_v22, %v530_v59  ;;  %vm927_vm7 = vcmp.lt.s32.totalorder %v5908_v46, 2  ;;  %v8664_v22 = vld [vmem:[#allocation6_spill] sm:$0xff] }
 0x191   : > { %v914_v12 = vmul.f32 %v913_v44, %v909_v29  ;;  %v921_v1 = vmul.f32 %v920_v58, %v909_v29  ;;  %v4567_v23 = vadd.s32 4294967294, %v1042_v3  ;;  %v537_v34 = vsel %vm536_vm15, 1, %v8622_v35 }
 0x192   : > { %vm924_vm8 = vweird.f32 %v8641_v53  ;;  %v1030_v16 = vadd.s32 %v5832_v5, %v5818_v18  ;;  %v5939_v4 = vsel %vm504_vm4, %v507_v38, %v509_v21  ;;  %v539_v7 = vadd.s32 %v537_v34, %v535_v28 }
 0x193   : > { %v547_v24 = vmul.u32 %v545_v9, %v5889_v57  ;;  %v915_v10 = vadd.f32 1.0, %v914_v12  ;;  %v922_v11 = vadd.f32 1.0, %v921_v1  ;;  %vm4568_vm12 = vcmp.lt.s32.totalorder %v4567_v23, 0 }
 0x194   : > { %v548_v29 = vmul.u32 %v544_v51, %v521_v41  ;;  %v1045_v48 = vsel %vm4568_vm12, 0, %v4567_v23  ;;  %v529_v20 = vshrl.u32 %v525_v55, 16  ;;  %v531_v54 = vshrl.u32 %v5916_v6, 16 }
 0x195   : > { %v550_v13 = vshll.u32 %v547_v24, 16  ;;  %v923_v61 = vmul.f32 %v922_v11, %v907_v52  ;;  %v932_v15 = vxor.u32 2147483648, %v915_v10  ;;  %v1046_v49 = vsub.s32 32, %v1045_v48 }
 0x196   : > { %v546_v18 = vmul.u32 %v544_v51, %v5889_v57  ;;  %v1047_v19 = vshll.u32 %v5912_v36, %v1045_v48  ;;  %v1050_v5 = vsub.s32 4294967266, %v1045_v48  ;;  %v540_v38 = vadd.s32 %v539_v7, %v529_v20 }
 0x197   : > { %v549_v21 = vmul.u32 %v545_v9, %v521_v41  ;;  %v929_v37 = vxor.u32 2147483648, %v923_v61  ;;  %v1048_v56 = vshrl.u32 %v1030_v16, %v1046_v49  ;;  %v552_v40 = vshll.u32 %v548_v29, 16 }
 0x198   : > { %vm554_vm9 = vc.u32 %v546_v18, %v550_v13  ;;  %v933_v55 = vsel %vm931_vm13, %v932_v15, %v923_v61  ;;  %vm938_vm11 = vcmp.lt.s32.totalorder %v8648_v26, 0  ;;  %v1051_v6 = vadd.s32 127, %v1050_v5 }
 0x199   : > { %v555_v52 = vsel %vm554_vm9, 1, %v8622_v35  ;;  %v556_v17 = vadd.s32 %v550_v13, %v546_v18  ;;  %v930_v57 = vsel %vm928_vm6, %v915_v10, %v929_v37  ;;  %v1049_v36 = vor.u32 %v1048_v56, %v1047_v19 }
 0x19a   : > { %v557_v51 = vadd.s32 %v555_v52, %v549_v21  ;;  %v626_v41 = vand.u32 2147483647, %v8664_v22  ;;  %v934_v30 = vsel %vm927_vm7, %v930_v57, %v933_v55  ;;  %v1052_v59 = vshll.u32 %v1051_v6, 23 }
 0x19b   : > { %v1060_v27 = vsub.s32 4, %v5894_v31  ;;  %vm558_vm10 = vc.u32 %v556_v17, %v552_v40  ;;  %v935_v9 = vsel %vm924_vm8, nan, %v934_v30  ;;  %vm5959_vm1 = vcmp.le.f32.partialorder %v936_v8, 0.7853982 }
 0x19c   : > { %v5963_v58 = vadd.s32 %v540_v38, %v531_v54  ;;  %v551_v3 = vshrl.u32 %v547_v24, 16  ;;  %v559_v28 = vsel %vm558_vm10, 1, %v8622_v35  ;;  %1766 = vmatpush.msrb.mxu2 %v935_v9  ;;  %v1053_v46 = vor.u32 4788187, %v1052_v59 }
 0x19d   : > { %v553_v12 = vshrl.u32 %v548_v29, 16  ;;  %v5966_v1 = vadd.s32 %v556_v17, %v552_v40  ;;  %v561_v23 = vadd.s32 %v559_v28, %v557_v51  ;;  %v1056_v34 = vcvt.s32.f32 %v1049_v36 }
 0x19e   : > { %v633_v53 = vand.u32 8388607, %v626_v41  ;;  %v643_v8 = vshll.u32 %v8623_v50, %v8655_v43  ;;  %v644_v16 = vshrl.u32 %v8624_v63, %v8653_v47  ;;  %v1054_v7 = vand.u32 2147483647, %v1053_v46 }
 0x19f   : > { %v562_v24 = vadd.s32 %v561_v23, %v551_v3  ;;  %v646_v10 = vshll.u32 %v8624_v63, %v8655_v43  ;;  %v647_v11 = vshrl.u32 %v8625_v42, %v8653_v47  ;;  %v649_v20 = vshll.u32 %v8625_v42, %v8655_v43 }
 0x1a0   : > { %v634_v29 = vor.u32 8388608, %v633_v53  ;;  %v5978_v48 = vor.u32 %v644_v16, %v643_v8  ;;  %v650_v54 = vshrl.u32 %v8626_v32, %v8653_v47  ;;  %v1057_v13 = vmul.f32 %v1056_v34, %v1054_v7 }
 0x1a1   : > { %v563_v61 = vadd.s32 %v562_v24, %v553_v12  ;;  %v564_v15 = vmul.u32 %v5868_v39, %v5939_v4  ;;  %v5986_v49 = vor.u32 %v647_v11, %v646_v10  ;;  %v1061_v18 = vsel %vm938_vm11, %v1060_v27, %v5894_v31 }
 0x1a2   : > { %vm566_vm3 = vc.u32 %v5963_v58, %v5966_v1  ;;  %v5993_v19 = vor.u32 %v650_v54, %v649_v20  ;;  %vm660_vm4 = vcmp.lt.s32.totalorder %v8662_v33, 3  ;;  %v1058_v43 = vxor.u32 2147483648, %v1057_v13 }
 0x1a3   : > { %v567_v5 = vadd.s32 1, %v563_v61  ;;  %vm658_vm14 = vcmp.lt.s32.totalorder %v8662_v33, 1  ;;  %v672_v39 = vsel %vm660_vm4, %v5872_v14, %v5928_v62  ;;  %v6013_v21 = vshll.u32 %v634_v29, 8 }
 0x1a4   : > { %v666_v31 = vsel %vm658_vm14, %v5978_v48, %v5986_v49  ;;  %v668_v4 = vsel %vm660_vm4, %v5993_v19, %v5901_v25  ;;  %v670_v38 = vsel %vm658_vm14, %v5986_v49, %v5993_v19  ;;  %v1059_v14 = vsel %vm938_vm11, %v1058_v43, %v1057_v13 }
 0x1a5   : > { %v1063_v62 = vsel %vm5959_vm1, 0, %v1061_v18  ;;  %v568_v37 = vsel %vm566_vm3, %v567_v5, %v563_v61  ;;  %vm659_vm5 = vcmp.lt.s32.totalorder %v8662_v33, 2  ;;  %v1062_v25 = vsel %vm5959_vm1, %v8648_v26, %v1059_v14 }
 0x1a6   : > { %v569_v56 = vadd.s32 %v568_v37, %v564_v15  ;;  %v673_v40 = vsel %vm659_vm5, %v670_v38, %v672_v39  ;;  %v1064_v55 = vmul.f32 %v1062_v25, %v1062_v25  ;;  %v6027_v6 = vsel %vm659_vm5, %v666_v31, %v668_v4 }
 0x1a7   : > { %v677_v52 = vand.u32 65535, %v673_v40  ;;  %v1080_v17 = vadd.s32 3, %v1063_v62  ;;  %v675_v36 = vand.u32 65535, %v6013_v21  ;;  %v678_v51 = vshrl.u32 %v673_v40, 16 }
 0x1a8   : > { %v570_v57 = vadd.s32 536870912, %v569_v56  ;;  %v1065_v30 = vmul.f32 -0.001358992, %v1064_v55  ;;  %v1072_v59 = vmul.f32 -0.00019511016, %v1064_v55  ;;  %v676_v27 = vshrl.u32 %v6013_v21, 16 }
 0x1a9   : > { %v680_v44 = vmul.u32 %v678_v51, %v675_v36  ;;  %v700_v3 = vshrl.u32 %v6027_v6, 16  ;;  %v1081_v23 = vand.u32 3, %v1080_v17  ;;  %v679_v53 = vmul.u32 %v677_v52, %v675_v36 }
 0x1aa   : > { %v6031_v9 = vshrl.u32 %v570_v57, 30  ;;  %v1066_v28 = vadd.f32 0.041655596, %v1065_v30  ;;  %v1073_v46 = vadd.f32 0.008332121, %v1072_v59  ;;  %v6034_v12 = vmul.u32 %v677_v52, %v676_v27 }
 0x1ab   : > { %v683_v8 = vshll.u32 %v680_v44, 16  ;;  %v682_v24 = vmul.u32 %v678_v51, %v676_v27  ;;  %v699_v10 = vand.u32 65535, %v6027_v6  ;;  %v6038_v20 = vmul.u32 %v700_v3, %v675_v36 }
 0x1ac   : > { %v572_v34 = vshll.u32 %v6031_v9, 30  ;;  %v1067_v16 = vmul.f32 %v1066_v28, %v1064_v55  ;;  %v1074_v7 = vmul.f32 %v1073_v46, %v1064_v55  ;;  %v685_v61 = vshll.u32 %v6034_v12, 16 }
 0x1ad   : > { %vm687_vm6 = vc.u32 %v679_v53, %v683_v8  ;;  %v689_v29 = vadd.s32 %v683_v8, %v679_v53  ;;  %vm1082_vm15 = vcmp.lt.s32.totalorder %v1081_v23, 2  ;;  %vm1079_vm8 = vweird.f32 %v8648_v26 }
 0x1ae   : > { %v573_v11 = vsub.s32 %v569_v56, %v572_v34  ;;  %v1068_v54 = vadd.f32 -0.4999988, %v1067_v16  ;;  %v1075_v13 = vadd.f32 -0.16666654, %v1074_v7  ;;  %v688_v15 = vsel %vm687_vm6, 1, %v8622_v35 }
 0x1af   : > { %v690_v43 = vadd.s32 %v688_v15, %v682_v24  ;;  %vm691_vm7 = vc.u32 %v689_v29, %v685_v61  ;;  %v703_v38 = vmul.u32 %v699_v10, %v676_v27  ;;  %v705_v14 = vshll.u32 %v6038_v20, 16 }
 0x1b0   : > { %vm574_vm13 = vcmp.lt.s32.totalorder %v573_v11, 0  ;;  %v575_v18 = vsub.s32 0, %v573_v11  ;;  %v1069_v5 = vmul.f32 %v1068_v54, %v1064_v55  ;;  %v1076_v39 = vmul.f32 %v1075_v13, %v1064_v55 }
 0x1b1   : > { %v692_v4 = vsel %vm691_vm7, 1, %v8622_v35  ;;  %vm1083_vm12 = vcmp.eq.s32.totalorder %v1081_v23, 0  ;;  %vm1086_vm9 = vcmp.eq.s32.totalorder %v1081_v23, 2  ;;  %v565_v40 = vadd.s32 %v5966_v1, %v5963_v58 }
 0x1b2   : > { %v576_v31 = vsel %vm574_vm13, %v575_v18, %v573_v11  ;;  %v1070_v62 = vadd.f32 1.0, %v1069_v5  ;;  %v1077_v37 = vadd.f32 1.0, %v1076_v39  ;;  %v694_v6 = vadd.s32 %v692_v4, %v690_v43 }
 0x1b3   : > { %v577_v56 = vclz %v576_v31  ;;  %v701_v55 = vmul.u32 %v699_v10, %v675_v36  ;;  %v642_v51 = vshrl.u32 %v8623_v50, %v8653_v47  ;;  %v684_v30 = vshrl.u32 %v680_v44, 16 }
 0x1b4   : > { %v1078_v52 = vmul.f32 %v1077_v37, %v1062_v25  ;;  %v1087_v17 = vxor.u32 2147483648, %v1070_v62  ;;  %v707_v59 = vshll.u32 %v703_v38, 16  ;;  %v663_v34 = vsel %vm661_vm2, %v5993_v19, 2102212464 }
 0x1b5   : > { %v4558_v57 = vadd.s32 4294967294, %v577_v56  ;;  %vm709_vm11 = vc.u32 %v701_v55, %v705_v14  ;;  %v711_v28 = vadd.s32 %v705_v14, %v701_v55  ;;  %v704_v53 = vmul.u32 %v700_v3, %v676_v27 }
 0x1b6   : > { %v1084_v46 = vxor.u32 2147483648, %v1078_v52  ;;  %v695_v1 = vadd.s32 %v694_v6, %v684_v30  ;;  %v710_v25 = vsel %vm709_vm11, 1, %v8622_v35  ;;  %v1088_v47 = vsel %vm1086_vm9, %v1087_v17, %v1078_v52 }
 0x1b7   : > { %vm4559_vm10 = vcmp.lt.s32.totalorder %v4558_v57, 0  ;;  %vm713_vm1 = vc.u32 %v711_v28, %v707_v59  ;;  %v686_v7 = vshrl.u32 %v6034_v12, 16  ;;  %v712_v24 = vadd.s32 %v710_v25, %v704_v53 }
 0x1b8   : > { %v580_v58 = vsel %vm4559_vm10, 0, %v4558_v57  ;;  %v1085_v36 = vsel %vm1083_vm12, %v1070_v62, %v1084_v46  ;;  %v714_v10 = vsel %vm713_vm1, 1, %v8622_v35  ;;  %v662_v54 = vsel %vm658_vm14, %v642_v51, %v5978_v48 }
 0x1b9   : > { %v581_v44 = vsub.s32 32, %v580_v58  ;;  %v585_v8 = vsub.s32 4294967266, %v580_v58  ;;  %v1089_v16 = vsel %vm1082_vm15, %v1085_v36, %v1088_v47  ;;  %v582_v27 = vshll.u32 %v573_v11, %v580_v58 }
 0x1ba   : > { %v1090_v19 = vsel %vm1079_vm8, nan, %v1089_v16  ;;  %v706_v13 = vshrl.u32 %v6038_v20, 16  ;;  %v716_v23 = vadd.s32 %v714_v10, %v712_v24  ;;  %v664_v12 = vsel %vm660_vm4, %v5986_v49, %v663_v34 }
 0x1bb   : > { %v583_v3 = vshrl.u32 %v565_v40, %v581_v44  ;;  %v586_v29 = vadd.s32 127, %v585_v8  ;;  %1795 = vmatpush.msrb.mxu3 %v1090_v19  ;;  %v696_v18 = vadd.s32 %v695_v1, %v686_v7  ;;  %v708_v26 = vshrl.u32 %v703_v38, 16 }
 0x1bc   : > { %v717_v43 = vadd.s32 %v716_v23, %v706_v13  ;;  %v715_v5 = vadd.s32 %v711_v28, %v707_v59  ;;  %v665_v39 = vsel %vm659_vm5, %v662_v54, %v664_v12  ;;  %vm473_vm3 = vcmp.lt.s32.totalorder %v8659_v0, 0 }
 0x1bd   : > { %v584_v61 = vor.u32 %v583_v3, %v582_v27  ;;  %v587_v15 = vshll.u32 %v586_v29, 23  ;;  %v719_v62 = vmul.u32 %v6013_v21, %v665_v39  ;;  %vm6073_vm4 = vcmp.le.f32.partialorder %v471_v60, 0.7853982 }
 0x1be   : > { %v718_v31 = vadd.s32 %v717_v43, %v708_v26  ;;  %vm721_vm2 = vc.u32 %v696_v18, %v715_v5  ;;  %v595_v38 = vsub.s32 4, %v6031_v9  ;;  %v720_v29 = vadd.s32 %v715_v5, %v696_v18  ;;  %v1711_v18 = vld [vmem:[%s8444_s3] sm:$0xff] }
 0x1bf   : > { %v588_v11 = vor.u32 4788187, %v587_v15  ;;  %v591_v48 = vcvt.s32.f32 %v584_v61  ;;  %vm614_vm7 = vweird.f32 %v8659_v0  ;;  %vm8579_vm8 = vcmask 261120  }
 0x1c0   : > { %v722_v20 = vadd.s32 1, %v718_v31  ;;  %v596_v17 = vsel %vm473_vm3, %v595_v38, %v6031_v9  ;;  %vm628_vm12 = vcmp.lt.s32.totalorder %v8664_v22, 0  ;;  %vm6098_vm9 = vcmp.le.f32.partialorder %v626_v41, 0.7853982  ;;  %v1713_v41 = vld [vmem:[%s8444_s3 + $0x10] sm:$0xff] }
 0x1c1   : > { %v589_v4 = vand.u32 2147483647, %v588_v11  ;;  %v598_v46 = vsel %vm6073_vm4, 0, %v596_v17 }
 0x1c2   : > { %v723_v37 = vsel %vm721_vm2, %v722_v20, %v718_v31  ;;  %v615_v36 = vadd.s32 3, %v598_v46  ;;  %vm769_vm2 = vweird.f32 %v8664_v22 }
 0x1c3   : > { %v592_v14 = vmul.f32 %v591_v48, %v589_v4  ;;  %v724_v40 = vadd.s32 %v723_v37, %v719_v62 }
 0x1c4   : > { %v616_v10 = vand.u32 3, %v615_v36 }
 0x1c5   : > { %v593_v56 = vxor.u32 2147483648, %v592_v14  ;;  %v725_v6 = vadd.s32 536870912, %v724_v40 }
 0x1c6   : > { %vm618_vm6 = vcmp.eq.s32.totalorder %v616_v10, 0  ;;  %vm621_vm13 = vcmp.eq.s32.totalorder %v616_v10, 2  ;;  %vm617_vm15 = vcmp.lt.s32.totalorder %v616_v10, 2  ;;  %v3057_v10 = vld [vmem:[%s8447_s6 + $0x18] sm:$0xff] }
 0x1c7   : > { %v594_v33 = vsel %vm473_vm3, %v593_v56, %v592_v14  ;;  %v6081_v52 = vshrl.u32 %v725_v6, 30 }
 0x1c8   : > { %v597_v55 = vsel %vm6073_vm4, %v8659_v0, %v594_v33  ;;  %v1712_v0 = vld [vmem:[%s8444_s3 + $0x8] sm:$0xff] }
 0x1c9   : > { %v599_v21 = vmul.f32 %v597_v55, %v597_v55  ;;  %v727_v60 = vshll.u32 %v6081_v52, 30 }
 0x1cb   : > { %v600_v57 = vmul.f32 -0.001358992, %v599_v21  ;;  %v607_v51 = vmul.f32 -0.00019511016, %v599_v21  ;;  %v728_v28 = vsub.s32 %v724_v40, %v727_v60  ;;  %v750_v40 = vsub.s32 4, %v6081_v52 }
 0x1cd   : > { %v601_v30 = vadd.f32 0.041655596, %v600_v57  ;;  %v608_v59 = vadd.f32 0.008332121, %v607_v51  ;;  %vm729_vm14 = vcmp.lt.s32.totalorder %v728_v28, 0  ;;  %v730_v58 = vsub.s32 0, %v728_v28 }
 0x1cf   : > { %v602_v34 = vmul.f32 %v601_v30, %v599_v21  ;;  %v609_v53 = vmul.f32 %v608_v59, %v599_v21  ;;  %v731_v47 = vsel %vm729_vm14, %v730_v58, %v728_v28  ;;  %v1714_v58 = vld [vmem:[%s8444_s3 + $0x18] sm:$0xff] }
 0x1d0   : > { %v732_v44 = vclz %v731_v47  ;;  %v1718_v47 = vld [vmem:[%s8445_s4 + $0x18] sm:$0xff] }
 0x1d1   : > { %v603_v1 = vadd.f32 -0.4999988, %v602_v34  ;;  %v610_v25 = vadd.f32 -0.16666654, %v609_v53  ;;  %1736 = vperm.xlu2 %4720, %v1718_v47  }
 0x1d2   : > { %v4561_v16 = vadd.s32 4294967294, %v732_v44 }
 0x1d3   : > { %v604_v9 = vmul.f32 %v603_v1, %v599_v21  ;;  %v611_v8 = vmul.f32 %v610_v25, %v599_v21 }
 0x1d4   : > { %vm4562_vm5 = vcmp.lt.s32.totalorder %v4561_v16, 0 }
 0x1d5   : > { %v605_v7 = vadd.f32 1.0, %v604_v9  ;;  %v612_v24 = vadd.f32 1.0, %v611_v8  ;;  %v735_v3 = vsel %vm4562_vm5, 0, %v4561_v16 }
 0x1d6   : > { %v736_v54 = vsub.s32 32, %v735_v3  ;;  %v740_v13 = vsub.s32 4294967266, %v735_v3  ;;  %v737_v61 = vshll.u32 %v728_v28, %v735_v3 }
 0x1d7   : > { %v613_v19 = vmul.f32 %v612_v24, %v597_v55  ;;  %v622_v27 = vxor.u32 2147483648, %v605_v7  ;;  %v751_v55 = vsel %vm628_vm12, %v750_v40, %v6081_v52  ;;  %v1717_v24 = vld [vmem:[%s8445_s4 + $0x10] sm:$0xff] }
 0x1d8   : > { %v738_v15 = vshrl.u32 %v720_v29, %v736_v54  ;;  %v741_v12 = vadd.s32 127, %v740_v13  ;;  %v753_v57 = vsel %vm6098_vm9, 0, %v751_v55  ;;  %v1727_v13 = vpop.permute.xlu0 %1726 }
 0x1d9   : > { %v619_v23 = vxor.u32 2147483648, %v613_v19  ;;  %v623_v43 = vsel %vm621_vm13, %v622_v27, %v613_v19  ;;  %v770_v28 = vadd.s32 3, %v753_v57  ;;  %1731 = vperm.xlu2 %4720, %v1717_v24   ;;  %v1722_v27 = vpop.permute.xlu1 %1721 }
 0x1da   : > { %v739_v39 = vor.u32 %v738_v15, %v737_v61  ;;  %v742_v31 = vshll.u32 %v741_v12, 23 }
 0x1db   : > { %v620_v26 = vsel %vm618_vm6, %v605_v7, %v619_v23  ;;  %v771_v1 = vand.u32 3, %v770_v28 }
 0x1dc   : > { %v624_v11 = vsel %vm617_vm15, %v620_v26, %v623_v43  ;;  %v743_v5 = vor.u32 4788187, %v742_v31  ;;  %v746_v20 = vcvt.s32.f32 %v739_v39 }
 0x1dd   : > { %v625_v4 = vsel %vm614_vm7, nan, %v624_v11  ;;  %vm773_vm11 = vcmp.eq.s32.totalorder %v771_v1, 0  ;;  %vm776_vm10 = vcmp.eq.s32.totalorder %v771_v1, 2  ;;  %vm772_vm1 = vcmp.lt.s32.totalorder %v771_v1, 2 }
 0x1de   : > { %1767 = vmatpush.msrb.mxu2 %v625_v4  ;;  %v744_v48 = vand.u32 2147483647, %v743_v5 }
 0x1df   : > { %4581 = vmatmul.msk.f32.vlgmr.msrb.gmra.mxu2 %vm8579_vm8, %v1711_v18 }
 0x1e0   : > { %v747_v14 = vmul.f32 %v746_v20, %v744_v48 }
 0x1e1   : > { %3075 = vperm.xlu2 %4720, %v3057_v10  }
 0x1e2   : > { %v748_v62 = vxor.u32 2147483648, %v747_v14 }
 0x1e4   : > { %v749_v56 = vsel %vm628_vm12, %v748_v62, %v747_v14 }
 0x1e5   : > { %v752_v49 = vsel %vm6098_vm9, %v8664_v22, %v749_v56  ;;  %v3054_v22 = vld [vmem:[%s8447_s6] sm:$0xff] }
 0x1e6   : > { %v754_v33 = vmul.f32 %v752_v49, %v752_v49 }
 0x1e7   : > { %4582 = vmatmul.msk.f32.gmra.mxu2 %vm8579_vm8, %v1712_v0 }
 0x1e8   : > { %v755_v38 = vmul.f32 -0.001358992, %v754_v33  ;;  %v762_v6 = vmul.f32 -0.00019511016, %v754_v33 }
 0x1e9   : > { %3060 = vperm.xlu2 %4720, %v3054_v22  }
 0x1ea   : > { %v756_v21 = vadd.f32 0.041655596, %v755_v38  ;;  %v763_v17 = vadd.f32 0.008332121, %v762_v6 }
 0x1ec   : > { %v757_v51 = vmul.f32 %v756_v21, %v754_v33  ;;  %v764_v60 = vmul.f32 %v763_v17, %v754_v33 }
 0x1ee   : > { %v758_v30 = vadd.f32 -0.4999988, %v757_v51  ;;  %v765_v59 = vadd.f32 -0.16666654, %v764_v60 }
 0x1ef   : > { %4583 = vmatmul.msk.f32.gmra.mxu2 %vm8579_vm8, %v1713_v41 }
 0x1f0   : > { %v759_v46 = vmul.f32 %v758_v30, %v754_v33  ;;  %v766_v34 = vmul.f32 %v765_v59, %v754_v33 }
 0x1f2   : > { %v760_v53 = vadd.f32 1.0, %v759_v46  ;;  %v767_v52 = vadd.f32 1.0, %v766_v34 }
 0x1f4   : > { %v768_v25 = vmul.f32 %v767_v52, %v752_v49  ;;  %v777_v36 = vxor.u32 2147483648, %v760_v53 }
 0x1f6   : > { %v774_v44 = vxor.u32 2147483648, %v768_v25  ;;  %v778_v8 = vsel %vm776_vm10, %v777_v36, %v768_v25 }
 0x1f7   : > { %4584 = vmatmul.msk.f32.gmra.mxu2 %vm8579_vm8, %v1714_v58 }
 0x1f8   : > { %v775_v9 = vsel %vm773_vm11, %v760_v53, %v774_v44 }
 0x1f9   : > { %v779_v16 = vsel %vm772_vm1, %v775_v9, %v778_v8 }
 0x1fa   : > { %v780_v7 = vsel %vm769_vm2, nan, %v779_v16 }
 0x1fb   : > { %1796 = vmatpush.msrb.mxu3 %v780_v7 }
 0x1fc   : > { %4585 = vmatmul.msk.f32.vlgmr.msrb.gmra.mxu3 %vm8579_vm8, %v1711_v18 }
 0x204   : > { %4586 = vmatmul.msk.f32.gmra.mxu3 %vm8579_vm8, %v1712_v0 }
 0x20c   : > { %4587 = vmatmul.msk.f32.gmra.mxu3 %vm8579_vm8, %v1713_v41 }
 0x214   : > { %4588 = vmatmul.msk.f32.gmra.mxu3 %vm8579_vm8, %v1714_v58 }
 0x22b   : > { %v6138_v54 = vpop.permute.xlu2 %1736 }
 0x233   : > { %v1732_v31 = vpop.permute.xlu2 %1731 }
 0x262   : > { %v1769_v19 = vpop.f32.mrf.mxu2 }
 0x263   : > { %v6135_v3 = vadd.f32 %v1769_v19, %v1722_v27 }
 0x265   : > { %8671 = vst [vmem:[#allocation23_spill] sm:$0xff] %v6135_v3  ;;  %v1813_v29 = vand.u32 2139095040, %v6135_v3 }
 0x267   : > { %v1814_v61 = vshrl.u32 %v1813_v29, 23 }
 0x269   : > { %v4589_v26 = vadd.s32 4294967169, %v1814_v61 }
 0x26a   : > { %v1772_v23 = vpop.f32.mrf.mxu2 }
 0x26b   : > { %v6140_v15 = vadd.f32 %v1772_v23, %v1727_v13  ;;  %v1820_v39 = vadd.s32 1, %v4589_v26 }
 0x26d   : > { %v2123_v12 = vand.u32 2139095040, %v6140_v15  ;;  %vm1821_vm3 = vcmp.gt.s32.totalorder %v1820_v39, 0 }
 0x26e   : > { %v1822_v0 = vsel %vm1821_vm3, %v1820_v39, 0 }
 0x26f   : > { %v2124_v43 = vshrl.u32 %v2123_v12, 23  ;;  %v6152_v38 = vand.u32 31, %v1822_v0  ;;  %v6166_v53 = vshrl.u32 %v1822_v0, 5 }
 0x271   : > { %v4595_v11 = vadd.s32 4294967169, %v2124_v43  ;;  %8673 = vst [vmem:[#allocation14_spill] sm:$0xff] %v6152_v38  ;;  %v6160_v51 = vsub.s32 32, %v6152_v38  ;;  %v1836_v36 = vshll.u32 %v8626_v32, %v6152_v38  ;;  %v1839_v8 = vshll.u32 %v8654_v2, %v6152_v38 }
 0x272   : > { %v1775_v4 = vpop.f32.mrf.mxu2  ;;  %8678 = vst [vmem:[#allocation21_spill] sm:$0xff] %v6166_v53  ;;  %vm1845_vm6 = vcmp.lt.s32.totalorder %v6166_v53, 4 }
 0x273   : > { %v2130_v18 = vadd.s32 1, %v4595_v11  ;;  %v6143_v5 = vadd.f32 %v1775_v4, %v1732_v31  ;;  %8676 = vst [vmem:[#allocation24_spill] sm:$0xff] %v6160_v51  ;;  %v1837_v52 = vshrl.u32 %v8654_v2, %v6160_v51  ;;  %v1840_v47 = vshrl.u32 %v8631_v45, %v6160_v51 }
 0x275   : > { %v2433_v20 = vand.u32 2139095040, %v6143_v5  ;;  %vm2131_vm4 = vcmp.gt.s32.totalorder %v2130_v18, 0  ;;  %v1841_v23 = vor.u32 %v1840_v47, %v1839_v8 }
 0x276   : > { %v2132_v56 = vsel %vm2131_vm4, %v2130_v18, 0 }
 0x277   : > { %v2434_v62 = vshrl.u32 %v2433_v20, 23  ;;  %v6154_v21 = vand.u32 31, %v2132_v56  ;;  %v6189_v29 = vshrl.u32 %v2132_v56, 5 }
 0x279   : > { %v4601_v37 = vadd.s32 4294967169, %v2434_v62  ;;  %8674 = vst [vmem:[#allocation16_spill] sm:$0xff] %v6154_v21  ;;  %v6164_v59 = vsub.s32 32, %v6154_v21  ;;  %v2146_v16 = vshll.u32 %v8626_v32, %v6154_v21  ;;  %v2149_v12 = vshll.u32 %v8654_v2, %v6154_v21 }
 0x27a   : > { %v1778_v40 = vpop.f32.mrf.mxu2  ;;  %8680 = vst [vmem:[#allocation15_spill] sm:$0xff] %v6189_v29  ;;  %vm2155_vm15 = vcmp.lt.s32.totalorder %v6189_v29, 4 }
 0x27b   : > { %v6150_v33 = vadd.f32 %v1778_v40, %v6138_v54  ;;  %v2440_v55 = vadd.s32 1, %v4601_v37  ;;  %8677 = vst [vmem:[#allocation8_spill] sm:$0xff] %v6164_v59  ;;  %v2147_v44 = vshrl.u32 %v8654_v2, %v6164_v59  ;;  %v2150_v10 = vshrl.u32 %v8631_v45, %v6164_v59 }
 0x27d   : > { %v2743_v41 = vand.u32 2139095040, %v6150_v33  ;;  %vm2441_vm14 = vcmp.gt.s32.totalorder %v2440_v55, 0  ;;  %v6191_v61 = vor.u32 %v2147_v44, %v2146_v16  ;;  %v2151_v39 = vor.u32 %v2150_v10, %v2149_v12 }
 0x27e   : > { %v2442_v34 = vsel %vm2441_vm14, %v2440_v55, 0 }
 0x27f   : > { %v1798_v48 = vpop.f32.mrf.mxu3  ;;  %v2744_v30 = vshrl.u32 %v2743_v41, 23  ;;  %v6182_v7 = vand.u32 31, %v2442_v34  ;;  %8681 = vst [vmem:[#allocation18_spill] sm:$0xff] %v6191_v61  ;;  %v6212_v20 = vsel %vm2155_vm15, %v6191_v61, 920167782 }
 0x280   : > { %v6146_v14 = vadd.f32 %v1798_v48, %v1722_v27  ;;  %v6187_v27 = vor.u32 %v1837_v52, %v1836_v36  ;;  %v6207_v48 = vsel %vm1845_vm6, %v1841_v23, 1326507024  ;;  %8684 = vst [vmem:[#allocation17_spill] sm:$0xff] %v6212_v20 }
 0x281   : > { %v4607_v28 = vadd.s32 4294967169, %v2744_v30  ;;  %v6196_v43 = vsub.s32 32, %v6182_v7  ;;  %8683 = vst [vmem:[#allocation13_spill] sm:$0xff] %v6207_v48  ;;  %v2456_v56 = vshll.u32 %v8626_v32, %v6182_v7  ;;  %v2459_v55 = vshll.u32 %v8654_v2, %v6182_v7 }
 0x282   : > { %8672 = vst [vmem:[#allocation7_spill] sm:$0xff] %v6146_v14  ;;  %v1968_v49 = vand.u32 2139095040, %v6146_v14 }
 0x283   : > { %v2750_v25 = vadd.s32 1, %v4607_v28  ;;  %8679 = vst [vmem:[#allocation11_spill] sm:$0xff] %v6187_v27  ;;  %v2457_v40 = vshrl.u32 %v8654_v2, %v6196_v43  ;;  %v2460_v41 = vshrl.u32 %v8631_v45, %v6196_v43 }
 0x284   : > { %v1969_v57 = vshrl.u32 %v1968_v49, 23 }
 0x285   : > { %vm2751_vm5 = vcmp.gt.s32.totalorder %v2750_v25, 0  ;;  %v2461_v44 = vor.u32 %v2460_v41, %v2459_v55 }
 0x286   : > { %v4592_v46 = vadd.s32 4294967169, %v1969_v57  ;;  %v2752_v19 = vsel %vm2751_vm5, %v2750_v25, 0  ;;  %v6244_v25 = vor.u32 %v2457_v40, %v2456_v56 }
 0x287   : > { %v1801_v6 = vpop.f32.mrf.mxu3  ;;  %v2754_v11 = vand.u32 31, %v2752_v19  ;;  %v6247_v8 = vshrl.u32 %v2752_v19, 5 }
 0x288   : > { %v6156_v17 = vadd.f32 %v1801_v6, %v1727_v13  ;;  %v1975_v24 = vadd.s32 1, %v4592_v46  ;;  %v6225_v6 = vsel %vm2155_vm15, %v2151_v39, 1326507024 }
 0x289   : > { %v6214_v0 = vsub.s32 32, %v2754_v11  ;;  %8685 = vst [vmem:[#allocation5_spill] sm:$0xff] %v6225_v6  ;;  %v2766_v52 = vshll.u32 %v8626_v32, %v2754_v11  ;;  %v2769_v36 = vshll.u32 %v8654_v2, %v2754_v11  ;;  %v2760_v12 = vshll.u32 %v8624_v63, %v2754_v11 }
 0x28a   : > { %8675 = vst [vmem:[#allocation22_spill] sm:$0xff] %v6156_v17  ;;  %v2278_v60 = vand.u32 2139095040, %v6156_v17  ;;  %vm1976_vm13 = vcmp.gt.s32.totalorder %v1975_v24, 0  ;;  %vm2775_vm11 = vcmp.lt.s32.totalorder %v6247_v8, 4  ;;  %vm2772_vm1 = vcmp.lt.s32.totalorder %v6247_v8, 1 }
 0x28b   : > { %v1977_v37 = vsel %vm1976_vm13, %v1975_v24, 0  ;;  %v2767_v57 = vshrl.u32 %v8654_v2, %v6214_v0  ;;  %vm2774_vm2 = vcmp.lt.s32.totalorder %v6247_v8, 3  ;;  %vm2773_vm3 = vcmp.lt.s32.totalorder %v6247_v8, 2 }
 0x28c   : > { %v2279_v58 = vshrl.u32 %v2278_v60, 23  ;;  %v6233_v60 = vshrl.u32 %v2442_v34, 5  ;;  %v6238_v28 = vshrl.u32 %v1977_v37, 5 }
 0x28d   : > { %v2768_v16 = vor.u32 %v2767_v57, %v2766_v52 }
 0x28e   : > { %v4598_v13 = vadd.s32 4294967169, %v2279_v58  ;;  %8686 = vst [vmem:[#allocation9_spill] sm:$0xff] %v6238_v28  ;;  %v8495_v58 = vand.u32 2147483647, %v6150_v33  ;;  %vm2465_vm9 = vcmp.lt.s32.totalorder %v6233_v60, 4 }
 0x28f   : > { %v1804_v1 = vpop.f32.mrf.mxu3  ;;  %v2781_v56 = vsel %vm2775_vm11, %v2768_v16, 920167782 }
 0x290   : > { %v6176_v9 = vadd.f32 %v1804_v1, %v1732_v31  ;;  %v6202_v31 = vsel %vm1845_vm6, %v6187_v27, 920167782  ;;  %v2285_v4 = vadd.s32 1, %v4598_v13  ;;  %v6242_v1 = vand.u32 31, %v1977_v37 }
 0x291   : > { %8682 = vst [vmem:[#allocation19_spill] sm:$0xff] %v6202_v31  ;;  %v2758_v13 = vshrl.u32 %v8624_v63, %v6214_v0  ;;  %v2747_v23 = vand.u32 8388607, %v8495_v58 }
 0x292   : > { %v2588_v22 = vand.u32 2139095040, %v6176_v9  ;;  %vm2286_vm7 = vcmp.gt.s32.totalorder %v2285_v4, 0  ;;  %8687 = vst [vmem:[#allocation10_spill] sm:$0xff] %v6242_v1 }
 0x293   : > { %v2287_v47 = vsel %vm2286_vm7, %v2285_v4, 0  ;;  %v2763_v4 = vshll.u32 %v8625_v42, %v2754_v11  ;;  %v2748_v57 = vor.u32 8388608, %v2747_v23 }
 0x294   : > { %v2589_v26 = vshrl.u32 %v2588_v22, 23  ;;  %v2757_v22 = vshll.u32 %v8623_v50, %v2754_v11  ;;  %v6269_v11 = vsub.s32 32, %v6242_v1 }
 0x296   : > { %v4604_v62 = vadd.s32 4294967169, %v2589_v26  ;;  %v2761_v26 = vshrl.u32 %v8625_v42, %v6214_v0  ;;  %v2759_v19 = vor.u32 %v2758_v13, %v2757_v22  ;;  %8689 = vst [vmem:[#allocation20_spill] sm:$0xff] %v6269_v11 }
 0x297   : > { %v1807_v18 = vpop.f32.mrf.mxu3 }
 0x298   : > { %v6221_v49 = vadd.f32 %v1807_v18, %v6138_v54  ;;  %v2770_v54 = vshrl.u32 %v8631_v45, %v6214_v0  ;;  %v2595_v46 = vadd.s32 1, %v4604_v62  ;;  %v2764_v18 = vshrl.u32 %v8626_v32, %v6214_v0 }
 0x299   : > { %v6260_v62 = vand.u32 31, %v2287_v47  ;;  %v2762_v37 = vor.u32 %v2761_v26, %v2760_v12 }
 0x29a   : > { %v2898_v30 = vand.u32 2139095040, %v6221_v49  ;;  %v2771_v24 = vor.u32 %v2770_v54, %v2769_v36  ;;  %vm2596_vm12 = vcmp.gt.s32.totalorder %v2595_v46, 0  ;;  %v2765_v55 = vor.u32 %v2764_v18, %v2763_v4 }
 0x29b   : > { %8688 = vst [vmem:[#allocation12_spill] sm:$0xff] %v6260_v62  ;;  %v2597_v41 = vsel %vm2596_vm12, %v2595_v46, 0  ;;  %v6276_v54 = vsel %vm2465_vm9, %v6244_v25, 920167782  ;;  %v2780_v52 = vsel %vm2772_vm1, %v2759_v19, %v2762_v37  ;;  %v6301_v13 = vshll.u32 %v8626_v32, %v6260_v62 }
 0x29c   : > { %v2899_v34 = vshrl.u32 %v2898_v30, 23  ;;  %v2785_v40 = vsel %vm2775_vm11, %v2771_v24, 1326507024  ;;  %v6280_v30 = vsel %vm2465_vm9, %v2461_v44, 1326507024  ;;  %v2782_v46 = vsel %vm2774_vm2, %v2765_v55, %v2781_v56 }
 0x29d   : > { %v2786_v24 = vsel %vm2774_vm2, %v2768_v16, %v2785_v40  ;;  %v6294_v44 = vsub.s32 32, %v6260_v62  ;;  %v6296_v22 = vand.u32 31, %v2597_v41  ;;  %8691 = vst [vmem:[#allocation25_spill] sm:$0xff] %v6301_v13  ;;  %v2783_v23 = vsel %vm2773_vm3, %v2780_v52, %v2782_v46 }
 0x29e   : > { %v4610_v10 = vadd.s32 4294967169, %v2899_v34  ;;  %v2784_v34 = vsel %vm2772_vm1, %v2762_v37, %v2765_v55  ;;  %v6307_v16 = vshll.u32 %v2748_v57, 8  ;;  %v2777_v18 = vsel %vm2775_vm11, %v2765_v55, 2102212464 }
 0x29f   : > { %v2787_v12 = vsel %vm2773_vm3, %v2784_v34, %v2786_v24  ;;  %v2814_v52 = vshrl.u32 %v2783_v23, 16  ;;  %v6319_v46 = vshrl.u32 %v2597_v41, 5  ;;  %v6322_v57 = vsub.s32 32, %v6296_v22 }
 0x2a0   : > { %v2905_v39 = vadd.s32 1, %v4610_v10  ;;  %v6291_v10 = vshrl.u32 %v2287_v47, 5  ;;  %v6311_v47 = vshll.u32 %v8654_v2, %v6260_v62  ;;  %v2792_v4 = vshrl.u32 %v2787_v12, 16 }
 0x2a1   : > { %v2789_v56 = vand.u32 65535, %v6307_v16  ;;  %v2790_v40 = vshrl.u32 %v6307_v16, 16  ;;  %v2756_v34 = vshrl.u32 %v8623_v50, %v6214_v0  ;;  %v2813_v24 = vand.u32 65535, %v2783_v23 }
 0x2a2   : > { %vm2906_vm10 = vcmp.gt.s32.totalorder %v2905_v39, 0  ;;  %8690 = vst [vmem:[#allocation6_spill] sm:$0xff] %v6291_v10  ;;  %v6332_v55 = vshll.u32 %v8654_v2, %v6296_v22  ;;  %v2778_v31 = vsel %vm2774_vm2, %v2762_v37, %v2777_v18  ;;  %v8516_v18 = vand.u32 2147483647, %v6221_v49 }
 0x2a3   : > { %v2907_v36 = vsel %vm2906_vm10, %v2905_v39, 0  ;;  %8692 = vst [vmem:[#allocation26_spill] sm:$0xff] %v6311_v47  ;;  %v2791_v39 = vand.u32 65535, %v2787_v12  ;;  %v6328_v12 = vshll.u32 %v8626_v32, %v6296_v22  ;;  %v2794_v58 = vmul.u32 %v2792_v4, %v2789_v56 }
 0x2a4   : > { %v6313_v26 = vand.u32 31, %v2907_v36  ;;  %v6334_v28 = vshrl.u32 %v2907_v36, 5  ;;  %v2776_v41 = vsel %vm2772_vm1, %v2756_v34, %v2759_v19  ;;  %v2816_v0 = vmul.u32 %v2814_v52, %v2789_v56 }
 0x2a5   : > { %v2795_v14 = vmul.u32 %v2791_v39, %v2790_v40  ;;  %v2793_v48 = vmul.u32 %v2791_v39, %v2789_v56  ;;  %v2797_v53 = vshll.u32 %v2794_v58, 16  ;;  %v2796_v38 = vmul.u32 %v2792_v4, %v2790_v40 }
 0x2a6   : > { %v6341_v23 = vsub.s32 32, %v6313_v26  ;;  %v2921_v27 = vshll.u32 %v8626_v32, %v6313_v26  ;;  %v2815_v51 = vmul.u32 %v2813_v24, %v2789_v56  ;;  %v2817_v3 = vmul.u32 %v2813_v24, %v2790_v40 }
 0x2a7   : > { %v2819_v36 = vshll.u32 %v2816_v0, 16  ;;  %v2799_v1 = vshll.u32 %v2795_v14, 16  ;;  %vm2801_vm4 = vc.u32 %v2793_v48, %v2797_v53  ;;  %v2803_v11 = vadd.s32 %v2797_v53, %v2793_v48 }
 0x2a8   : > { %v2818_v19 = vmul.u32 %v2814_v52, %v2790_v40  ;;  %v2802_v34 = vsel %vm2801_vm4, 1, %v8622_v35  ;;  %v2821_v37 = vshll.u32 %v2817_v3, 16  ;;  %v2922_v4 = vshrl.u32 %v8654_v2, %v6341_v23 }
 0x2a9   : > { %vm2823_vm14 = vc.u32 %v2815_v51, %v2819_v36  ;;  %v2804_v62 = vadd.s32 %v2802_v34, %v2796_v38  ;;  %vm2805_vm5 = vc.u32 %v2803_v11, %v2799_v1  ;;  %v2825_v39 = vadd.s32 %v2819_v36, %v2815_v51 }
 0x2aa   : > { %v2824_v17 = vsel %vm2823_vm14, 1, %v8622_v35  ;;  %v2924_v56 = vshll.u32 %v8654_v2, %v6313_v26  ;;  %v2806_v53 = vsel %vm2805_vm5, 1, %v8622_v35  ;;  %v2925_v40 = vshrl.u32 %v8631_v45, %v6341_v23 }
 0x2ab   : > { %v2826_v48 = vadd.s32 %v2824_v17, %v2818_v19  ;;  %v2798_v52 = vshrl.u32 %v2794_v58, 16  ;;  %v2808_v24 = vadd.s32 %v2806_v53, %v2804_v62  ;;  %vm2827_vm13 = vc.u32 %v2825_v39, %v2821_v37 }
 0x2ac   : > { %v2779_v38 = vsel %vm2773_vm3, %v2776_v41, %v2778_v31  ;;  %v2828_v51 = vsel %vm2827_vm13, 1, %v8622_v35  ;;  %v2902_v1 = vand.u32 8388607, %v8516_v18  ;;  %v8517_v11 = vand.u32 2147483647, %v6143_v5 }
 0x2ad   : > { %v2800_v36 = vshrl.u32 %v2795_v14, 16  ;;  %v2809_v34 = vadd.s32 %v2808_v24, %v2798_v52  ;;  %v2820_v61 = vshrl.u32 %v2816_v0, 16  ;;  %v2830_v17 = vadd.s32 %v2828_v51, %v2826_v48 }
 0x2ae   : > { %v6363_v19 = vshrl.u32 %v8654_v2, %v6322_v57  ;;  %v6367_v58 = vshrl.u32 %v8631_v45, %v6322_v57  ;;  %v2923_v31 = vor.u32 %v2922_v4, %v2921_v27  ;;  %vm2930_vm7 = vcmp.lt.s32.totalorder %v6334_v28, 4 }
 0x2af   : > { %v2926_v8 = vor.u32 %v2925_v40, %v2924_v56  ;;  %v2810_v62 = vadd.s32 %v2809_v34, %v2800_v36  ;;  %v2822_v41 = vshrl.u32 %v2817_v3, 16  ;;  %v2831_v53 = vadd.s32 %v2830_v17, %v2820_v61 }
 0x2b0   : > { %v2829_v18 = vadd.s32 %v2825_v39, %v2821_v37  ;;  %v2833_v14 = vmul.u32 %v6307_v16, %v2779_v38  ;;  %v2903_v0 = vor.u32 8388608, %v2902_v1  ;;  %v6373_v48 = vand.u32 8388607, %v8517_v11 }
 0x2b1   : > { %v2832_v52 = vadd.s32 %v2831_v53, %v2822_v41  ;;  %v2912_v24 = vshll.u32 %v8623_v50, %v6313_v26  ;;  %v2915_v27 = vshll.u32 %v8624_v63, %v6313_v26  ;;  %v2918_v4 = vshll.u32 %v8625_v42, %v6313_v26 }
 0x2b2   : > { %vm2835_vm12 = vc.u32 %v2810_v62, %v2829_v18  ;;  %v2913_v3 = vshrl.u32 %v8624_v63, %v6341_v23  ;;  %v2916_v61 = vshrl.u32 %v8625_v42, %v6341_v23  ;;  %v2919_v16 = vshrl.u32 %v8626_v32, %v6341_v23 }
 0x2b3   : > { %v2936_v37 = vsel %vm2930_vm7, %v2923_v31, 920167782  ;;  %v2940_v39 = vsel %vm2930_vm7, %v2926_v8, 1326507024  ;;  %v2836_v56 = vadd.s32 1, %v2832_v52  ;;  %v2447_v26 = vshll.u32 %v8623_v50, %v6182_v7 }
 0x2b4   : > { %v2914_v40 = vor.u32 %v2913_v3, %v2912_v24  ;;  %v2917_v38 = vor.u32 %v2916_v61, %v2915_v27  ;;  %v2920_v51 = vor.u32 %v2919_v16, %v2918_v4  ;;  %v6393_v1 = vshll.u32 %v2903_v0, 8 }
 0x2b5   : > { %v2837_v36 = vsel %vm2835_vm12, %v2836_v56, %v2832_v52  ;;  %vm2927_vm11 = vcmp.lt.s32.totalorder %v6334_v28, 1  ;;  %v2448_v34 = vshrl.u32 %v8624_v63, %v6196_v43  ;;  %v2450_v17 = vshll.u32 %v8624_v63, %v6182_v7 }
 0x2b6   : > { %v2838_v41 = vadd.s32 %v2837_v36, %v2833_v14  ;;  %vm2929_vm10 = vcmp.lt.s32.totalorder %v6334_v28, 3  ;;  %v2935_v8 = vsel %vm2927_vm11, %v2914_v40, %v2917_v38  ;;  %vm2928_vm1 = vcmp.lt.s32.totalorder %v6334_v28, 2 }
 0x2b7   : > { %v2937_v0 = vsel %vm2929_vm10, %v2920_v51, %v2936_v37  ;;  %v2939_v52 = vsel %vm2927_vm11, %v2917_v38, %v2920_v51  ;;  %v2941_v24 = vsel %vm2929_vm10, %v2923_v31, %v2940_v39  ;;  %v2944_v3 = vand.u32 65535, %v6393_v1 }
 0x2b8   : > { %v2839_v27 = vadd.s32 536870912, %v2838_v41  ;;  %v2938_v14 = vsel %vm2928_vm1, %v2935_v8, %v2937_v0  ;;  %v2942_v4 = vsel %vm2928_vm1, %v2939_v52, %v2941_v24  ;;  %v2945_v61 = vshrl.u32 %v6393_v1, 16 }
 0x2b9   : > { %v2946_v16 = vand.u32 65535, %v2942_v4  ;;  %v2947_v56 = vshrl.u32 %v2942_v4, 16  ;;  %v2969_v37 = vshrl.u32 %v2938_v14, 16  ;;  %v6417_v36 = vadd.s32 %v2829_v18, %v2810_v62 }
 0x2ba   : > { %v6419_v11 = vshrl.u32 %v2839_v27, 30  ;;  %v2911_v31 = vshrl.u32 %v8623_v50, %v6341_v23  ;;  %v2968_v39 = vand.u32 65535, %v2938_v14  ;;  %v2932_v8 = vsel %vm2930_vm7, %v2920_v51, 2102212464 }
 0x2bb   : > { %v2949_v0 = vmul.u32 %v2947_v56, %v2944_v3  ;;  %v2950_v52 = vmul.u32 %v2946_v16, %v2945_v61  ;;  %v6425_v24 = vor.u32 %v2448_v34, %v2447_v26  ;;  %v2971_v6 = vmul.u32 %v2969_v37, %v2944_v3 }
 0x2bc   : > { %v2841_v53 = vshll.u32 %v6419_v11, 30  ;;  %v2451_v18 = vshrl.u32 %v8625_v42, %v6196_v43  ;;  %v2453_v62 = vshll.u32 %v8625_v42, %v6182_v7  ;;  %v2931_v23 = vsel %vm2927_vm11, %v2911_v31, %v2914_v40 }
 0x2bd   : > { %v2948_v27 = vmul.u32 %v2946_v16, %v2944_v3  ;;  %v2952_v14 = vshll.u32 %v2949_v0, 16  ;;  %v2454_v51 = vshrl.u32 %v8626_v32, %v6196_v43  ;;  %v2933_v26 = vsel %vm2929_vm10, %v2917_v38, %v2932_v8 }
 0x2be   : > { %v6436_v4 = vsub.s32 %v2838_v41, %v2841_v53  ;;  %v2951_v34 = vmul.u32 %v2947_v56, %v2945_v61  ;;  %v2972_v20 = vmul.u32 %v2968_v39, %v2945_v61  ;;  %v2954_v29 = vshll.u32 %v2950_v52, 16 }
 0x2bf   : > { %vm2956_vm2 = vc.u32 %v2948_v27, %v2952_v14  ;;  %v2958_v47 = vadd.s32 %v2952_v14, %v2948_v27  ;;  %v2974_v13 = vshll.u32 %v2971_v6, 16  ;;  %v2970_v16 = vmul.u32 %v2968_v39, %v2944_v3 }
 0x2c0   : > { %vm2843_vm3 = vcmp.lt.s32.totalorder %v6436_v4, 0  ;;  %v2844_v7 = vsub.s32 0, %v6436_v4  ;;  %v2957_v40 = vsel %vm2956_vm2, 1, %v8622_v35  ;;  %vm2742_vm4 = vcmp.lt.s32.totalorder %v6150_v33, 0 }
 0x2c1   : > { %v2959_v41 = vadd.s32 %v2957_v40, %v2951_v34  ;;  %vm2960_vm14 = vc.u32 %v2958_v47, %v2954_v29  ;;  %v2973_v53 = vmul.u32 %v2969_v37, %v2945_v61  ;;  %v2976_v31 = vshll.u32 %v2972_v20, 16 }
 0x2c2   : > { %v2845_v38 = vsel %vm2843_vm3, %v2844_v7, %v6436_v4  ;;  %v2961_v56 = vsel %vm2960_vm14, 1, %v8622_v35  ;;  %vm2978_vm5 = vc.u32 %v2970_v16, %v2974_v13  ;;  %v2980_v8 = vadd.s32 %v2974_v13, %v2970_v16 }
 0x2c3   : > { %v2846_v27 = vclz %v2845_v38  ;;  %v2953_v14 = vshrl.u32 %v2949_v0, 16  ;;  %v2963_v10 = vadd.s32 %v2961_v56, %v2959_v41  ;;  %v2979_v21 = vsel %vm2978_vm5, 1, %v8622_v35 }
 0x2c4   : > { %v2981_v59 = vadd.s32 %v2979_v21, %v2973_v53  ;;  %vm2982_vm13 = vc.u32 %v2980_v8, %v2976_v31  ;;  %v6447_v3 = vor.u32 %v2451_v18, %v2450_v17  ;;  %v2455_v39 = vor.u32 %v2454_v51, %v2453_v62 }
 0x2c5   : > { %v4608_v34 = vadd.s32 4294967294, %v2846_v27  ;;  %v2955_v29 = vshrl.u32 %v2950_v52, 16  ;;  %v2964_v47 = vadd.s32 %v2963_v10, %v2953_v14  ;;  %v2983_v61 = vsel %vm2982_vm13, 1, %v8622_v35 }
 0x2c6   : > { %v2864_v37 = vsub.s32 4, %v6419_v11  ;;  %v2934_v13 = vsel %vm2928_vm1, %v2931_v23, %v2933_v26  ;;  %v2975_v7 = vshrl.u32 %v2971_v6, 16  ;;  %v2985_v0 = vadd.s32 %v2983_v61, %v2981_v59 }
 0x2c7   : > { %v8693_v40 = vand.u32 2147483647, %v6150_v33  ;;  %vm4609_vm12 = vcmp.lt.s32.totalorder %v4608_v34, 0  ;;  %v6459_v17 = vadd.s32 %v2964_v47, %v2955_v29  ;;  %v2977_v52 = vshrl.u32 %v2972_v20, 16 }
 0x2c8   : > { %vm2462_vm11 = vcmp.lt.s32.totalorder %v6233_v60, 1  ;;  %v2849_v10 = vsel %vm4609_vm12, 0, %v4608_v34  ;;  %v6462_v18 = vadd.s32 %v2980_v8, %v2976_v31  ;;  %v2986_v62 = vadd.s32 %v2985_v0, %v2975_v7 }
 0x2c9   : > { %vm6455_vm7 = vcmp.le.f32.partialorder %v8693_v40, 0.7853982  ;;  %vm2464_vm10 = vcmp.lt.s32.totalorder %v6233_v60, 3  ;;  %v2850_v6 = vsub.s32 32, %v2849_v10  ;;  %v2854_v59 = vsub.s32 4294967266, %v2849_v10 }
 0x2ca   : > { %v2470_v28 = vsel %vm2462_vm11, %v6425_v24, %v6447_v3  ;;  %v2472_v23 = vsel %vm2464_vm10, %v2455_v39, %v6276_v54  ;;  %v2865_v20 = vsel %vm2742_vm4, %v2864_v37, %v6419_v11  ;;  %v2987_v51 = vadd.s32 %v2986_v62, %v2977_v52 }
 0x2cb   : > { %v2988_v26 = vmul.u32 %v6393_v1, %v2934_v13  ;;  %vm2463_vm1 = vcmp.lt.s32.totalorder %v6233_v60, 2  ;;  %v2851_v16 = vshll.u32 %v6436_v4, %v2849_v10  ;;  %v2852_v41 = vshrl.u32 %v6417_v36, %v2850_v6 }
 0x2cc   : > { %v2855_v53 = vadd.s32 127, %v2854_v59  ;;  %vm2990_vm2 = vc.u32 %v6459_v17, %v6462_v18  ;;  %v2991_v31 = vadd.s32 1, %v2987_v51  ;;  %v6483_v54 = vsel %vm2463_vm1, %v2470_v28, %v2472_v23 }
 0x2cd   : > { %v2474_v11 = vsel %vm2462_vm11, %v6447_v3, %v2455_v39  ;;  %v2476_v1 = vsel %vm2464_vm10, %v6244_v25, %v6280_v30  ;;  %v2853_v4 = vor.u32 %v2852_v41, %v2851_v16  ;;  %v8696_v56 = vor.u32 8388608, %v6373_v48 }
 0x2ce   : > { %v2856_v36 = vshll.u32 %v2855_v53, 23  ;;  %v2477_v38 = vsel %vm2463_vm1, %v2474_v11, %v2476_v1  ;;  %v6500_v27 = vor.u32 %v6363_v19, %v6328_v12  ;;  %v2992_v14 = vsel %vm2990_vm2, %v2991_v31, %v2987_v51 }
 0x2cf   : > { %v6496_v8 = vshll.u32 %v8696_v56, 8  ;;  %v2481_v34 = vand.u32 65535, %v2477_v38  ;;  %v2482_v29 = vshrl.u32 %v2477_v38, 16  ;;  %v2993_v61 = vadd.s32 %v2992_v14, %v2988_v26 }
 0x2d0   : > { %v2857_v47 = vor.u32 4788187, %v2856_v36  ;;  %v2446_v25 = vshrl.u32 %v8623_v50, %v6196_v43  ;;  %v2867_v37 = vsel %vm6455_vm7, 0, %v2865_v20  ;;  %v2467_v48 = vsel %vm2465_vm9, %v2455_v39, 2102212464 }
 0x2d1   : > { %v2479_v30 = vand.u32 65535, %v6496_v8  ;;  %v2480_v13 = vshrl.u32 %v6496_v8, 16  ;;  %v2504_v12 = vshrl.u32 %v6483_v54, 16  ;;  %v2860_v7 = vcvt.s32.f32 %v2853_v4 }
 0x2d2   : > { %v2858_v19 = vand.u32 2147483647, %v2857_v47  ;;  %v2994_v0 = vadd.s32 536870912, %v2993_v61  ;;  %v2616_v52 = vor.u32 %v6367_v58, %v6332_v55  ;;  %v2503_v10 = vand.u32 65535, %v6483_v54 }
 0x2d3   : > { %v2484_v40 = vmul.u32 %v2482_v29, %v2479_v30  ;;  %v6513_v43 = vmul.u32 %v2481_v34, %v2480_v13  ;;  %v6516_v62 = vmul.u32 %v2504_v12, %v2479_v30  ;;  %v2483_v39 = vmul.u32 %v2481_v34, %v2479_v30 }
 0x2d4   : > { %v2861_v6 = vmul.f32 %v2860_v7, %v2858_v19  ;;  %v2995_v59 = vshrl.u32 %v2994_v0, 30  ;;  %v2884_v23 = vadd.s32 3, %v2867_v37  ;;  %vm2897_vm9 = vcmp.lt.s32.totalorder %v6221_v49, 0 }
 0x2d5   : > { %v2487_v28 = vshll.u32 %v2484_v40, 16  ;;  %v2466_v20 = vsel %vm2462_vm11, %v2446_v25, %v6425_v24  ;;  %v2468_v51 = vsel %vm2464_vm10, %v6447_v3, %v2467_v48  ;;  %v2486_v26 = vmul.u32 %v2482_v29, %v2480_v13 }
 0x2d6   : > { %v2862_v16 = vxor.u32 2147483648, %v2861_v6  ;;  %v2996_v41 = vshll.u32 %v2995_v59, 30  ;;  %v2489_v53 = vshll.u32 %v6513_v43, 16  ;;  %v2507_v11 = vmul.u32 %v2503_v10, %v2480_v13 }
 0x2d7   : > { %vm2491_vm3 = vc.u32 %v2483_v39, %v2487_v28  ;;  %v2493_v54 = vadd.s32 %v2487_v28, %v2483_v39  ;;  %v2509_v1 = vshll.u32 %v6516_v62, 16  ;;  %v8697_v24 = vand.u32 2147483647, %v6221_v49 }
 0x2d8   : > { %v2492_v31 = vsel %vm2491_vm3, 1, %v8622_v35  ;;  %v2863_v4 = vsel %vm2742_vm4, %v2862_v16, %v2861_v6  ;;  %v6536_v3 = vsub.s32 %v2993_v61, %v2996_v41  ;;  %v6540_v38 = vsel %vm2463_vm1, %v2466_v20, %v2468_v51 }
 0x2d9   : > { %vm6532_vm14 = vcmp.le.f32.partialorder %v8697_v24, 0.7853982  ;;  %v2505_v56 = vmul.u32 %v2503_v10, %v2479_v30  ;;  %v6545_v14 = vsel %vm6455_vm7, %v6150_v33, %v2863_v4  ;;  %v2488_v34 = vshrl.u32 %v2484_v40, 16 }
 0x2da   : > { %v2494_v29 = vadd.s32 %v2492_v31, %v2486_v26  ;;  %vm2495_vm4 = vc.u32 %v2493_v54, %v2489_v53  ;;  %v2868_v47 = vmul.f32 %v6545_v14, %v6545_v14  ;;  %vm2998_vm5 = vcmp.lt.s32.totalorder %v6536_v3, 0 }
 0x2db   : > { %v2999_v61 = vsub.s32 0, %v6536_v3  ;;  %v3019_v25 = vsub.s32 4, %v2995_v59  ;;  %v2496_v60 = vsel %vm2495_vm4, 1, %v8622_v35  ;;  %v2511_v37 = vshll.u32 %v2507_v11, 16 }
 0x2dc   : > { %vm2513_vm13 = vc.u32 %v2505_v56, %v2509_v1  ;;  %v2515_v30 = vadd.s32 %v2509_v1, %v2505_v56  ;;  %v2869_v48 = vmul.f32 -0.001358992, %v2868_v47  ;;  %v2876_v21 = vmul.f32 -0.00019511016, %v2868_v47 }
 0x2dd   : > { %v3000_v19 = vsel %vm2998_vm5, %v2999_v61, %v6536_v3  ;;  %v2508_v7 = vmul.u32 %v2504_v12, %v2480_v13  ;;  %v2498_v40 = vadd.s32 %v2496_v60, %v2494_v29  ;;  %v2514_v10 = vsel %vm2513_vm13, 1, %v8622_v35 }
 0x2de   : > { %v3001_v0 = vclz %v3000_v19  ;;  %vm2517_vm7 = vc.u32 %v2515_v30, %v2511_v37  ;;  %v2870_v6 = vadd.f32 0.041655596, %v2869_v48  ;;  %v2877_v39 = vadd.f32 0.008332121, %v2876_v21 }
 0x2df   : > { %v6554_v28 = vand.u32 3, %v2884_v23  ;;  %v3020_v20 = vsel %vm2897_vm9, %v3019_v25, %v2995_v59  ;;  %v2989_v51 = vadd.s32 %v6462_v18, %v6459_v17  ;;  %v2499_v16 = vadd.s32 %v2498_v40, %v2488_v34 }
 0x2e0   : > { %v4611_v26 = vadd.s32 4294967294, %v3001_v0  ;;  %v2516_v41 = vadd.s32 %v2514_v10, %v2508_v7  ;;  %v2871_v53 = vmul.f32 %v2870_v6, %v2868_v47  ;;  %v2878_v13 = vmul.f32 %v2877_v39, %v2868_v47 }
 0x2e1   : > { %v2490_v12 = vshrl.u32 %v6513_v43, 16  ;;  %v2518_v31 = vsel %vm2517_vm7, 1, %v8622_v35  ;;  %v3022_v23 = vsel %vm6532_vm14, 0, %v3020_v20  ;;  %v2510_v54 = vshrl.u32 %v6516_v62, 16 }
 0x2e2   : > { %vm4612_vm12 = vcmp.lt.s32.totalorder %v4611_v26, 0  ;;  %v2520_v1 = vadd.s32 %v2518_v31, %v2516_v41  ;;  %v2872_v59 = vadd.f32 -0.4999988, %v2871_v53  ;;  %v2879_v4 = vadd.f32 -0.16666654, %v2878_v13 }
 0x2e3   : > { %v3004_v24 = vsel %vm4612_vm12, 0, %v4611_v26  ;;  %v6565_v17 = vadd.s32 %v2499_v16, %v2490_v12  ;;  %v2512_v34 = vshrl.u32 %v2507_v11, 16  ;;  %vm2886_vm11 = vcmp.lt.s32.totalorder %v6554_v28, 2 }
 0x2e4   : > { %v3005_v18 = vsub.s32 32, %v3004_v24  ;;  %v3009_v56 = vsub.s32 4294967266, %v3004_v24  ;;  %v2521_v29 = vadd.s32 %v2520_v1, %v2510_v54  ;;  %v2873_v61 = vmul.f32 %v2872_v59, %v2868_v47 }
 0x2e5   : > { %v2880_v43 = vmul.f32 %v2879_v4, %v2868_v47  ;;  %v6568_v25 = vadd.s32 %v2515_v30, %v2511_v37  ;;  %v2585_v60 = vand.u32 2147483647, %v6176_v9  ;;  %vm2620_vm10 = vcmp.lt.s32.totalorder %v6319_v46, 4 }
 0x2e6   : > { %vm2883_vm1 = vweird.f32 %v6150_v33  ;;  %v3006_v62 = vshll.u32 %v6536_v3, %v3004_v24  ;;  %v3007_v48 = vshrl.u32 %v2989_v51, %v3005_v18  ;;  %v3010_v21 = vadd.s32 127, %v3009_v56 }
 0x2e7   : > { %v2522_v19 = vadd.s32 %v2521_v29, %v2512_v34  ;;  %v2874_v7 = vadd.f32 1.0, %v2873_v61  ;;  %v2881_v11 = vadd.f32 1.0, %v2880_v43  ;;  %vm2887_vm2 = vcmp.eq.s32.totalorder %v6554_v28, 0 }
 0x2e8   : > { %vm2525_vm3 = vc.u32 %v6565_v17, %v6568_v25  ;;  %vm2890_vm4 = vcmp.eq.s32.totalorder %v6554_v28, 2  ;;  %v3008_v47 = vor.u32 %v3007_v48, %v3006_v62  ;;  %v3011_v37 = vshll.u32 %v3010_v21, 23 }
 0x2e9   : > { %v2526_v30 = vadd.s32 1, %v2522_v19  ;;  %v2882_v0 = vmul.f32 %v2881_v11, %v6545_v14  ;;  %v2891_v40 = vxor.u32 2147483648, %v2874_v7  ;;  %v3039_v10 = vadd.s32 3, %v3022_v23 }
 0x2ea   : > { %v2523_v3 = vmul.u32 %v6496_v8, %v6540_v38  ;;  %v3012_v6 = vor.u32 4788187, %v3011_v37  ;;  %v2592_v20 = vand.u32 8388607, %v2585_v60  ;;  %v2603_v51 = vshrl.u32 %v8624_v63, %v6322_v57 }
 0x2eb   : > { %v2527_v39 = vsel %vm2525_vm3, %v2526_v30, %v2522_v19  ;;  %v2888_v26 = vxor.u32 2147483648, %v2882_v0  ;;  %v3015_v16 = vcvt.s32.f32 %v3008_v47  ;;  %v2605_v53 = vshll.u32 %v8624_v63, %v6296_v22 }
 0x2ec   : > { %v2528_v41 = vadd.s32 %v2527_v39, %v2523_v3  ;;  %v3013_v14 = vand.u32 2147483647, %v3012_v6  ;;  %v2606_v13 = vshrl.u32 %v8625_v42, %v6322_v57  ;;  %v2608_v8 = vshll.u32 %v8625_v42, %v6296_v22 }
 0x2ed   : > { %v2609_v38 = vshrl.u32 %v8626_v32, %v6322_v57  ;;  %v2889_v12 = vsel %vm2887_vm2, %v2874_v7, %v2888_v26  ;;  %v2892_v31 = vsel %vm2890_vm4, %v2891_v40, %v2882_v0  ;;  %v2602_v54 = vshll.u32 %v8623_v50, %v6296_v22 }
 0x2ee   : > { %v2529_v23 = vadd.s32 536870912, %v2528_v41  ;;  %v2893_v1 = vsel %vm2886_vm11, %v2889_v12, %v2892_v31  ;;  %v3016_v59 = vmul.f32 %v3015_v16, %v3013_v14  ;;  %v2607_v4 = vor.u32 %v2606_v13, %v2605_v53 }
 0x2ef   : > { %v2610_v24 = vor.u32 %v2609_v38, %v2608_v8  ;;  %v2626_v18 = vsel %vm2620_vm10, %v6500_v27, 920167782  ;;  %v2630_v56 = vsel %vm2620_vm10, %v2616_v52, 1326507024  ;;  %v2894_v34 = vsel %vm2883_vm1, nan, %v2893_v1 }
 0x2f0   : > { %v2530_v22 = vshrl.u32 %v2529_v23, 30  ;;  %3102 = vmatpush.msrb.mxu0 %v2894_v34  ;;  %v3017_v28 = vxor.u32 2147483648, %v3016_v59  ;;  %vm2432_vm5 = vcmp.lt.s32.totalorder %v6143_v5, 0  ;;  %v2593_v29 = vor.u32 8388608, %v2592_v20 }
 0x2f1   : > { %v2604_v61 = vor.u32 %v2603_v51, %v2602_v54  ;;  %v6612_v43 = vand.u32 3, %v3039_v10  ;;  %vm2617_vm13 = vcmp.lt.s32.totalorder %v6319_v46, 1  ;;  %vm2619_vm7 = vcmp.lt.s32.totalorder %v6319_v46, 3 }
 0x2f2   : > { %v2531_v62 = vshll.u32 %v2530_v22, 30  ;;  %v3018_v55 = vsel %vm2897_vm9, %v3017_v28, %v3016_v59  ;;  %vm2618_vm12 = vcmp.lt.s32.totalorder %v6319_v46, 2  ;;  %v2629_v33 = vsel %vm2617_vm13, %v2607_v4, %v2610_v24 }
 0x2f3   : > { %v2631_v58 = vsel %vm2619_vm7, %v6500_v27, %v2630_v56  ;;  %v6627_v52 = vsel %vm6532_vm14, %v6221_v49, %v3018_v55  ;;  %v2622_v21 = vsel %vm2620_vm10, %v2610_v24, 2102212464  ;;  %v2625_v11 = vsel %vm2617_vm13, %v2604_v61, %v2607_v4 }
 0x2f4   : > { %v6629_v48 = vsub.s32 %v2528_v41, %v2531_v62  ;;  %v2632_v19 = vsel %vm2618_vm12, %v2629_v33, %v2631_v58  ;;  %v3023_v7 = vmul.f32 %v6627_v52, %v6627_v52  ;;  %v2627_v27 = vsel %vm2619_vm7, %v2610_v24, %v2626_v18 }
 0x2f5   : > { %v6641_v36 = vshll.u32 %v2593_v29, 8  ;;  %v2554_v37 = vsub.s32 4, %v2530_v22  ;;  %v2637_v30 = vshrl.u32 %v2632_v19, 16  ;;  %v2524_v10 = vadd.s32 %v6568_v25, %v6565_v17 }
 0x2f6   : > { %vm2533_vm9 = vcmp.lt.s32.totalorder %v6629_v48, 0  ;;  %v2534_v47 = vsub.s32 0, %v6629_v48  ;;  %v3024_v0 = vmul.f32 -0.001358992, %v3023_v7  ;;  %v3031_v40 = vmul.f32 -0.00019511016, %v3023_v7 }
 0x2f7   : > { %v2636_v3 = vand.u32 65535, %v2632_v19  ;;  %v2601_v39 = vshrl.u32 %v8623_v50, %v6322_v57  ;;  %v2628_v20 = vsel %vm2618_vm12, %v2625_v11, %v2627_v27  ;;  %v2634_v51 = vand.u32 65535, %v6641_v36 }
 0x2f8   : > { %v2535_v6 = vsel %vm2533_vm9, %v2534_v47, %v6629_v48  ;;  %v3025_v26 = vadd.f32 0.041655596, %v3024_v0  ;;  %v3032_v16 = vadd.f32 0.008332121, %v3031_v40  ;;  %v2635_v53 = vshrl.u32 %v6641_v36, 16 }
 0x2f9   : > { %v2536_v41 = vclz %v2535_v6  ;;  %v6656_v14 = vsel %vm2432_vm5, %v2554_v37, %v2530_v22  ;;  %v6660_v17 = vsel %vm2617_vm13, %v2601_v39, %v2604_v61  ;;  %v6664_v57 = vsel %vm2619_vm7, %v2607_v4, %v2622_v21 }
 0x2fa   : > { %v2639_v25 = vmul.u32 %v2637_v30, %v2634_v51  ;;  %v3026_v13 = vmul.f32 %v3025_v26, %v3023_v7  ;;  %v3033_v8 = vmul.f32 %v3032_v16, %v3023_v7  ;;  %v8700_v38 = vand.u32 2147483647, %v6143_v5 }
 0x2fb   : > { %v4602_v31 = vadd.s32 4294967294, %v2536_v41  ;;  %v2640_v23 = vmul.u32 %v2636_v3, %v2635_v53  ;;  %v2638_v54 = vmul.u32 %v2636_v3, %v2634_v51  ;;  %v2658_v59 = vand.u32 65535, %v2628_v20 }
 0x2fc   : > { %vm6668_vm14 = vcmp.le.f32.partialorder %v8700_v38, 0.7853982  ;;  %v2642_v1 = vshll.u32 %v2639_v25, 16  ;;  %v2659_v24 = vshrl.u32 %v2628_v20, 16  ;;  %v3027_v18 = vadd.f32 -0.4999988, %v3026_v13 }
 0x2fd   : > { %v3034_v56 = vadd.f32 -0.16666654, %v3033_v8  ;;  %vm4603_vm11 = vcmp.lt.s32.totalorder %v4602_v31, 0  ;;  %v2641_v4 = vmul.u32 %v2637_v30, %v2635_v53  ;;  %vm3042_vm10 = vcmp.eq.s32.totalorder %v6612_v43, 0 }
 0x2fe   : > { %vm3045_vm1 = vcmp.eq.s32.totalorder %v6612_v43, 2  ;;  %v2539_v34 = vsel %vm4603_vm11, 0, %v4602_v31  ;;  %v2644_v22 = vshll.u32 %v2640_v23, 16  ;;  %vm2646_vm2 = vc.u32 %v2638_v54, %v2642_v1 }
 0x2ff   : > { %v2648_v28 = vadd.s32 %v2642_v1, %v2638_v54  ;;  %v3028_v29 = vmul.f32 %v3027_v18, %v3023_v7  ;;  %v3035_v61 = vmul.f32 %v3034_v56, %v3023_v7  ;;  %vm3041_vm3 = vcmp.lt.s32.totalorder %v6612_v43, 2 }
 0x300   : > { %v2540_v62 = vsub.s32 32, %v2539_v34  ;;  %v2541_v55 = vshll.u32 %v6629_v48, %v2539_v34  ;;  %vm3038_vm4 = vweird.f32 %v6221_v49  ;;  %v2544_v33 = vsub.s32 4294967266, %v2539_v34 }
 0x301   : > { %v2647_v58 = vsel %vm2646_vm2, 1, %v8622_v35  ;;  %vm2650_vm13 = vc.u32 %v2648_v28, %v2644_v22  ;;  %v2661_v21 = vmul.u32 %v2659_v24, %v2634_v51  ;;  %v3029_v19 = vadd.f32 1.0, %v3028_v29 }
 0x302   : > { %v3036_v11 = vadd.f32 1.0, %v3035_v61  ;;  %v2542_v27 = vshrl.u32 %v2524_v10, %v2540_v62  ;;  %v2649_v47 = vadd.s32 %v2647_v58, %v2641_v4  ;;  %v2545_v37 = vadd.s32 127, %v2544_v33 }
 0x303   : > { %v2643_v30 = vshrl.u32 %v2639_v25, 16  ;;  %v2651_v7 = vsel %vm2650_vm13, 1, %v8622_v35  ;;  %v2662_v0 = vmul.u32 %v2658_v59, %v2635_v53  ;;  %v3046_v3 = vxor.u32 2147483648, %v3029_v19 }
 0x304   : > { %v3037_v40 = vmul.f32 %v3036_v11, %v6627_v52  ;;  %v2543_v48 = vor.u32 %v2542_v27, %v2541_v55  ;;  %v2653_v6 = vadd.s32 %v2651_v7, %v2649_v47  ;;  %v2546_v39 = vshll.u32 %v2545_v37, 23  ;;  %v8704_v11 = vld [vmem:[#allocation16_spill] sm:$0xff] }
 0x305   : > { %v2557_v20 = vsel %vm6668_vm14, 0, %v6656_v14  ;;  %v2660_v26 = vmul.u32 %v2658_v59, %v2634_v51  ;;  %v2664_v16 = vshll.u32 %v2661_v21, 16  ;;  %v2645_v10 = vshrl.u32 %v2640_v23, 16 }
 0x306   : > { %v3043_v41 = vxor.u32 2147483648, %v3037_v40  ;;  %v2654_v13 = vadd.s32 %v2653_v6, %v2643_v30  ;;  %v2663_v8 = vmul.u32 %v2659_v24, %v2635_v53  ;;  %v2547_v25 = vor.u32 4788187, %v2546_v39 }
 0x307   : > { %v2666_v38 = vshll.u32 %v2662_v0, 16  ;;  %vm2668_vm7 = vc.u32 %v2660_v26, %v2664_v16  ;;  %v2670_v31 = vadd.s32 %v2664_v16, %v2660_v26  ;;  %v3047_v54 = vsel %vm3045_vm1, %v3046_v3, %v3037_v40  ;;  %v8705_v3 = vld [vmem:[#allocation6_spill] sm:$0xff] }
 0x308   : > { %v3044_v52 = vsel %vm3042_vm10, %v3029_v19, %v3043_v41  ;;  %v2550_v1 = vcvt.s32.f32 %v2543_v48  ;;  %v2669_v18 = vsel %vm2668_vm7, 1, %v8622_v35  ;;  %v2548_v14 = vand.u32 2147483647, %v2547_v25  ;;  %v8707_v16 = vld [vmem:[#allocation26_spill] sm:$0xff] }
 0x309   : > { %v3048_v51 = vsel %vm3041_vm3, %v3044_v52, %v3047_v54  ;;  %v2671_v23 = vadd.s32 %v2669_v18, %v2663_v8  ;;  %vm2672_vm9 = vc.u32 %v2670_v31, %v2666_v38  ;;  %v2302_v53 = vshrl.u32 %v8654_v2, %v6294_v44 }
 0x30a   : > { %v3049_v59 = vsel %vm3038_vm4, nan, %v3048_v51  ;;  %v6694_v24 = vadd.s32 %v2654_v13, %v2645_v10  ;;  %v2673_v56 = vsel %vm2672_vm9, 1, %v8622_v35  ;;  %v2551_v4 = vmul.f32 %v2550_v1, %v2548_v14 }
 0x30b   : > { %3131 = vmatpush.msrb.mxu1 %v3049_v59  ;;  %v2665_v34 = vshrl.u32 %v2661_v21, 16  ;;  %v2675_v22 = vadd.s32 %v2673_v56, %v2671_v23  ;;  %v2120_v43 = vand.u32 2147483647, %v6140_v15  ;;  %v2305_v28 = vshrl.u32 %v8631_v45, %v6294_v44  ;;  %v8703_v21 = vld [vmem:[#allocation8_spill] sm:$0xff]  ;;  %v8709_v23 = vld [vmem:[#allocation17_spill] sm:$0xff]  ;;  %v8711_v56 = vld [vmem:[#allocation18_spill] sm:$0xff] }
 0x30c   : > { %v2574_v29 = vadd.s32 3, %v2557_v20  ;;  %v2624_v49 = vsel %vm2618_vm12, %v6660_v17, %v6664_v57  ;;  %v2674_v61 = vadd.s32 %v2670_v31, %v2666_v38  ;;  %v2552_v62 = vxor.u32 2147483648, %v2551_v4  ;;  %v8706_v20 = vld [vmem:[#allocation25_spill] sm:$0xff]  ;;  %v8708_v38 = vld [vmem:[#allocation15_spill] sm:$0xff] }
 0x30d   : > { %v2667_v55 = vshrl.u32 %v2662_v0, 16  ;;  %v2676_v33 = vadd.s32 %v2675_v22, %v2665_v34  ;;  %v2127_v58 = vand.u32 8388607, %v2120_v43  ;;  %v2138_v19 = vshrl.u32 %v8624_v63, %v8703_v21  ;;  %v8710_v59 = vld [vmem:[#allocation5_spill] sm:$0xff] }
 0x30e   : > { %vm2680_vm11 = vc.u32 %v6694_v24, %v2674_v61  ;;  %v2140_v27 = vshll.u32 %v8624_v63, %v8704_v11  ;;  %v2141_v47 = vshrl.u32 %v8625_v42, %v8703_v21  ;;  %v2553_v46 = vsel %vm2432_vm5, %v2552_v62, %v2551_v4 }
 0x30f   : > { %v2677_v17 = vadd.s32 %v2676_v33, %v2667_v55  ;;  %v2143_v57 = vshll.u32 %v8625_v42, %v8704_v11  ;;  %v2144_v37 = vshrl.u32 %v8626_v32, %v8703_v21  ;;  %v6722_v30 = vsel %vm6668_vm14, %v6143_v5, %v2553_v46 }
 0x310   : > { %v2128_v7 = vor.u32 8388608, %v2127_v58  ;;  %v2137_v0 = vshll.u32 %v8623_v50, %v8704_v11  ;;  %v6726_v40 = vor.u32 %v2141_v47, %v2140_v27  ;;  %vm2310_vm5 = vcmp.lt.s32.totalorder %v8705_v3, 4 }
 0x311   : > { %v2558_v48 = vmul.f32 %v6722_v30, %v6722_v30  ;;  %v2681_v6 = vadd.s32 1, %v2677_v17  ;;  %v2145_v39 = vor.u32 %v2144_v37, %v2143_v57  ;;  %v6732_v26 = vor.u32 %v2302_v53, %v8706_v20 }
 0x312   : > { %v2306_v12 = vor.u32 %v2305_v28, %v8707_v16  ;;  %v2678_v41 = vmul.u32 %v6641_v36, %v2624_v49  ;;  %v6736_v10 = vor.u32 %v2138_v19, %v2137_v0  ;;  %vm2152_vm12 = vcmp.lt.s32.totalorder %v8708_v38, 1 }
 0x313   : > { %v2559_v13 = vmul.f32 -0.001358992, %v2558_v48  ;;  %v2566_v8 = vmul.f32 -0.00019511016, %v2558_v48  ;;  %v2682_v25 = vsel %vm2680_vm11, %v2681_v6, %v2677_v17  ;;  %v6741_v31 = vand.u32 3, %v2574_v29 }
 0x314   : > { %v2683_v52 = vadd.s32 %v2682_v25, %v2678_v41  ;;  %v2164_v54 = vsel %vm2152_vm12, %v6726_v40, %v2145_v39  ;;  %v6746_v1 = vshll.u32 %v2128_v7, 8  ;;  %vm2153_vm14 = vcmp.lt.s32.totalorder %v8708_v38, 2 }
 0x315   : > { %v2560_v18 = vadd.f32 0.041655596, %v2559_v13  ;;  %v2567_v36 = vadd.f32 0.008332121, %v2566_v8  ;;  %vm2154_vm10 = vcmp.lt.s32.totalorder %v8708_v38, 3  ;;  %v2160_v14 = vsel %vm2152_vm12, %v6736_v10, %v6726_v40 }
 0x316   : > { %v2684_v51 = vadd.s32 536870912, %v2683_v52  ;;  %v2162_v53 = vsel %vm2154_vm10, %v2145_v39, %v8709_v23  ;;  %v2166_v4 = vsel %vm2154_vm10, %v8711_v56, %v8710_v59  ;;  %v6764_v34 = vsel %vm2310_vm5, %v6732_v26, 920167782 }
 0x317   : > { %v2561_v22 = vmul.f32 %v2560_v18, %v2558_v48  ;;  %v2568_v28 = vmul.f32 %v2567_v36, %v2558_v48  ;;  %v2167_v29 = vsel %vm2153_vm14, %v2164_v54, %v2166_v4  ;;  %v2169_v62 = vand.u32 65535, %v6746_v1 }
 0x318   : > { %v6768_v49 = vshrl.u32 %v2684_v51, 30  ;;  %v2171_v55 = vand.u32 65535, %v2167_v29  ;;  %v2172_v33 = vshrl.u32 %v2167_v29, 16  ;;  %v6773_v58 = vsel %vm2310_vm5, %v2306_v12, 1326507024 }
 0x319   : > { %v2562_v19 = vadd.f32 -0.4999988, %v2561_v22  ;;  %v2569_v11 = vadd.f32 -0.16666654, %v2568_v28  ;;  %v2163_v27 = vsel %vm2153_vm14, %v2160_v14, %v2162_v53  ;;  %vm2577_vm1 = vcmp.eq.s32.totalorder %v6741_v31, 0 }
 0x31a   : > { %vm2580_vm2 = vcmp.eq.s32.totalorder %v6741_v31, 2  ;;  %v2686_v47 = vshll.u32 %v6768_v49, 30  ;;  %v2170_v46 = vshrl.u32 %v6746_v1, 16  ;;  %v2174_v17 = vmul.u32 %v2172_v33, %v2169_v62 }
 0x31b   : > { %v2563_v57 = vmul.f32 %v2562_v19, %v2558_v48  ;;  %v2570_v37 = vmul.f32 %v2569_v11, %v2558_v48  ;;  %vm2576_vm3 = vcmp.lt.s32.totalorder %v6741_v31, 2  ;;  %v2679_v7 = vadd.s32 %v2674_v61, %v6694_v24 }
 0x31c   : > { %v2136_v0 = vshrl.u32 %v8623_v50, %v8703_v21  ;;  %vm2573_vm4 = vweird.f32 %v6143_v5  ;;  %v6786_v6 = vsub.s32 %v2683_v52, %v2686_v47  ;;  %v2175_v20 = vmul.u32 %v2171_v55, %v2170_v46 }
 0x31d   : > { %v2177_v16 = vshll.u32 %v2174_v17, 16  ;;  %v2194_v12 = vshrl.u32 %v2163_v27, 16  ;;  %v2564_v41 = vadd.f32 1.0, %v2563_v57  ;;  %v2571_v13 = vadd.f32 1.0, %v2570_v37 }
 0x31e   : > { %v2173_v8 = vmul.u32 %v2171_v55, %v2169_v62  ;;  %v2193_v25 = vand.u32 65535, %v2163_v27  ;;  %vm2688_vm13 = vcmp.lt.s32.totalorder %v6786_v6, 0  ;;  %v2689_v48 = vsub.s32 0, %v6786_v6 }
 0x31f   : > { %v2157_v24 = vsel %vm2155_vm15, %v2145_v39, 2102212464  ;;  %v2176_v61 = vmul.u32 %v2172_v33, %v2170_v46  ;;  %v2572_v21 = vmul.f32 %v2571_v13, %v6722_v30  ;;  %v2581_v54 = vxor.u32 2147483648, %v2564_v41 }
 0x320   : > { %vm2181_vm7 = vc.u32 %v2173_v8, %v2177_v16  ;;  %v2183_v52 = vadd.s32 %v2177_v16, %v2173_v8  ;;  %v2690_v18 = vsel %vm2688_vm13, %v2689_v48, %v6786_v6  ;;  %v2179_v36 = vshll.u32 %v2175_v20, 16 }
 0x321   : > { %v2182_v51 = vsel %vm2181_vm7, 1, %v8622_v35  ;;  %v2196_v14 = vmul.u32 %v2194_v12, %v2169_v62  ;;  %v2578_v23 = vxor.u32 2147483648, %v2572_v21  ;;  %v2691_v53 = vclz %v2690_v18 }
 0x322   : > { %v2184_v59 = vadd.s32 %v2182_v51, %v2176_v61  ;;  %v2197_v56 = vmul.u32 %v2193_v25, %v2170_v46  ;;  %v2156_v39 = vsel %vm2152_vm12, %v2136_v0, %v6736_v10  ;;  %v2158_v30 = vsel %vm2154_vm10, %v6726_v40, %v2157_v24 }
 0x323   : > { %vm2185_vm15 = vc.u32 %v2183_v52, %v2179_v36  ;;  %v2195_v4 = vmul.u32 %v2193_v25, %v2169_v62  ;;  %v2579_v22 = vsel %vm2577_vm1, %v2564_v41, %v2578_v23  ;;  %v2582_v28 = vsel %vm2580_vm2, %v2581_v54, %v2572_v21 }
 0x324   : > { %vm2587_vm9 = vcmp.lt.s32.totalorder %v6176_v9, 0  ;;  %v4605_v29 = vadd.s32 4294967294, %v2691_v53  ;;  %v2186_v55 = vsel %vm2185_vm15, 1, %v8622_v35  ;;  %v2583_v10 = vsel %vm2576_vm3, %v2579_v22, %v2582_v28 }
 0x325   : > { %v2178_v33 = vshrl.u32 %v2174_v17, 16  ;;  %v2188_v19 = vadd.s32 %v2186_v55, %v2184_v59  ;;  %v2199_v11 = vshll.u32 %v2196_v14, 16  ;;  %v2584_v40 = vsel %vm2573_vm4, nan, %v2583_v10 }
 0x326   : > { %vm4606_vm11 = vcmp.lt.s32.totalorder %v4605_v29, 0  ;;  %v2198_v62 = vmul.u32 %v2194_v12, %v2170_v46  ;;  %v2201_v27 = vshll.u32 %v2197_v56, 16  ;;  %3103 = vmatpush.msrb.mxu0 %v2584_v40  ;;  %v2180_v41 = vshrl.u32 %v2175_v20, 16 }
 0x327   : > { %v2694_v47 = vsel %vm4606_vm11, 0, %v4605_v29  ;;  %v2189_v57 = vadd.s32 %v2188_v19, %v2178_v33  ;;  %vm2203_vm12 = vc.u32 %v2195_v4, %v2199_v11  ;;  %v2205_v37 = vadd.s32 %v2199_v11, %v2195_v4 }
 0x328   : > { %v2695_v0 = vsub.s32 32, %v2694_v47  ;;  %v2699_v16 = vsub.s32 4294967266, %v2694_v47  ;;  %v2204_v31 = vsel %vm2203_vm12, 1, %v8622_v35  ;;  %v2696_v17 = vshll.u32 %v6786_v6, %v2694_v47 }
 0x329   : > { %v2709_v13 = vsub.s32 4, %v6768_v49  ;;  %v2206_v8 = vadd.s32 %v2204_v31, %v2198_v62  ;;  %vm2207_vm10 = vc.u32 %v2205_v37, %v2201_v27  ;;  %v6814_v46 = vadd.s32 %v2189_v57, %v2180_v41  ;;  %v8716_v62 = vld [vmem:[#allocation20_spill] sm:$0xff] }
 0x32a   : > { %v2697_v5 = vshrl.u32 %v2679_v7, %v2695_v0  ;;  %v2700_v25 = vadd.s32 127, %v2699_v16  ;;  %v2208_v12 = vsel %vm2207_vm10, 1, %v8622_v35  ;;  %vm6819_vm1 = vcmp.le.f32.partialorder %v2585_v60, 0.7853982  ;;  %v8714_v7 = vld [vmem:[#allocation22_spill] sm:$0xff] }
 0x32b   : > { %v2159_v20 = vsel %vm2153_vm14, %v2156_v39, %v2158_v30  ;;  %v2200_v6 = vshrl.u32 %v2196_v14, 16  ;;  %v2210_v24 = vadd.s32 %v2208_v12, %v2206_v8  ;;  %v6825_v54 = vadd.s32 %v2205_v37, %v2201_v27  ;;  %v8715_v14 = vld [vmem:[#allocation12_spill] sm:$0xff] }
 0x32c   : > { %v2698_v61 = vor.u32 %v2697_v5, %v2696_v17  ;;  %v2701_v21 = vshll.u32 %v2700_v25, 23  ;;  %v2275_v52 = vand.u32 2147483647, %v8714_v7  ;;  %v2710_v18 = vsel %vm2587_vm9, %v2709_v13, %v6768_v49 }
 0x32d   : > { %v2202_v36 = vshrl.u32 %v2197_v56, 16  ;;  %v2211_v60 = vadd.s32 %v2210_v24, %v2200_v6  ;;  %v2293_v51 = vshrl.u32 %v8624_v63, %v6294_v44  ;;  %vm2215_vm14 = vc.u32 %v6814_v46, %v6825_v54 }
 0x32e   : > { %v2702_v23 = vor.u32 4788187, %v2701_v21  ;;  %v2282_v38 = vand.u32 8388607, %v2275_v52  ;;  %v2292_v53 = vshll.u32 %v8623_v50, %v8715_v14  ;;  %v2705_v59 = vcvt.s32.f32 %v2698_v61 }
 0x32f   : > { %v2212_v39 = vadd.s32 %v2211_v60, %v2202_v36  ;;  %v2295_v49 = vshll.u32 %v8624_v63, %v8715_v14  ;;  %v2296_v56 = vshrl.u32 %v8625_v42, %v6294_v44  ;;  %v2298_v22 = vshll.u32 %v8625_v42, %v8715_v14 }
 0x330   : > { %v2703_v30 = vand.u32 2147483647, %v2702_v23  ;;  %v2283_v4 = vor.u32 8388608, %v2282_v38  ;;  %v2299_v28 = vshrl.u32 %v8626_v32, %v6294_v44  ;;  %v2712_v29 = vsel %vm6819_vm1, 0, %v2710_v18 }
 0x331   : > { %v2216_v55 = vadd.s32 1, %v2212_v39  ;;  %v6849_v10 = vor.u32 %v2293_v51, %v2292_v53  ;;  %v6851_v33 = vor.u32 %v2296_v56, %v2295_v49  ;;  %v2213_v11 = vmul.u32 %v6746_v1, %v2159_v20  ;;  %v8717_v20 = vld [vmem:[#allocation10_spill] sm:$0xff] }
 0x332   : > { %v2706_v19 = vmul.f32 %v2705_v59, %v2703_v30  ;;  %v2300_v40 = vor.u32 %v2299_v28, %v2298_v22  ;;  %vm2309_vm2 = vcmp.lt.s32.totalorder %v8705_v3, 3  ;;  %v1992_v27 = vshrl.u32 %v8654_v2, %v8716_v62 }
 0x333   : > { %v2217_v47 = vsel %vm2215_vm14, %v2216_v55, %v2212_v39  ;;  %v2321_v57 = vsel %vm2309_vm2, %v6732_v26, %v6773_v58  ;;  %v6864_v37 = vshll.u32 %v2283_v4, 8  ;;  %v2729_v16 = vadd.s32 3, %v2712_v29 }
 0x334   : > { %v2707_v0 = vxor.u32 2147483648, %v2706_v19  ;;  %v2218_v1 = vadd.s32 %v2217_v47, %v2213_v11  ;;  %vm2307_vm3 = vcmp.lt.s32.totalorder %v8705_v3, 1  ;;  %vm2308_vm4 = vcmp.lt.s32.totalorder %v8705_v3, 2 }
 0x335   : > { %v2315_v41 = vsel %vm2307_vm3, %v6849_v10, %v6851_v33  ;;  %v2317_v31 = vsel %vm2309_vm2, %v2300_v40, %v6764_v34  ;;  %v2319_v26 = vsel %vm2307_vm3, %v6851_v33, %v2300_v40  ;;  %v6883_v8 = vand.u32 65535, %v6864_v37 }
 0x336   : > { %v2708_v58 = vsel %vm2587_vm9, %v2707_v0, %v2706_v19  ;;  %v2219_v17 = vadd.s32 536870912, %v2218_v1  ;;  %v2322_v13 = vsel %vm2308_vm4, %v2319_v26, %v2321_v57  ;;  %v6891_v34 = vshrl.u32 %v6864_v37, 16 }
 0x337   : > { %v6888_v5 = vsel %vm6819_vm1, %v6176_v9, %v2708_v58  ;;  %v2326_v25 = vand.u32 65535, %v2322_v13  ;;  %v2327_v12 = vshrl.u32 %v2322_v13, 16  ;;  %v1991_v6 = vshll.u32 %v8626_v32, %v8717_v20 }
 0x338   : > { %v2713_v24 = vmul.f32 %v6888_v5, %v6888_v5  ;;  %v6897_v61 = vshrl.u32 %v2219_v17, 30  ;;  %v6901_v21 = vsel %vm2308_vm4, %v2315_v41, %v2317_v31  ;;  %v6905_v48 = vshll.u32 %v8654_v2, %v8717_v20 }
 0x339   : > { %v6909_v18 = vshrl.u32 %v8631_v45, %v8716_v62  ;;  %v2329_v36 = vmul.u32 %v2327_v12, %v6883_v8  ;;  %v6913_v60 = vmul.u32 %v2326_v25, %v6891_v34  ;;  %v6915_v51 = vor.u32 %v1992_v27, %v1991_v6 }
 0x33a   : > { %v2714_v23 = vmul.f32 -0.001358992, %v2713_v24  ;;  %v2721_v38 = vmul.f32 -0.00019511016, %v2713_v24  ;;  %v2221_v14 = vshll.u32 %v6897_v61, 30  ;;  %v6918_v53 = vand.u32 3, %v2729_v16 }
 0x33b   : > { %v2328_v59 = vmul.u32 %v2326_v25, %v6883_v8  ;;  %v2332_v39 = vshll.u32 %v2329_v36, 16  ;;  %v2349_v49 = vshrl.u32 %v6901_v21, 16  ;;  %v2312_v22 = vsel %vm2310_vm5, %v2300_v40, 2102212464 }
 0x33c   : > { %v2715_v56 = vadd.f32 0.041655596, %v2714_v23  ;;  %v2722_v30 = vadd.f32 0.008332121, %v2721_v38  ;;  %v6922_v4 = vsub.s32 %v2218_v1, %v2221_v14  ;;  %v2331_v28 = vmul.u32 %v2327_v12, %v6891_v34 }
 0x33d   : > { %v2334_v29 = vshll.u32 %v6913_v60, 16  ;;  %vm2336_vm13 = vc.u32 %v2328_v59, %v2332_v39  ;;  %v2338_v55 = vadd.s32 %v2332_v39, %v2328_v59  ;;  %v2348_v57 = vand.u32 65535, %v6901_v21 }
 0x33e   : > { %v2716_v19 = vmul.f32 %v2715_v56, %v2713_v24  ;;  %v2723_v11 = vmul.f32 %v2722_v30, %v2713_v24  ;;  %vm2223_vm7 = vcmp.lt.s32.totalorder %v6922_v4, 0  ;;  %v2224_v27 = vsub.s32 0, %v6922_v4 }
 0x33f   : > { %v2337_v47 = vsel %vm2336_vm13, 1, %v8622_v35  ;;  %vm2340_vm15 = vc.u32 %v2338_v55, %v2334_v29  ;;  %v6933_v0 = vmul.u32 %v2349_v49, %v6883_v8  ;;  %vm2732_vm5 = vcmp.eq.s32.totalorder %v6918_v53, 0 }
 0x340   : > { %v2717_v40 = vadd.f32 -0.4999988, %v2716_v19  ;;  %v2724_v16 = vadd.f32 -0.16666654, %v2723_v11  ;;  %v2225_v1 = vsel %vm2223_vm7, %v2224_v27, %v6922_v4  ;;  %v2339_v41 = vadd.s32 %v2337_v47, %v2331_v28 }
 0x341   : > { %vm2735_vm9 = vcmp.eq.s32.totalorder %v6918_v53, 2  ;;  %v2226_v31 = vclz %v2225_v1  ;;  %v2291_v26 = vshrl.u32 %v8623_v50, %v6294_v44  ;;  %v2341_v58 = vsel %vm2340_vm15, 1, %v8622_v35 }
 0x342   : > { %v2718_v17 = vmul.f32 %v2717_v40, %v2713_v24  ;;  %v2725_v13 = vmul.f32 %v2724_v16, %v2713_v24  ;;  %vm2731_vm11 = vcmp.lt.s32.totalorder %v6918_v53, 2  ;;  %v2214_v25 = vadd.s32 %v6825_v54, %v6814_v46 }
 0x343   : > { %v2343_v12 = vadd.s32 %v2341_v58, %v2339_v41  ;;  %vm2728_vm12 = vweird.f32 %v6176_v9  ;;  %v4596_v6 = vadd.s32 4294967294, %v2226_v31  ;;  %v2311_v21 = vsel %vm2307_vm3, %v2291_v26, %v6849_v10 }
 0x344   : > { %v2313_v44 = vsel %vm2309_vm2, %v6851_v33, %v2312_v22  ;;  %v2333_v23 = vshrl.u32 %v2329_v36, 16  ;;  %v2719_v38 = vadd.f32 1.0, %v2718_v17  ;;  %v2726_v24 = vadd.f32 1.0, %v2725_v13  ;;  %v8720_v13 = vld [vmem:[#allocation23_spill] sm:$0xff] }
 0x345   : > { %v2352_v14 = vmul.u32 %v2348_v57, %v6891_v34  ;;  %v2354_v59 = vshll.u32 %v6933_v0, 16  ;;  %vm2122_vm10 = vcmp.lt.s32.totalorder %v6140_v15, 0  ;;  %vm4597_vm1 = vcmp.lt.s32.totalorder %v4596_v6, 0 }
 0x346   : > { %v2244_v46 = vsub.s32 4, %v6897_v61  ;;  %v2335_v54 = vshrl.u32 %v6913_v60, 16  ;;  %v2350_v10 = vmul.u32 %v2348_v57, %v6883_v8  ;;  %v2727_v39 = vmul.f32 %v2726_v24, %v6888_v5 }
 0x347   : > { %v2736_v56 = vxor.u32 2147483648, %v2719_v38  ;;  %v2229_v33 = vsel %vm4597_vm1, 0, %v4596_v6  ;;  %v2344_v36 = vadd.s32 %v2343_v12, %v2333_v23  ;;  %v2353_v28 = vmul.u32 %v2349_v49, %v6891_v34  ;;  %v8721_v6 = vld [vmem:[#allocation24_spill] sm:$0xff] }
 0x348   : > { %v2230_v30 = vsub.s32 32, %v2229_v33  ;;  %v2234_v22 = vsub.s32 4294967266, %v2229_v33  ;;  %vm2358_vm14 = vc.u32 %v2350_v10, %v2354_v59  ;;  %v2733_v29 = vxor.u32 2147483648, %v2727_v39 }
 0x349   : > { %v2356_v55 = vshll.u32 %v2352_v14, 16  ;;  %v2359_v19 = vsel %vm2358_vm14, 1, %v8622_v35  ;;  %v2360_v11 = vadd.s32 %v2354_v59, %v2350_v10  ;;  %v2231_v27 = vshll.u32 %v6922_v4, %v2229_v33 }
 0x34a   : > { %v2232_v60 = vshrl.u32 %v2214_v25, %v2230_v30  ;;  %v2235_v47 = vadd.s32 127, %v2234_v22  ;;  %v2361_v8 = vadd.s32 %v2359_v19, %v2353_v28  ;;  %v2734_v5 = vsel %vm2732_vm5, %v2719_v38, %v2733_v29  ;;  %v8723_v29 = vld [vmem:[#allocation21_spill] sm:$0xff] }
 0x34b   : > { %v2737_v57 = vsel %vm2735_vm9, %v2736_v56, %v2727_v39  ;;  %v6965_v40 = vadd.s32 %v2344_v36, %v2335_v54  ;;  %vm2362_vm2 = vc.u32 %v2360_v11, %v2356_v55  ;;  %vm6974_vm3 = vcmp.le.f32.partialorder %v2120_v43, 0.7853982 }
 0x34c   : > { %v2738_v34 = vsel %vm2731_vm11, %v2734_v5, %v2737_v57  ;;  %v2233_v49 = vor.u32 %v2232_v60, %v2231_v27  ;;  %v2236_v16 = vshll.u32 %v2235_v47, 23  ;;  %v2363_v1 = vsel %vm2362_vm2, 1, %v8622_v35  ;;  %v8725_v27 = vld [vmem:[#allocation11_spill] sm:$0xff] }
 0x34d   : > { %v2739_v4 = vsel %vm2728_vm12, nan, %v2738_v34  ;;  %v2355_v31 = vshrl.u32 %v6933_v0, 16  ;;  %v2365_v26 = vadd.s32 %v2363_v1, %v2361_v8  ;;  %v2314_v53 = vsel %vm2308_vm4, %v2311_v21, %v2313_v44  ;;  %v8722_v44 = vld [vmem:[#allocation14_spill] sm:$0xff] }
 0x34e   : > { %3132 = vmatpush.msrb.mxu1 %v2739_v4  ;;  %v2237_v58 = vor.u32 4788187, %v2236_v16  ;;  %v6981_v17 = vadd.s32 %v2360_v11, %v2356_v55  ;;  %v1810_v25 = vand.u32 2147483647, %v8720_v13  ;;  %v2245_v9 = vsel %vm2122_vm10, %v2244_v46, %v6897_v61  ;;  %v8724_v11 = vld [vmem:[#allocation13_spill] sm:$0xff]  ;;  %v8726_v16 = vld [vmem:[#allocation19_spill] sm:$0xff] }
 0x34f   : > { %v2357_v43 = vshrl.u32 %v2352_v14, 16  ;;  %v2366_v12 = vadd.s32 %v2365_v26, %v2355_v31  ;;  %v1828_v23 = vshrl.u32 %v8624_v63, %v8721_v6  ;;  %v2240_v38 = vcvt.s32.f32 %v2233_v49 }
 0x350   : > { %v2238_v0 = vand.u32 2147483647, %v2237_v58  ;;  %vm2370_vm13 = vc.u32 %v6965_v40, %v6981_v17  ;;  %v1817_v3 = vand.u32 8388607, %v1810_v25  ;;  %v1827_v24 = vshll.u32 %v8623_v50, %v8722_v44 }
 0x351   : > { %v2367_v21 = vadd.s32 %v2366_v12, %v2357_v43  ;;  %v1830_v61 = vshll.u32 %v8624_v63, %v8722_v44  ;;  %v1831_v14 = vshrl.u32 %v8625_v42, %v8721_v6  ;;  %v1833_v54 = vshll.u32 %v8625_v42, %v8722_v44 }
 0x352   : > { %v2241_v59 = vmul.f32 %v2240_v38, %v2238_v0  ;;  %v1818_v46 = vor.u32 8388608, %v1817_v3  ;;  %v1834_v10 = vshrl.u32 %v8626_v32, %v8721_v6  ;;  %v2247_v39 = vsel %vm6974_vm3, 0, %v2245_v9 }
 0x353   : > { %v2371_v56 = vadd.s32 1, %v2367_v21  ;;  %v7005_v33 = vor.u32 %v1828_v23, %v1827_v24  ;;  %v7007_v36 = vor.u32 %v1831_v14, %v1830_v61  ;;  %v2368_v22 = vmul.u32 %v6864_v37, %v2314_v53  ;;  %v8727_v53 = vld [vmem:[#allocation9_spill] sm:$0xff] }
 0x354   : > { %v2242_v30 = vxor.u32 2147483648, %v2241_v59  ;;  %v7010_v28 = vor.u32 %v1834_v10, %v1833_v54  ;;  %vm1844_vm4 = vcmp.lt.s32.totalorder %v8723_v29, 3  ;;  %v1996_v55 = vor.u32 %v6909_v18, %v6905_v48 }
 0x355   : > { %v2372_v19 = vsel %vm2370_vm13, %v2371_v56, %v2367_v21  ;;  %v1856_v60 = vsel %vm1844_vm4, %v8725_v27, %v8724_v11  ;;  %v7022_v47 = vshll.u32 %v1818_v46, 8  ;;  %v2264_v8 = vadd.s32 3, %v2247_v39 }
 0x356   : > { %v2243_v37 = vsel %vm2122_vm10, %v2242_v30, %v2241_v59  ;;  %v2373_v5 = vadd.s32 %v2372_v19, %v2368_v22  ;;  %vm1842_vm7 = vcmp.lt.s32.totalorder %v8723_v29, 1  ;;  %vm1843_vm15 = vcmp.lt.s32.totalorder %v8723_v29, 2 }
 0x357   : > { %v2246_v48 = vsel %vm6974_vm3, %v6140_v15, %v2243_v37  ;;  %v1850_v18 = vsel %vm1842_vm7, %v7005_v33, %v7007_v36  ;;  %v1854_v57 = vsel %vm1842_vm7, %v7007_v36, %v7010_v28  ;;  %v1852_v1 = vsel %vm1844_vm4, %v7010_v28, %v8726_v16 }
 0x358   : > { %v2248_v34 = vmul.f32 %v2246_v48, %v2246_v48  ;;  %v2374_v49 = vadd.s32 536870912, %v2373_v5  ;;  %v1857_v4 = vsel %vm1843_vm15, %v1854_v57, %v1856_v60  ;;  %v1859_v41 = vand.u32 65535, %v7022_v47 }
 0x359   : > { %v7047_v31 = vshrl.u32 %v7022_v47, 16  ;;  %v1861_v26 = vand.u32 65535, %v1857_v4  ;;  %v1862_v58 = vshrl.u32 %v1857_v4, 16  ;;  %vm2000_vm5 = vcmp.lt.s32.totalorder %v8727_v53, 4 }
 0x35a   : > { %v2249_v9 = vmul.f32 -0.001358992, %v2248_v34  ;;  %v2256_v43 = vmul.f32 -0.00019511016, %v2248_v34  ;;  %v7050_v12 = vshrl.u32 %v2374_v49, 30  ;;  %v1853_v24 = vsel %vm1843_vm15, %v1850_v18, %v1852_v1 }
 0x35b   : > { %v7055_v23 = vsel %vm2000_vm5, %v6915_v51, 920167782  ;;  %v1864_v0 = vmul.u32 %v1862_v58, %v1859_v41  ;;  %v7058_v38 = vmul.u32 %v1861_v26, %v7047_v31  ;;  %v7065_v61 = vsel %vm2000_vm5, %v1996_v55, 1326507024 }
 0x35c   : > { %v2250_v3 = vadd.f32 0.041655596, %v2249_v9  ;;  %v2257_v21 = vadd.f32 0.008332121, %v2256_v43  ;;  %v2376_v44 = vshll.u32 %v7050_v12, 30  ;;  %v2265_v14 = vand.u32 3, %v2264_v8 }
 0x35d   : > { %v1863_v59 = vmul.u32 %v1861_v26, %v1859_v41  ;;  %v1867_v46 = vshll.u32 %v1864_v0, 16  ;;  %v1866_v56 = vmul.u32 %v1862_v58, %v7047_v31  ;;  %v1869_v30 = vshll.u32 %v7058_v38, 16 }
 0x35e   : > { %v2251_v54 = vmul.f32 %v2250_v3, %v2248_v34  ;;  %v2258_v10 = vmul.f32 %v2257_v21, %v2248_v34  ;;  %v2377_v39 = vsub.s32 %v2373_v5, %v2376_v44  ;;  %v1884_v19 = vshrl.u32 %v1853_v24, 16 }
 0x35f   : > { %vm1871_vm9 = vc.u32 %v1863_v59, %v1867_v46  ;;  %v1873_v22 = vadd.s32 %v1867_v46, %v1863_v59  ;;  %vm2267_vm12 = vcmp.eq.s32.totalorder %v2265_v14, 0  ;;  %v1883_v37 = vand.u32 65535, %v1853_v24 }
 0x360   : > { %v2252_v11 = vadd.f32 -0.4999988, %v2251_v54  ;;  %v2259_v27 = vadd.f32 -0.16666654, %v2258_v10  ;;  %vm2378_vm11 = vcmp.lt.s32.totalorder %v2377_v39, 0  ;;  %v2379_v60 = vsub.s32 0, %v2377_v39 }
 0x361   : > { %v1872_v55 = vsel %vm1871_vm9, 1, %v8622_v35  ;;  %vm1875_vm10 = vc.u32 %v1873_v22, %v1869_v30  ;;  %vm2266_vm1 = vcmp.lt.s32.totalorder %v2265_v14, 2  ;;  %vm2263_vm14 = vweird.f32 %v6140_v15 }
 0x362   : > { %v2253_v8 = vmul.f32 %v2252_v11, %v2248_v34  ;;  %v2260_v18 = vmul.f32 %v2259_v27, %v2248_v34  ;;  %v2380_v5 = vsel %vm2378_vm11, %v2379_v60, %v2377_v39  ;;  %v1874_v57 = vadd.s32 %v1872_v55, %v1866_v56 }
 0x363   : > { %v2381_v49 = vclz %v2380_v5  ;;  %v1826_v16 = vshrl.u32 %v8623_v50, %v8721_v6  ;;  %v1876_v1 = vsel %vm1875_vm10, 1, %v8622_v35  ;;  %v1886_v4 = vmul.u32 %v1884_v19, %v1859_v41  ;;  %v8728_v5 = vld [vmem:[#allocation7_spill] sm:$0xff] }
 0x364   : > { %v2254_v26 = vadd.f32 1.0, %v2253_v8  ;;  %v2261_v58 = vadd.f32 1.0, %v2260_v18  ;;  %v1847_v9 = vsel %vm1845_vm6, %v7010_v28, 2102212464  ;;  %v1878_v43 = vadd.s32 %v1876_v1, %v1874_v57 }
 0x365   : > { %vm2270_vm2 = vcmp.eq.s32.totalorder %v2265_v14, 2  ;;  %v2369_v34 = vadd.s32 %v6981_v17, %v6965_v40  ;;  %v4599_v3 = vadd.s32 4294967294, %v2381_v49  ;;  %v1887_v21 = vmul.u32 %v1883_v37, %v7047_v31 }
 0x366   : > { %v2262_v44 = vmul.f32 %v2261_v58, %v2246_v48  ;;  %v2271_v24 = vxor.u32 2147483648, %v2254_v26  ;;  %v1846_v6 = vsel %vm1842_vm7, %v1826_v16, %v7005_v33  ;;  %v1868_v59 = vshrl.u32 %v1864_v0, 16 }
 0x367   : > { %vm4600_vm3 = vcmp.lt.s32.totalorder %v4599_v3, 0  ;;  %v1848_v28 = vsel %vm1844_vm4, %v7007_v36, %v1847_v9  ;;  %v1885_v46 = vmul.u32 %v1883_v37, %v1859_v41  ;;  %v1889_v54 = vshll.u32 %v1886_v4, 16 }
 0x368   : > { %v2268_v10 = vxor.u32 2147483648, %v2262_v44  ;;  %v2384_v56 = vsel %vm4600_vm3, 0, %v4599_v3  ;;  %v1879_v40 = vadd.s32 %v1878_v43, %v1868_v59  ;;  %v1888_v17 = vmul.u32 %v1884_v19, %v7047_v31 }
 0x369   : > { %v2272_v48 = vsel %vm2270_vm2, %v2271_v24, %v2262_v44  ;;  %v2385_v30 = vsub.s32 32, %v2384_v56  ;;  %v2389_v22 = vsub.s32 4294967266, %v2384_v56  ;;  %v1891_v11 = vshll.u32 %v1887_v21, 16 }
 0x36a   : > { %v2269_v33 = vsel %vm2267_vm12, %v2254_v26, %v2268_v10  ;;  %v2386_v0 = vshll.u32 %v2377_v39, %v2384_v56  ;;  %vm1893_vm6 = vc.u32 %v1885_v46, %v1889_v54  ;;  %v1895_v27 = vadd.s32 %v1889_v54, %v1885_v46 }
 0x36b   : > { %v2273_v60 = vsel %vm2266_vm1, %v2269_v33, %v2272_v48  ;;  %v2387_v36 = vshrl.u32 %v2369_v34, %v2385_v30  ;;  %v2390_v41 = vadd.s32 127, %v2389_v22  ;;  %v1894_v55 = vsel %vm1893_vm6, 1, %v8622_v35 }
 0x36c   : > { %v2274_v37 = vsel %vm2263_vm14, nan, %v2273_v60  ;;  %v1870_v31 = vshrl.u32 %v7058_v38, 16  ;;  %v1896_v19 = vadd.s32 %v1894_v55, %v1888_v17  ;;  %vm1897_vm13 = vc.u32 %v1895_v27, %v1891_v11 }
 0x36d   : > { %3104 = vmatpush.msrb.mxu0 %v2274_v37  ;;  %v2388_v8 = vor.u32 %v2387_v36, %v2386_v0  ;;  %v2391_v18 = vshll.u32 %v2390_v41, 23  ;;  %v1898_v39 = vsel %vm1897_vm13, 1, %v8622_v35  ;;  %v1965_v57 = vand.u32 2147483647, %v8728_v5 }
 0x36e   : > { %vm2277_vm4 = vcmp.lt.s32.totalorder %v8714_v7, 0  ;;  %v1849_v14 = vsel %vm1843_vm15, %v1846_v6, %v1848_v28  ;;  %v7099_v49 = vadd.s32 %v1879_v40, %v1870_v31  ;;  %v1890_v15 = vshrl.u32 %v1886_v4, 16 }
 0x36f   : > { %v1900_v16 = vadd.s32 %v1898_v39, %v1896_v19  ;;  %v2392_v1 = vor.u32 4788187, %v2391_v18  ;;  %v1892_v38 = vshrl.u32 %v1887_v21, 16  ;;  %v7101_v26 = vadd.s32 %v1895_v27, %v1891_v11 }
 0x370   : > { %v1972_v58 = vand.u32 8388607, %v1965_v57  ;;  %v2395_v9 = vcvt.s32.f32 %v2388_v8  ;;  %v1982_v34 = vshll.u32 %v8623_v50, %v8717_v20  ;;  %v1983_v29 = vshrl.u32 %v8624_v63, %v8716_v62 }
 0x371   : > { %v1901_v43 = vadd.s32 %v1900_v16, %v1890_v15  ;;  %v2393_v3 = vand.u32 2147483647, %v2392_v1  ;;  %v1985_v4 = vshll.u32 %v8624_v63, %v8717_v20  ;;  %v1986_v21 = vshrl.u32 %v8625_v42, %v8716_v62 }
 0x372   : > { %v1973_v44 = vor.u32 8388608, %v1972_v58  ;;  %v7113_v6 = vor.u32 %v1983_v29, %v1982_v34  ;;  %v1988_v59 = vshll.u32 %v8625_v42, %v8717_v20  ;;  %v1989_v28 = vshrl.u32 %v8626_v32, %v8716_v62 }
 0x373   : > { %v1902_v24 = vadd.s32 %v1901_v43, %v1892_v38  ;;  %v2396_v46 = vmul.f32 %v2395_v9, %v2393_v3  ;;  %v2399_v54 = vsub.s32 4, %v7050_v12  ;;  %vm1905_vm7 = vc.u32 %v7099_v49, %v7101_v26 }
 0x374   : > { %v7122_v10 = vor.u32 %v1986_v21, %v1985_v4  ;;  %v7124_v40 = vor.u32 %v1989_v28, %v1988_v59  ;;  %vm1997_vm15 = vcmp.lt.s32.totalorder %v8727_v53, 1  ;;  %vm1999_vm9 = vcmp.lt.s32.totalorder %v8727_v53, 3 }
 0x375   : > { %v1906_v56 = vadd.s32 1, %v1902_v24  ;;  %v2397_v17 = vxor.u32 2147483648, %v2396_v46  ;;  %v1903_v20 = vmul.u32 %v7022_v47, %v1849_v14  ;;  %v2011_v30 = vsel %vm1999_vm9, %v6915_v51, %v7065_v61 }
 0x376   : > { %v2005_v48 = vsel %vm1997_vm15, %v7113_v6, %v7122_v10  ;;  %v2007_v11 = vsel %vm1999_vm9, %v7124_v40, %v7055_v23  ;;  %v2009_v47 = vsel %vm1997_vm15, %v7122_v10, %v7124_v40  ;;  %v7145_v33 = vshll.u32 %v1973_v44, 8 }
 0x377   : > { %v1907_v22 = vsel %vm1905_vm7, %v1906_v56, %v1902_v24  ;;  %vm7149_vm11 = vcmp.le.f32.partialorder %v2275_v52, 0.7853982  ;;  %v2398_v51 = vsel %vm2277_vm4, %v2397_v17, %v2396_v46  ;;  %vm1998_vm12 = vcmp.lt.s32.totalorder %v8727_v53, 2 }
 0x378   : > { %v1908_v61 = vadd.s32 %v1907_v22, %v1903_v20  ;;  %v2400_v23 = vsel %vm2277_vm4, %v2399_v54, %v7050_v12  ;;  %v2401_v27 = vsel %vm7149_vm11, %v8714_v7, %v2398_v51  ;;  %v2012_v52 = vsel %vm1998_vm12, %v2009_v47, %v2011_v30 }
 0x379   : > { %v2403_v60 = vmul.f32 %v2401_v27, %v2401_v27  ;;  %v2008_v41 = vsel %vm1998_vm12, %v2005_v48, %v2007_v11  ;;  %v2016_v55 = vand.u32 65535, %v2012_v52  ;;  %v2014_v37 = vand.u32 65535, %v7145_v33 }
 0x37a   : > { %v1909_v36 = vadd.s32 536870912, %v1908_v61  ;;  %v2015_v31 = vshrl.u32 %v7145_v33, 16  ;;  %v2017_v19 = vshrl.u32 %v2012_v52, 16  ;;  %v2402_v12 = vsel %vm7149_vm11, 0, %v2400_v23 }
 0x37b   : > { %v2404_v8 = vmul.f32 -0.001358992, %v2403_v60  ;;  %v2411_v18 = vmul.f32 -0.00019511016, %v2403_v60  ;;  %v2039_v16 = vshrl.u32 %v2008_v41, 16  ;;  %v2419_v9 = vadd.s32 3, %v2402_v12 }
 0x37c   : > { %v7170_v39 = vshrl.u32 %v1909_v36, 30  ;;  %v2019_v14 = vmul.u32 %v2017_v19, %v2014_v37  ;;  %v7172_v15 = vmul.u32 %v2016_v55, %v2015_v31  ;;  %v2018_v43 = vmul.u32 %v2016_v55, %v2014_v37 }
 0x37d   : > { %v2405_v1 = vadd.f32 0.041655596, %v2404_v8  ;;  %v2412_v38 = vadd.f32 0.008332121, %v2411_v18  ;;  %v2021_v4 = vmul.u32 %v2017_v19, %v2015_v31  ;;  %v7176_v59 = vmul.u32 %v2039_v16, %v2014_v37 }
 0x37e   : > { %v1911_v58 = vshll.u32 %v7170_v39, 30  ;;  %v2022_v34 = vshll.u32 %v2019_v14, 16  ;;  %v2024_v21 = vshll.u32 %v7172_v15, 16  ;;  %v2420_v56 = vand.u32 3, %v2419_v9 }
 0x37f   : > { %v2406_v29 = vmul.f32 %v2405_v1, %v2403_v60  ;;  %v2413_v3 = vmul.f32 %v2412_v38, %v2403_v60  ;;  %v2038_v20 = vand.u32 65535, %v2008_v41  ;;  %vm2418_vm2 = vweird.f32 %v8714_v7 }
 0x380   : > { %v1912_v44 = vsub.s32 %v1908_v61, %v1911_v58  ;;  %vm2026_vm10 = vc.u32 %v2018_v43, %v2022_v34  ;;  %v2028_v24 = vadd.s32 %v2022_v34, %v2018_v43  ;;  %v2044_v52 = vshll.u32 %v7176_v59, 16 }
 0x381   : > { %v2407_v28 = vadd.f32 -0.4999988, %v2406_v29  ;;  %v2414_v46 = vadd.f32 -0.16666654, %v2413_v3  ;;  %v2027_v17 = vsel %vm2026_vm10, 1, %v8622_v35  ;;  %vm2421_vm3 = vcmp.lt.s32.totalorder %v2420_v56, 2 }
 0x382   : > { %vm1913_vm1 = vcmp.lt.s32.totalorder %v1912_v44, 0  ;;  %v1914_v54 = vsub.s32 0, %v1912_v44  ;;  %vm2030_vm14 = vc.u32 %v2028_v24, %v2024_v21  ;;  %v2029_v11 = vadd.s32 %v2027_v17, %v2021_v4 }
 0x383   : > { %v2408_v48 = vmul.f32 %v2407_v28, %v2403_v60  ;;  %v2415_v30 = vmul.f32 %v2414_v46, %v2403_v60  ;;  %v2031_v0 = vsel %vm2030_vm14, 1, %v8622_v35  ;;  %v2040_v55 = vmul.u32 %v2038_v20, %v2014_v37 }
 0x384   : > { %v1915_v22 = vsel %vm1913_vm1, %v1914_v54, %v1912_v44  ;;  %v2033_v23 = vadd.s32 %v2031_v0, %v2029_v11  ;;  %v2042_v19 = vmul.u32 %v2038_v20, %v2015_v31  ;;  %vm2422_vm6 = vcmp.eq.s32.totalorder %v2420_v56, 0 }
 0x385   : > { %v1916_v47 = vclz %v1915_v22  ;;  %v2409_v51 = vadd.f32 1.0, %v2408_v48  ;;  %v2416_v61 = vadd.f32 1.0, %v2415_v30  ;;  %v2023_v60 = vshrl.u32 %v2019_v14, 16 }
 0x386   : > { %vm2425_vm13 = vcmp.eq.s32.totalorder %v2420_v56, 2  ;;  %v1904_v8 = vadd.s32 %v7101_v26, %v7099_v49  ;;  %vm2048_vm7 = vc.u32 %v2040_v55, %v2044_v52  ;;  %v2043_v58 = vmul.u32 %v2039_v16, %v2015_v31 }
 0x387   : > { %v4590_v36 = vadd.s32 4294967294, %v1916_v47  ;;  %v2417_v12 = vmul.f32 %v2416_v61, %v2401_v27  ;;  %v2426_v41 = vxor.u32 2147483648, %v2409_v51  ;;  %v2034_v38 = vadd.s32 %v2033_v23, %v2023_v60 }
 0x388   : > { %v2046_v34 = vshll.u32 %v2042_v19, 16  ;;  %v2049_v37 = vsel %vm2048_vm7, 1, %v8622_v35  ;;  %v2050_v3 = vadd.s32 %v2044_v52, %v2040_v55  ;;  %v1981_v31 = vshrl.u32 %v8623_v50, %v8716_v62 }
 0x389   : > { %vm4591_vm4 = vcmp.lt.s32.totalorder %v4590_v36, 0  ;;  %v2423_v18 = vxor.u32 2147483648, %v2417_v12  ;;  %v2427_v27 = vsel %vm2425_vm13, %v2426_v41, %v2417_v12  ;;  %v2051_v4 = vadd.s32 %v2049_v37, %v2043_v58 }
 0x38a   : > { %v1919_v1 = vsel %vm4591_vm4, 0, %v4590_v36  ;;  %v2002_v16 = vsel %vm2000_vm5, %v7124_v40, 2102212464  ;;  %vm2052_vm11 = vc.u32 %v2050_v3, %v2046_v34  ;;  %v2025_v54 = vshrl.u32 %v7172_v15, 16 }
 0x38b   : > { %v1920_v9 = vsub.s32 32, %v1919_v1  ;;  %v1924_v43 = vsub.s32 4294967266, %v1919_v1  ;;  %v2424_v29 = vsel %vm2422_vm6, %v2409_v51, %v2423_v18  ;;  %v1921_v21 = vshll.u32 %v1912_v44, %v1919_v1 }
 0x38c   : > { %v2428_v14 = vsel %vm2421_vm3, %v2424_v29, %v2427_v27  ;;  %v2053_v44 = vsel %vm2052_vm11, 1, %v8622_v35  ;;  %v2045_v56 = vshrl.u32 %v7176_v59, 16  ;;  %v2001_v62 = vsel %vm1997_vm15, %v1981_v31, %v7113_v6 }
 0x38d   : > { %v1922_v24 = vshrl.u32 %v1904_v8, %v1920_v9  ;;  %v1925_v49 = vadd.s32 127, %v1924_v43  ;;  %v2429_v26 = vsel %vm2418_vm2, nan, %v2428_v14  ;;  %v2055_v17 = vadd.s32 %v2053_v44, %v2051_v4 }
 0x38e   : > { %3133 = vmatpush.msrb.mxu1 %v2429_v26  ;;  %v2003_v40 = vsel %vm1999_vm9, %v7122_v10, %v2002_v16  ;;  %v2035_v20 = vadd.s32 %v2034_v38, %v2025_v54  ;;  %v2047_v48 = vshrl.u32 %v2042_v19, 16  ;;  %v2054_v15 = vadd.s32 %v2050_v3, %v2046_v34 }
 0x38f   : > { %v1923_v28 = vor.u32 %v1922_v24, %v1921_v21  ;;  %v1926_v46 = vshll.u32 %v1925_v49, 23  ;;  %v2056_v30 = vadd.s32 %v2055_v17, %v2045_v56  ;;  %v2004_v47 = vsel %vm1998_vm12, %v2001_v62, %v2003_v40 }
 0x390   : > { %vm2060_vm5 = vc.u32 %v2035_v20, %v2054_v15  ;;  %v2058_v6 = vmul.u32 %v7145_v33, %v2004_v47  ;;  %vm1812_vm15 = vcmp.lt.s32.totalorder %v8720_v13, 0  ;;  %v1934_v10 = vsub.s32 4, %v7170_v39 }
 0x391   : > { %v1927_v7 = vor.u32 4788187, %v1926_v46  ;;  %v1930_v11 = vcvt.s32.f32 %v1923_v28  ;;  %v2057_v59 = vadd.s32 %v2056_v30, %v2047_v48  ;;  %vm7209_vm9 = vcmp.le.f32.partialorder %v1810_v25, 0.7853982 }
 0x392   : > { %v1935_v33 = vsel %vm1812_vm15, %v1934_v10, %v7170_v39  ;;  %v2059_v54 = vadd.s32 %v2054_v15, %v2035_v20  ;;  %vm1953_vm2 = vweird.f32 %v8720_v13  ;;  %vm1967_vm6 = vcmp.lt.s32.totalorder %v8728_v5, 0 }
 0x393   : > { %v1928_v22 = vand.u32 2147483647, %v1927_v7  ;;  %v2061_v51 = vadd.s32 1, %v2057_v59  ;;  %v1937_v18 = vsel %vm7209_vm9, 0, %v1935_v33  ;;  %vm7230_vm13 = vcmp.le.f32.partialorder %v1965_v57, 0.7853982 }
 0x394   : > { %v1954_v34 = vadd.s32 3, %v1937_v18 }
 0x395   : > { %v1931_v0 = vmul.f32 %v1930_v11, %v1928_v22  ;;  %v2062_v23 = vsel %vm2060_vm5, %v2061_v51, %v2057_v59  ;;  %v3050_v59 = vld [vmem:[%s8446_s5] sm:$0xff]  ;;  %v3051_v51 = vld [vmem:[%s8446_s5 + $0x8] sm:$0xff]  ;;  %vm2108_vm5 = vweird.f32 %v8728_v5 }
 0x396   : > { %v2063_v36 = vadd.s32 %v2062_v23, %v2058_v6  ;;  %v1955_v49 = vand.u32 3, %v1954_v34 }
 0x397   : > { %v1932_v61 = vxor.u32 2147483648, %v1931_v0 }
 0x398   : > { %v2064_v12 = vadd.s32 536870912, %v2063_v36  ;;  %vm1957_vm1 = vcmp.eq.s32.totalorder %v1955_v49, 0  ;;  %vm1960_vm14 = vcmp.eq.s32.totalorder %v1955_v49, 2  ;;  %vm1956_vm3 = vcmp.lt.s32.totalorder %v1955_v49, 2 }
 0x399   : > { %v1933_v53 = vsel %vm1812_vm15, %v1932_v61, %v1931_v0 }
 0x39a   : > { %v1936_v55 = vsel %vm7209_vm9, %v8720_v13, %v1933_v53  ;;  %v2065_v8 = vshrl.u32 %v2064_v12, 30  ;;  %v3052_v12 = vld [vmem:[%s8446_s5 + $0x10] sm:$0xff] }
 0x39b   : > { %v1938_v19 = vmul.f32 %v1936_v55, %v1936_v55 }
 0x39c   : > { %v2066_v38 = vshll.u32 %v2065_v8, 30  ;;  %v2089_v23 = vsub.s32 4, %v2065_v8 }
 0x39d   : > { %v1939_v41 = vmul.f32 -0.001358992, %v1938_v19  ;;  %v1946_v60 = vmul.f32 -0.00019511016, %v1938_v19 }
 0x39e   : > { %v2067_v43 = vsub.s32 %v2063_v36, %v2066_v38 }
 0x39f   : > { %v1940_v25 = vadd.f32 0.041655596, %v1939_v41  ;;  %v1947_v1 = vadd.f32 0.008332121, %v1946_v60 }
 0x3a0   : > { %vm2068_vm12 = vcmp.lt.s32.totalorder %v2067_v43, 0  ;;  %v2069_v27 = vsub.s32 0, %v2067_v43 }
 0x3a1   : > { %v1941_v58 = vmul.f32 %v1940_v25, %v1938_v19  ;;  %v1948_v9 = vmul.f32 %v1947_v1, %v1938_v19 }
 0x3a2   : > { %v2070_v39 = vsel %vm2068_vm12, %v2069_v27, %v2067_v43 }
 0x3a3   : > { %v1942_v37 = vadd.f32 -0.4999988, %v1941_v58  ;;  %v1949_v29 = vadd.f32 -0.16666654, %v1948_v9  ;;  %v2071_v14 = vclz %v2070_v39 }
 0x3a5   : > { %v1943_v3 = vmul.f32 %v1942_v37, %v1938_v19  ;;  %v1950_v4 = vmul.f32 %v1949_v29, %v1938_v19  ;;  %v4593_v26 = vadd.s32 4294967294, %v2071_v14  ;;  %v2090_v19 = vsel %vm1967_vm6, %v2089_v23, %v2065_v8  ;;  %v3053_v8 = vld [vmem:[%s8446_s5 + $0x18] sm:$0xff] }
 0x3a6   : > { %v2092_v41 = vsel %vm7230_vm13, 0, %v2090_v19 }
 0x3a7   : > { %v1944_v21 = vadd.f32 1.0, %v1943_v3  ;;  %v1951_v24 = vadd.f32 1.0, %v1950_v4  ;;  %vm4594_vm10 = vcmp.lt.s32.totalorder %v4593_v26, 0  ;;  %v2109_v38 = vadd.s32 3, %v2092_v41 }
 0x3a8   : > { %v2074_v46 = vsel %vm4594_vm10, 0, %v4593_v26 }
 0x3a9   : > { %v1952_v31 = vmul.f32 %v1951_v24, %v1936_v55  ;;  %v1961_v16 = vxor.u32 2147483648, %v1944_v21  ;;  %v2075_v44 = vsub.s32 32, %v2074_v46  ;;  %v2079_v56 = vsub.s32 4294967266, %v2074_v46  ;;  %v7253_v24 = vpop.permute.xlu2 %3075 }
 0x3aa   : > { %v2076_v40 = vshll.u32 %v2067_v43, %v2074_v46  ;;  %v2110_v37 = vand.u32 3, %v2109_v38 }
 0x3ab   : > { %v1958_v28 = vxor.u32 2147483648, %v1952_v31  ;;  %v1962_v7 = vsel %vm1960_vm14, %v1961_v16, %v1952_v31  ;;  %v2077_v48 = vshrl.u32 %v2059_v54, %v2075_v44  ;;  %v2080_v30 = vadd.s32 127, %v2079_v56  ;;  %v3066_v54 = vpop.permute.xlu1 %3065 }
 0x3ac   : > { %vm2112_vm4 = vcmp.eq.s32.totalorder %v2110_v37, 0  ;;  %vm2115_vm7 = vcmp.eq.s32.totalorder %v2110_v37, 2  ;;  %vm2111_vm11 = vcmp.lt.s32.totalorder %v2110_v37, 2 }
 0x3ad   : > { %v1959_v17 = vsel %vm1957_vm1, %v1944_v21, %v1958_v28  ;;  %v2078_v11 = vor.u32 %v2077_v48, %v2076_v40  ;;  %v2081_v47 = vshll.u32 %v2080_v30, 23 }
 0x3ae   : > { %v1963_v62 = vsel %vm1956_vm3, %v1959_v17, %v1962_v7 }
 0x3af   : > { %v1964_v22 = vsel %vm1953_vm2, nan, %v1963_v62  ;;  %v2082_v20 = vor.u32 4788187, %v2081_v47  ;;  %v2085_v13 = vcvt.s32.f32 %v2078_v11 }
 0x3b0   : > { %3105 = vmatpush.msrb.mxu0 %v1964_v22 }
 0x3b1   : > { %4613 = vmatmul.msk.f32.vlgmr.msrb.gmra.mxu0 %vm8579_vm8, %v3050_v59  ;;  %v2083_v15 = vand.u32 2147483647, %v2082_v20  ;;  %v3061_v26 = vpop.permute.xlu2 %3060 }
 0x3b3   : > { %v2086_v0 = vmul.f32 %v2085_v13, %v2083_v15 }
 0x3b5   : > { %v2087_v61 = vxor.u32 2147483648, %v2086_v0 }
 0x3b7   : > { %v2088_v10 = vsel %vm1967_vm6, %v2087_v61, %v2086_v0 }
 0x3b8   : > { %v2091_v52 = vsel %vm7230_vm13, %v8728_v5, %v2088_v10 }
 0x3b9   : > { %4614 = vmatmul.msk.f32.gmra.mxu0 %vm8579_vm8, %v3051_v51  ;;  %v2093_v53 = vmul.f32 %v2091_v52, %v2091_v52 }
 0x3bb   : > { %v2094_v36 = vmul.f32 -0.001358992, %v2093_v53  ;;  %v2101_v55 = vmul.f32 -0.00019511016, %v2093_v53 }
 0x3bd   : > { %v2095_v57 = vadd.f32 0.041655596, %v2094_v36  ;;  %v2102_v33 = vadd.f32 0.008332121, %v2101_v55 }
 0x3bf   : > { %v2096_v60 = vmul.f32 %v2095_v57, %v2093_v53  ;;  %v2103_v18 = vmul.f32 %v2102_v33, %v2093_v53 }
 0x3c1   : > { %4615 = vmatmul.msk.f32.gmra.mxu0 %vm8579_vm8, %v3052_v12  ;;  %v2097_v25 = vadd.f32 -0.4999988, %v2096_v60  ;;  %v2104_v1 = vadd.f32 -0.16666654, %v2103_v18 }
 0x3c3   : > { %v2098_v58 = vmul.f32 %v2097_v25, %v2093_v53  ;;  %v2105_v9 = vmul.f32 %v2104_v1, %v2093_v53 }
 0x3c5   : > { %v2099_v43 = vadd.f32 1.0, %v2098_v58  ;;  %v2106_v34 = vadd.f32 1.0, %v2105_v9 }
 0x3c7   : > { %v2107_v29 = vmul.f32 %v2106_v34, %v2091_v52  ;;  %v2116_v27 = vxor.u32 2147483648, %v2099_v43 }
 0x3c9   : > { %4616 = vmatmul.msk.f32.gmra.mxu0 %vm8579_vm8, %v3053_v8  ;;  %v2113_v3 = vxor.u32 2147483648, %v2107_v29  ;;  %v2117_v39 = vsel %vm2115_vm7, %v2116_v27, %v2107_v29 }
 0x3cb   : > { %v2114_v4 = vsel %vm2112_vm4, %v2099_v43, %v2113_v3 }
 0x3cc   : > { %v2118_v14 = vsel %vm2111_vm11, %v2114_v4, %v2117_v39 }
 0x3cd   : > { %v2119_v21 = vsel %vm2108_vm5, nan, %v2118_v14 }
 0x3ce   : > { %3134 = vmatpush.msrb.mxu1 %v2119_v21 }
 0x3cf   : > { %4617 = vmatmul.msk.f32.vlgmr.msrb.gmra.mxu1 %vm8579_vm8, %v3050_v59 }
 0x3d7   : > { %4618 = vmatmul.msk.f32.gmra.mxu1 %vm8579_vm8, %v3051_v51 }
 0x3df   : > { %4619 = vmatmul.msk.f32.gmra.mxu1 %vm8579_vm8, %v3052_v12 }
 0x3e7   : > { %4620 = vmatmul.msk.f32.gmra.mxu1 %vm8579_vm8, %v3053_v8 }
 0x42e   : > { %v3107_v49 = vpop.f32.mrf.mxu0 }
 0x42f   : > { %v7255_v31 = vadd.f32 %v3107_v49, %v3061_v26 }
 0x431   : > { %8735 = vst [vmem:[#allocation8_spill] sm:$0xff] %v7255_v31  ;;  %v3151_v16 = vand.u32 2139095040, %v7255_v31  ;;  %v8526_v30 = vand.u32 2147483647, %v7255_v31 }
 0x433   : > { %v3152_v5 = vshrl.u32 %v3151_v16, 23  ;;  %v3155_v15 = vand.u32 8388607, %v8526_v30 }
 0x435   : > { %v4621_v28 = vadd.s32 4294967169, %v3152_v5  ;;  %v3156_v10 = vor.u32 8388608, %v3155_v15 }
 0x436   : > { %v3110_v44 = vpop.f32.mrf.mxu0 }
 0x437   : > { %v3158_v46 = vadd.s32 1, %v4621_v28  ;;  %v7258_v56 = vadd.f32 %v3110_v44, %v3066_v54  ;;  %v7290_v9 = vshll.u32 %v3156_v10, 8 }
 0x439   : > { %vm3159_vm15 = vcmp.gt.s32.totalorder %v3158_v46, 0  ;;  %8736 = vst [vmem:[#allocation16_spill] sm:$0xff] %v7258_v56  ;;  %v3461_v17 = vand.u32 2139095040, %v7258_v56  ;;  %v8528_v59 = vand.u32 2147483647, %v7258_v56  ;;  %v7312_v21 = vand.u32 65535, %v7290_v9 }
 0x43a   : > { %v3160_v7 = vsel %vm3159_vm15, %v3158_v46, 0  ;;  %8740 = vst [vmem:[#allocation15_spill] sm:$0xff] %v7290_v9  ;;  %v7315_v49 = vshrl.u32 %v7290_v9, 16 }
 0x43b   : > { %v3462_v62 = vshrl.u32 %v3461_v17, 23  ;;  %v3162_v40 = vand.u32 31, %v3160_v7  ;;  %v3465_v51 = vand.u32 8388607, %v8528_v59  ;;  %v7283_v57 = vshrl.u32 %v3160_v7, 5  ;;  %8746 = vst [vmem:[#allocation20_spill] sm:$0xff] %v7312_v21 }
 0x43c   : > { %8747 = vst [vmem:[#allocation10_spill] sm:$0xff] %v7315_v49 }
 0x43d   : > { %v4627_v48 = vadd.s32 4294967169, %v3462_v62  ;;  %v7265_v20 = vsub.s32 32, %v3162_v40  ;;  %v3174_v23 = vshll.u32 %v8626_v32, %v3162_v40  ;;  %v3177_v52 = vshll.u32 %v8654_v2, %v3162_v40  ;;  %8739 = vst [vmem:[#allocation26_spill] sm:$0xff] %v7283_v57 }
 0x43e   : > { %v3165_v33 = vshll.u32 %v8623_v50, %v3162_v40  ;;  %v3466_v60 = vor.u32 8388608, %v3465_v51  ;;  %v3168_v18 = vshll.u32 %v8624_v63, %v3162_v40  ;;  %v3171_v58 = vshll.u32 %v8625_v42, %v3162_v40  ;;  %v3113_v28 = vpop.f32.mrf.mxu0 }
 0x43f   : > { %v3468_v11 = vadd.s32 1, %v4627_v48  ;;  %8738 = vst [vmem:[#allocation25_spill] sm:$0xff] %v7265_v20  ;;  %v3175_v61 = vshrl.u32 %v8654_v2, %v7265_v20  ;;  %v3178_v6 = vshrl.u32 %v8631_v45, %v7265_v20  ;;  %v3166_v36 = vshrl.u32 %v8624_v63, %v7265_v20 }
 0x440   : > { %v3169_v55 = vshrl.u32 %v8625_v42, %v7265_v20  ;;  %v3172_v41 = vshrl.u32 %v8626_v32, %v7265_v20  ;;  %vm8595_vm12 = vcmp.lt.s32.totalorder %v7283_v57, 4  ;;  %v7301_v3 = vshll.u32 %v3466_v60, 8 }
 0x441   : > { %vm3469_vm9 = vcmp.gt.s32.totalorder %v3468_v11, 0  ;;  %v3176_v25 = vor.u32 %v3175_v61, %v3174_v23  ;;  %v3179_v1 = vor.u32 %v3178_v6, %v3177_v52  ;;  %v7292_v8 = vor.u32 %v3166_v36, %v3165_v33 }
 0x442   : > { %v3470_v53 = vsel %vm3469_vm9, %v3468_v11, 0  ;;  %v7294_v43 = vor.u32 %v3169_v55, %v3168_v18  ;;  %v7298_v27 = vor.u32 %v3172_v41, %v3171_v58  ;;  %8744 = vst [vmem:[#allocation22_spill] sm:$0xff] %v7301_v3  ;;  %vm8594_vm10 = vcmp.lt.s32.totalorder %v7283_v57, 1 }
 0x443   : > { %v3472_v38 = vand.u32 31, %v3470_v53  ;;  %8741 = vst [vmem:[#allocation17_spill] sm:$0xff] %v7292_v8  ;;  %v3189_v4 = vsel %vm8595_vm12, %v3176_v25, 920167782  ;;  %v3193_v39 = vsel %vm8595_vm12, %v3179_v1, 1326507024 }
 0x444   : > { %8742 = vst [vmem:[#allocation5_spill] sm:$0xff] %v7294_v43  ;;  %vm8586_vm1 = vcmp.lt.s32.totalorder %v7283_v57, 3  ;;  %v7334_v44 = vsel %vm8594_vm10, %v7294_v43, %v7298_v27  ;;  %v7341_v7 = vand.u32 65535, %v7301_v3  ;;  %v7343_v62 = vshrl.u32 %v3470_v53, 5 }
 0x445   : > { %8743 = vst [vmem:[#allocation18_spill] sm:$0xff] %v7298_v27  ;;  %v7307_v14 = vsub.s32 32, %v3472_v38  ;;  %v7328_v46 = vsel %vm8586_vm1, %v7298_v27, %v3189_v4  ;;  %v7338_v17 = vsel %vm8586_vm1, %v3176_v25, %v3193_v39  ;;  %v3475_v40 = vshll.u32 %v8623_v50, %v3472_v38 }
 0x446   : > { %8750 = vst [vmem:[#allocation14_spill] sm:$0xff] %v7328_v46  ;;  %v3478_v23 = vshll.u32 %v8624_v63, %v3472_v38  ;;  %v3481_v52 = vshll.u32 %v8625_v42, %v3472_v38  ;;  %v3487_v53 = vshll.u32 %v8654_v2, %v3472_v38  ;;  %vm3490_vm2 = vcmp.lt.s32.totalorder %v7343_v62, 1 }
 0x447   : > { %8745 = vst [vmem:[#allocation12_spill] sm:$0xff] %v7307_v14  ;;  %v3485_v48 = vshrl.u32 %v8654_v2, %v7307_v14  ;;  %v3476_v15 = vshrl.u32 %v8624_v63, %v7307_v14  ;;  %v3479_v61 = vshrl.u32 %v8625_v42, %v7307_v14  ;;  %v3482_v6 = vshrl.u32 %v8626_v32, %v7307_v14 }
 0x448   : > { %8751 = vst [vmem:[#allocation21_spill] sm:$0xff] %v7334_v44  ;;  %v3488_v36 = vshrl.u32 %v8631_v45, %v7307_v14  ;;  %vm3493_vm3 = vcmp.lt.s32.totalorder %v7343_v62, 4  ;;  %vm8599_vm6 = vcmp.lt.s32.totalorder %v7343_v62, 3 }
 0x449   : > { %8752 = vst [vmem:[#allocation13_spill] sm:$0xff] %v7338_v17  ;;  %v7369_v60 = vor.u32 %v3476_v15, %v3475_v40 }
 0x44a   : > { %8753 = vst [vmem:[#allocation11_spill] sm:$0xff] %v7341_v7 }
 0x44b   : > { %8754 = vst [vmem:[#allocation19_spill] sm:$0xff] %v7343_v62 }
 0x44c   : > { %v3136_v22 = vpop.f32.mrf.mxu1  ;;  %8758 = vst [vmem:[#allocation28_spill] sm:$0xff] %v7369_v60 }
 0x44d   : > { %v7262_v47 = vadd.f32 %v3136_v22, %v3061_v26  ;;  %v7321_v26 = vsel %vm8594_vm10, %v7292_v8, %v7294_v43  ;;  %v7349_v22 = vshrl.u32 %v7301_v3, 16 }
 0x44e   : > { %8748 = vst [vmem:[#allocation23_spill] sm:$0xff] %v7321_v26 }
 0x44f   : > { %8737 = vst [vmem:[#allocation6_spill] sm:$0xff] %v7262_v47  ;;  %v3306_v13 = vand.u32 2139095040, %v7262_v47  ;;  %v8525_v19 = vand.u32 2147483647, %v7262_v47 }
 0x450   : > { %8755 = vst [vmem:[#allocation9_spill] sm:$0xff] %v7349_v22 }
 0x451   : > { %v3307_v0 = vshrl.u32 %v3306_v13, 23  ;;  %v3310_v34 = vand.u32 8388607, %v8525_v19  ;;  %v3484_v13 = vshll.u32 %v8626_v32, %v3472_v38  ;;  %v7377_v38 = vor.u32 %v3479_v61, %v3478_v23 }
 0x453   : > { %v4624_v12 = vadd.s32 4294967169, %v3307_v0  ;;  %v3311_v16 = vor.u32 8388608, %v3310_v34  ;;  %8760 = vst [vmem:[#allocation30_spill] sm:$0xff] %v7377_v38  ;;  %v7379_v34 = vor.u32 %v3482_v6, %v3481_v52 }
 0x454   : > { %v3139_v29 = vpop.f32.mrf.mxu1 }
 0x455   : > { %v3313_v37 = vadd.s32 1, %v4624_v12  ;;  %v7323_v5 = vadd.f32 %v3139_v29, %v3066_v54  ;;  %v3071_v54 = vpop.permute.xlu0 %3070  ;;  %v7356_v51 = vshll.u32 %v3311_v16, 8  ;;  %v3486_v12 = vor.u32 %v3485_v48, %v3484_v13  ;;  %8761 = vst [vmem:[#allocation31_spill] sm:$0xff] %v7379_v34 }
 0x456   : > { %v7354_v0 = vadd.f32 %v3113_v28, %v3071_v54  ;;  %v3489_v28 = vor.u32 %v3488_v36, %v3487_v53 }
 0x457   : > { %vm3314_vm14 = vcmp.gt.s32.totalorder %v3313_v37, 0  ;;  %8749 = vst [vmem:[#allocation24_spill] sm:$0xff] %v7323_v5  ;;  %v3616_v10 = vand.u32 2139095040, %v7323_v5  ;;  %v8527_v18 = vand.u32 2147483647, %v7323_v5  ;;  %v7375_v58 = vand.u32 65535, %v7356_v51 }
 0x458   : > { %v3315_v11 = vsel %vm3314_vm14, %v3313_v37, 0  ;;  %8756 = vst [vmem:[#allocation7_spill] sm:$0xff] %v7354_v0  ;;  %v8529_v25 = vand.u32 2147483647, %v7354_v0  ;;  %v3771_v1 = vand.u32 2139095040, %v7354_v0  ;;  %v7382_v29 = vshrl.u32 %v7356_v51, 16 }
 0x459   : > { %8757 = vst [vmem:[#allocation27_spill] sm:$0xff] %v7356_v51  ;;  %v3317_v55 = vand.u32 31, %v3315_v11  ;;  %v3617_v33 = vshrl.u32 %v3616_v10, 23  ;;  %v3499_v40 = vsel %vm3493_vm3, %v3486_v12, 920167782  ;;  %v7396_v6 = vshrl.u32 %v3315_v11, 5 }
 0x45a   : > { %8759 = vst [vmem:[#allocation29_spill] sm:$0xff] %v7375_v58  ;;  %v3772_v4 = vshrl.u32 %v3771_v1, 23  ;;  %v3620_v15 = vand.u32 8388607, %v8527_v18  ;;  %v3775_v61 = vand.u32 8388607, %v8529_v25  ;;  %v7408_v10 = vsel %vm3490_vm2, %v7377_v38, %v7379_v34 }
 0x45b   : > { %v4630_v37 = vadd.s32 4294967169, %v3617_v33  ;;  %8762 = vst [vmem:[#allocation32_spill] sm:$0xff] %v7382_v29  ;;  %v7387_v16 = vsub.s32 32, %v3317_v55  ;;  %v7413_v23 = vsel %vm8599_vm6, %v7379_v34, %v3499_v40  ;;  %v3503_v1 = vsel %vm3493_vm3, %v3489_v28, 1326507024 }
 0x45c   : > { %v3142_v41 = vpop.f32.mrf.mxu1  ;;  %v4633_v13 = vadd.s32 4294967169, %v3772_v4  ;;  %8765 = vst [vmem:[#allocation35_spill] sm:$0xff] %v7396_v6  ;;  %v3621_v40 = vor.u32 8388608, %v3620_v15  ;;  %v3323_v19 = vshll.u32 %v8624_v63, %v3317_v55  ;;  %v3329_v30 = vshll.u32 %v8626_v32, %v3317_v55 }
 0x45d   : > { %v7385_v39 = vadd.f32 %v3142_v41, %v3071_v54  ;;  %8764 = vst [vmem:[#allocation34_spill] sm:$0xff] %v7387_v16  ;;  %v3623_v48 = vadd.s32 1, %v4630_v37  ;;  %v7402_v54 = vsel %vm3490_vm2, %v7369_v60, %v7377_v38  ;;  %v3321_v36 = vshrl.u32 %v8624_v63, %v7387_v16 }
 0x45e   : > { %8766 = vst [vmem:[#allocation36_spill] sm:$0xff] %v7402_v54  ;;  %v3778_v52 = vadd.s32 1, %v4633_v13  ;;  %v3324_v33 = vshrl.u32 %v8625_v42, %v7387_v16  ;;  %v3330_v41 = vshrl.u32 %v8654_v2, %v7387_v16  ;;  %v3320_v37 = vshll.u32 %v8623_v50, %v3317_v55  ;;  %v3116_v13 = vpop.f32.mrf.mxu0 }
 0x45f   : > { %8763 = vst [vmem:[#allocation33_spill] sm:$0xff] %v7385_v39  ;;  %vm3624_vm13 = vcmp.gt.s32.totalorder %v3623_v48, 0  ;;  %v3926_v53 = vand.u32 2139095040, %v7385_v39  ;;  %v3327_v4 = vshrl.u32 %v8626_v32, %v7387_v16  ;;  %v3326_v59 = vshll.u32 %v8625_v42, %v3317_v55 }
 0x460   : > { %8767 = vst [vmem:[#allocation37_spill] sm:$0xff] %v7408_v10  ;;  %v3625_v11 = vsel %vm3624_vm13, %v3623_v48, 0  ;;  %v3776_v48 = vor.u32 8388608, %v3775_v61  ;;  %vm3779_vm4 = vcmp.gt.s32.totalorder %v3778_v52, 0  ;;  %v7432_v25 = vshrl.u32 %v8631_v45, %v7387_v16 }
 0x461   : > { %8768 = vst [vmem:[#allocation38_spill] sm:$0xff] %v7413_v23  ;;  %v3627_v18 = vand.u32 31, %v3625_v11  ;;  %v8541_v28 = vand.u32 2147483647, %v7385_v39  ;;  %v3927_v47 = vshrl.u32 %v3926_v53, 23  ;;  %v7435_v31 = vor.u32 %v3321_v36, %v3320_v37 }
 0x462   : > { %8769 = vst [vmem:[#allocation39_spill] sm:$0xff] %v7432_v25  ;;  %v7437_v15 = vor.u32 %v3324_v33, %v3323_v19  ;;  %v7439_v61 = vor.u32 %v3330_v41, %v3329_v30  ;;  %v7442_v51 = vadd.f32 %v3116_v13, %v7253_v24  ;;  %v7444_v29 = vor.u32 %v3327_v4, %v3326_v59 }
 0x463   : > { %8770 = vst [vmem:[#allocation40_spill] sm:$0xff] %v7435_v31  ;;  %v7446_v58 = vshll.u32 %v3621_v40, 8  ;;  %v3780_v9 = vsel %vm3779_vm4, %v3778_v52, 0  ;;  %v7448_v5 = vshll.u32 %v3776_v48, 8  ;;  %v7451_v16 = vshll.u32 %v8654_v2, %v3317_v55 }
 0x464   : > { %8771 = vst [vmem:[#allocation41_spill] sm:$0xff] %v7437_v15  ;;  %vm8580_vm7 = vcmp.lt.s32.totalorder %v7396_v6, 1  ;;  %vm8597_vm11 = vcmp.lt.s32.totalorder %v7396_v6, 4  ;;  %v7455_v19 = vsub.s32 32, %v3627_v18  ;;  %v7459_v30 = vsel %vm8599_vm6, %v3486_v12, %v3503_v1 }
 0x465   : > { %8772 = vst [vmem:[#allocation42_spill] sm:$0xff] %v7439_v61  ;;  %v3782_v59 = vand.u32 31, %v3780_v9  ;;  %v4636_v53 = vadd.s32 4294967169, %v3927_v47  ;;  %v3930_v52 = vand.u32 8388607, %v8541_v28  ;;  %v7469_v55 = vsel %vm8580_vm7, %v7435_v31, %v7437_v15 }
 0x466   : > { %8773 = vst [vmem:[#allocation43_spill] sm:$0xff] %v7444_v29  ;;  %v7474_v33 = vsel %vm8597_vm11, %v7439_v61, 920167782  ;;  %v7481_v47 = vsel %vm8580_vm7, %v7437_v15, %v7444_v29  ;;  %v7484_v41 = vand.u32 65535, %v7446_v58  ;;  %v7487_v1 = vand.u32 65535, %v7448_v5 }
 0x467   : > { %8774 = vst [vmem:[#allocation44_spill] sm:$0xff] %v7446_v58  ;;  %v7490_v37 = vshrl.u32 %v7448_v5, 16  ;;  %v7492_v4 = vshrl.u32 %v3625_v11, 5  ;;  %v3631_v40 = vshrl.u32 %v8624_v63, %v7455_v19  ;;  %v3634_v48 = vshrl.u32 %v8625_v42, %v7455_v19 }
 0x468   : > { %8775 = vst [vmem:[#allocation45_spill] sm:$0xff] %v7451_v16  ;;  %v7498_v13 = vsub.s32 32, %v3782_v59  ;;  %v3637_v36 = vshrl.u32 %v8626_v32, %v7455_v19  ;;  %v3640_v28 = vshrl.u32 %v8654_v2, %v7455_v19  ;;  %v3931_v12 = vor.u32 8388608, %v3930_v52 }
 0x469   : > { %8776 = vst [vmem:[#allocation46_spill] sm:$0xff] %v7455_v19  ;;  %v3933_v15 = vadd.s32 1, %v4636_v53  ;;  %v3630_v31 = vshll.u32 %v8623_v50, %v3627_v18  ;;  %v3633_v11 = vshll.u32 %v8624_v63, %v3627_v18  ;;  %v3636_v8 = vshll.u32 %v8625_v42, %v3627_v18 }
 0x46a   : > { %8777 = vst [vmem:[#allocation47_spill] sm:$0xff] %v7459_v30  ;;  %v3639_v27 = vshll.u32 %v8626_v32, %v3627_v18  ;;  %v7514_v20 = vshll.u32 %v8654_v2, %v3627_v18  ;;  %v7518_v53 = vshrl.u32 %v8631_v45, %v7455_v19  ;;  %vm3648_vm5 = vcmp.lt.s32.totalorder %v7492_v4, 4 }
 0x46b   : > { %8778 = vst [vmem:[#allocation48_spill] sm:$0xff] %v7469_v55  ;;  %v8783_v55 = vand.u32 2147483647, %v7442_v51  ;;  %v7520_v52 = vor.u32 %v3631_v40, %v3630_v31  ;;  %v7522_v61 = vor.u32 %v3634_v48, %v3633_v11  ;;  %v7527_v26 = vor.u32 %v3637_v36, %v3636_v8 }
 0x46c   : > { %8779 = vst [vmem:[#allocation49_spill] sm:$0xff] %v7474_v33  ;;  %v7529_v46 = vor.u32 %v3640_v28, %v3639_v27  ;;  %v3798_v18 = vshrl.u32 %v8631_v45, %v7498_v13  ;;  %vm3934_vm15 = vcmp.gt.s32.totalorder %v3933_v15, 0  ;;  %v3786_v49 = vshrl.u32 %v8624_v63, %v7498_v13 }
 0x46d   : > { %8780 = vst [vmem:[#allocation50_spill] sm:$0xff] %v7481_v47  ;;  %v4081_v47 = vand.u32 2139095040, %v7442_v51  ;;  %v7509_v43 = vand.u32 8388607, %v8783_v55  ;;  %v3795_v55 = vshrl.u32 %v8654_v2, %v7498_v13  ;;  %v3789_v31 = vshrl.u32 %v8625_v42, %v7498_v13 }
 0x46e   : > { %8781 = vst [vmem:[#allocation51_spill] sm:$0xff] %v7484_v41  ;;  %v3792_v40 = vshrl.u32 %v8626_v32, %v7498_v13  ;;  %v3794_v48 = vshll.u32 %v8626_v32, %v3782_v59  ;;  %v7540_v11 = vshrl.u32 %v3780_v9, 5  ;;  %v3785_v8 = vshll.u32 %v8623_v50, %v3782_v59 }
 0x46f   : > { %8782 = vst [vmem:[#allocation52_spill] sm:$0xff] %v7492_v4  ;;  %v3797_v27 = vshll.u32 %v8654_v2, %v3782_v59  ;;  %v4082_v28 = vshrl.u32 %v4081_v47, 23  ;;  %v3788_v36 = vshll.u32 %v8624_v63, %v3782_v59  ;;  %v3791_v21 = vshll.u32 %v8625_v42, %v3782_v59 }
 0x470   : > { %8784 = vst [vmem:[#allocation53_spill] sm:$0xff] %v7514_v20  ;;  %v3796_v44 = vor.u32 %v3795_v55, %v3794_v48  ;;  %v3935_v17 = vsel %vm3934_vm15, %v3933_v15, 0  ;;  %vm8598_vm9 = vcmp.lt.s32.totalorder %v7492_v4, 1  ;;  %vm3647_vm14 = vcmp.lt.s32.totalorder %v7492_v4, 3  ;;  %v3145_v48 = vpop.f32.mrf.mxu1 }
 0x471   : > { %8785 = vst [vmem:[#allocation54_spill] sm:$0xff] %v7518_v53  ;;  %v3654_v9 = vsel %vm3648_vm5, %v7529_v46, 920167782  ;;  %v3799_v57 = vor.u32 %v3798_v18, %v3797_v27  ;;  %v7551_v16 = vor.u32 %v3786_v49, %v3785_v8  ;;  %v7553_v25 = vor.u32 %v3789_v31, %v3788_v36 }
 0x472   : > { %8786 = vst [vmem:[#allocation55_spill] sm:$0xff] %v7520_v52  ;;  %v7555_v47 = vor.u32 %v3792_v40, %v3791_v21  ;;  %v7557_v56 = vshll.u32 %v3931_v12, 8  ;;  %vm3803_vm13 = vcmp.lt.s32.totalorder %v7540_v11, 4  ;;  %v3937_v59 = vand.u32 31, %v3935_v17 }
 0x473   : > { %8787 = vst [vmem:[#allocation56_spill] sm:$0xff] %v7522_v61  ;;  %v4639_v55 = vadd.s32 4294967169, %v4082_v28  ;;  %v7566_v49 = vsel %vm8598_vm9, %v7520_v52, %v7522_v61  ;;  %v7571_v21 = vsel %vm3647_vm14, %v7527_v26, %v3654_v9  ;;  %v7577_v12 = vsel %vm8598_vm9, %v7522_v61, %v7527_v26 }
 0x474   : > { %8788 = vst [vmem:[#allocation57_spill] sm:$0xff] %v7527_v26  ;;  %v3809_v18 = vsel %vm3803_vm13, %v3796_v44, 920167782  ;;  %vm3800_vm4 = vcmp.lt.s32.totalorder %v7540_v11, 1  ;;  %vm3802_vm15 = vcmp.lt.s32.totalorder %v7540_v11, 3  ;;  %v7598_v28 = vand.u32 65535, %v7557_v56 }
 0x475   : > { %8789 = vst [vmem:[#allocation58_spill] sm:$0xff] %v7529_v46  ;;  %v3813_v31 = vsel %vm3803_vm13, %v3799_v57, 1326507024  ;;  %v4088_v40 = vadd.s32 1, %v4639_v55  ;;  %v7589_v8 = vsel %vm3800_vm4, %v7551_v16, %v7553_v25  ;;  %v7595_v27 = vsel %vm3800_vm4, %v7553_v25, %v7555_v47 }
 0x476   : > { %8790 = vst [vmem:[#allocation59_spill] sm:$0xff] %v7557_v56  ;;  %v7601_v36 = vadd.f32 %v3145_v48, %v7253_v24  ;;  %v7606_v57 = vsel %vm3802_vm15, %v7555_v47, %v3809_v18  ;;  %v7608_v9 = vsub.s32 32, %v3937_v59  ;;  %v4086_v55 = vor.u32 8388608, %v7509_v43 }
 0x477   : > { %8791 = vst [vmem:[#allocation60_spill] sm:$0xff] %v7566_v49  ;;  %vm4089_vm0 = vcmp.gt.s32.totalorder %v4088_v40, 0  ;;  %v7613_v15 = vsel %vm3802_vm15, %v3796_v44, %v3813_v31  ;;  %v7615_v61 = vshrl.u32 %v3935_v17, 5  ;;  %v3940_v48 = vshll.u32 %v8623_v50, %v3937_v59 }
 0x478   : > { %8792 = vst [vmem:[#allocation61_spill] sm:$0xff] %v7571_v21  ;;  %v4090_v52 = vsel %vm4089_vm0, %v4088_v40, 0  ;;  %v7620_v26 = vshll.u32 %v8624_v63, %v3937_v59  ;;  %v7623_v18 = vshrl.u32 %v7557_v56, 16  ;;  %v7626_v43 = vshll.u32 %v8625_v42, %v3937_v59 }
 0x479   : > { %8793 = vst [vmem:[#allocation62_spill] sm:$0xff] %v7577_v12  ;;  %v4092_v19 = vand.u32 31, %v4090_v52  ;;  %v7629_v44 = vshll.u32 %v8626_v32, %v3937_v59  ;;  %v7632_v17 = vshll.u32 %v8654_v2, %v3937_v59  ;;  %v4091_v31 = vshrl.u32 %v4090_v52, 5 }
 0x47a   : > { %8794 = vst [vmem:[#allocation63_spill] sm:$0xff] %v7598_v28  ;;  %v3941_v40 = vshrl.u32 %v8624_v63, %v7608_v9  ;;  %v7636_v41 = vshll.u32 %v4086_v55, 8  ;;  %v4236_v29 = vand.u32 2139095040, %v7601_v36  ;;  %v8797_v3 = vand.u32 2147483647, %v7601_v36 }
 0x47b   : > { %8795 = vst [vmem:[#allocation64_spill] sm:$0xff] %v7608_v9  ;;  %v4093_v24 = vsub.s32 32, %v4092_v19  ;;  %v4095_v33 = vshll.u32 %v8623_v50, %v4092_v19  ;;  %v4098_v58 = vshll.u32 %v8624_v63, %v4092_v19  ;;  %v4101_v12 = vshll.u32 %v8625_v42, %v4092_v19 }
 0x47c   : > { %8796 = vst [vmem:[#allocation65_spill] sm:$0xff] %v7623_v18  ;;  %v4240_v49 = vand.u32 8388607, %v8797_v3  ;;  %v4104_v55 = vshll.u32 %v8626_v32, %v4092_v19  ;;  %v4107_v38 = vshll.u32 %v8654_v2, %v4092_v19  ;;  %vm4110_vm0 = vcmp.lt.s32.totalorder %v4091_v31, 1 }
 0x47d   : > { %v4096_v59 = vshrl.u32 %v8624_v63, %v4093_v24  ;;  %v4099_v52 = vshrl.u32 %v8625_v42, %v4093_v24  ;;  %v4102_v21 = vshrl.u32 %v8626_v32, %v4093_v24  ;;  %v4105_v6 = vshrl.u32 %v8654_v2, %v4093_v24 }
 0x47e   : > { %v4108_v39 = vshrl.u32 %v8631_v45, %v4093_v24  ;;  %v4237_v46 = vshrl.u32 %v4236_v29, 23  ;;  %v4094_v3 = vshrl.u32 %v8623_v50, %v4093_v24  ;;  %vm4113_vm8 = vcmp.lt.s32.totalorder %v4091_v31, 4 }
 0x47f   : > { %v4097_v60 = vor.u32 %v4096_v59, %v4095_v33  ;;  %v4100_v34 = vor.u32 %v4099_v52, %v4098_v58  ;;  %v4103_v14 = vor.u32 %v4102_v21, %v4101_v12  ;;  %v4106_v22 = vor.u32 %v4105_v6, %v4104_v55 }
 0x480   : > { %v4109_v7 = vor.u32 %v4108_v39, %v4107_v38  ;;  %vm4112_vm7 = vcmp.lt.s32.totalorder %v4091_v31, 3  ;;  %v4642_v10 = vadd.s32 4294967169, %v4237_v46  ;;  %v4241_v30 = vor.u32 8388608, %v4240_v49 }
 0x481   : > { %v4115_v56 = vsel %vm4113_vm8, %v4103_v14, 2102212464  ;;  %v4118_v4 = vsel %vm4110_vm0, %v4097_v60, %v4100_v34  ;;  %v4122_v20 = vsel %vm4110_vm0, %v4100_v34, %v4103_v14  ;;  %v4119_v53 = vsel %vm4113_vm8, %v4106_v22, 920167782 }
 0x482   : > { %v4123_v19 = vsel %vm4113_vm8, %v4109_v7, 1326507024  ;;  %vm4111_vm1 = vcmp.lt.s32.totalorder %v4091_v31, 2  ;;  %v4114_v58 = vsel %vm4110_vm0, %v4094_v3, %v4097_v60  ;;  %v4120_v33 = vsel %vm4112_vm7, %v4103_v14, %v4119_v53 }
 0x483   : > { %v4124_v29 = vsel %vm4112_vm7, %v4106_v22, %v4123_v19  ;;  %v4116_v21 = vsel %vm4112_vm7, %v4100_v34, %v4115_v56  ;;  %v7656_v6 = vsel %vm4111_vm1, %v4118_v4, %v4120_v33  ;;  %v4243_v39 = vadd.s32 1, %v4642_v10 }
 0x484   : > { %v4125_v38 = vsel %vm4111_vm1, %v4122_v20, %v4124_v29  ;;  %v3944_v12 = vshrl.u32 %v8625_v42, %v7608_v9  ;;  %v4127_v24 = vand.u32 65535, %v7636_v41  ;;  %v7664_v49 = vshrl.u32 %v8626_v32, %v7608_v9 }
 0x485   : > { %v4129_v7 = vand.u32 65535, %v4125_v38  ;;  %v4130_v46 = vshrl.u32 %v4125_v38, 16  ;;  %v4128_v14 = vshrl.u32 %v7636_v41, 16  ;;  %vm4244_vm8 = vcmp.gt.s32.totalorder %v4243_v39, 0 }
 0x486   : > { %v7667_v56 = vshll.u32 %v4241_v30, 8  ;;  %v7670_v22 = vsel %vm4111_vm1, %v4114_v58, %v4116_v21  ;;  %v4151_v60 = vand.u32 65535, %v7656_v6  ;;  %v4152_v34 = vshrl.u32 %v7656_v6, 16 }
 0x487   : > { %v7672_v20 = vmul.u32 %v4130_v46, %v4127_v24  ;;  %v7676_v10 = vor.u32 %v3941_v40, %v3940_v48  ;;  %v7680_v4 = vshrl.u32 %v8654_v2, %v7608_v9  ;;  %v7684_v53 = vshrl.u32 %v8631_v45, %v7608_v9 }
 0x488   : > { %v7686_v30 = vmul.u32 %v4129_v7, %v4128_v14  ;;  %v7689_v31 = vor.u32 %v3944_v12, %v7620_v26  ;;  %v4131_v59 = vmul.u32 %v4129_v7, %v4127_v24  ;;  %v4245_v55 = vsel %vm4244_vm8, %v4243_v39, 0 }
 0x489   : > { %8798 = vst [vmem:[#allocation66_spill] sm:$0xff] %v7676_v10  ;;  %v4135_v52 = vshll.u32 %v7672_v20, 16  ;;  %v4247_v40 = vand.u32 31, %v4245_v55  ;;  %v7695_v3 = vand.u32 65535, %v7667_v56  ;;  %v7698_v19 = vshrl.u32 %v7667_v56, 16 }
 0x48a   : > { %v4134_v58 = vmul.u32 %v4130_v46, %v4128_v14  ;;  %v4153_v33 = vmul.u32 %v4151_v60, %v4127_v24  ;;  %v7700_v29 = vmul.u32 %v4152_v34, %v4127_v24  ;;  %v4137_v26 = vshll.u32 %v7686_v30, 16 }
 0x48b   : > { %vm4139_vm1 = vc.u32 %v4131_v59, %v4135_v52  ;;  %v7703_v21 = vmul.u32 %v4151_v60, %v4128_v14  ;;  %v7705_v6 = vshrl.u32 %v4245_v55, 5  ;;  %v4248_v38 = vsub.s32 32, %v4247_v40 }
 0x48c   : > { %v4140_v39 = vsel %vm4139_vm1, 1, %v8622_v35  ;;  %v4141_v12 = vadd.s32 %v4135_v52, %v4131_v59  ;;  %v4250_v7 = vshll.u32 %v8623_v50, %v4247_v40  ;;  %v4253_v48 = vshll.u32 %v8624_v63, %v4247_v40 }
 0x48d   : > { %v4251_v46 = vshrl.u32 %v8624_v63, %v4248_v38  ;;  %v4254_v54 = vshrl.u32 %v8625_v42, %v4248_v38  ;;  %v4256_v24 = vshll.u32 %v8625_v42, %v4247_v40  ;;  %v4257_v23 = vshrl.u32 %v8626_v32, %v4248_v38 }
 0x48e   : > { %v4259_v60 = vshll.u32 %v8626_v32, %v4247_v40  ;;  %v4260_v55 = vshrl.u32 %v8654_v2, %v4248_v38  ;;  %v4262_v62 = vshll.u32 %v8654_v2, %v4247_v40  ;;  %v4263_v59 = vshrl.u32 %v8631_v45, %v4248_v38 }
 0x48f   : > { %v4142_v52 = vadd.s32 %v4140_v39, %v4134_v58  ;;  %v4252_v0 = vor.u32 %v4251_v46, %v4250_v7  ;;  %v7718_v9 = vor.u32 %v4254_v54, %v4253_v48  ;;  %v4258_v18 = vor.u32 %v4257_v23, %v4256_v24 }
 0x490   : > { %v4261_v63 = vor.u32 %v4260_v55, %v4259_v60  ;;  %v4264_v28 = vor.u32 %v4263_v59, %v4262_v62  ;;  %vm4265_vm7 = vcmp.lt.s32.totalorder %v7705_v6, 1  ;;  %vm4143_vm0 = vc.u32 %v4141_v12, %v4137_v26 }
 0x491   : > { %vm4268_vm8 = vcmp.lt.s32.totalorder %v7705_v6, 4  ;;  %v4273_v42 = vsel %vm4265_vm7, %v4252_v0, %v7718_v9  ;;  %v4277_v32 = vsel %vm4265_vm7, %v7718_v9, %v4258_v18  ;;  %v4157_v45 = vshll.u32 %v7700_v29, 16 }
 0x492   : > { %vm4267_vm1 = vcmp.lt.s32.totalorder %v7705_v6, 3  ;;  %v4274_v2 = vsel %vm4268_vm8, %v4261_v63, 920167782  ;;  %v4278_v62 = vsel %vm4268_vm8, %v4264_v28, 1326507024  ;;  %v4144_v54 = vsel %vm4143_vm0, 1, %v8622_v35 }
 0x493   : > { %v4156_v23 = vmul.u32 %v4152_v34, %v4128_v14  ;;  %vm4266_vm10 = vcmp.lt.s32.totalorder %v7705_v6, 2  ;;  %v4275_v48 = vsel %vm4267_vm1, %v4258_v18, %v4274_v2  ;;  %v4279_v40 = vsel %vm4267_vm1, %v4261_v63, %v4278_v62 }
 0x494   : > { %v4276_v58 = vsel %vm4266_vm10, %v4273_v42, %v4275_v48  ;;  %v4280_v26 = vsel %vm4266_vm10, %v4277_v32, %v4279_v40  ;;  %v4136_v39 = vshrl.u32 %v7672_v20, 16  ;;  %v4146_v28 = vadd.s32 %v4144_v54, %v4142_v52 }
 0x495   : > { %v4284_v12 = vand.u32 65535, %v4280_v26  ;;  %v4285_v7 = vshrl.u32 %v4280_v26, 16  ;;  %v4307_v14 = vshrl.u32 %v4276_v58, 16  ;;  %v4138_v34 = vshrl.u32 %v7686_v30, 16 }
 0x496   : > { %v4249_v46 = vshrl.u32 %v8623_v50, %v4248_v38  ;;  %v4306_v24 = vand.u32 65535, %v4276_v58  ;;  %vm4161_vm0 = vc.u32 %v4153_v33, %v4157_v45  ;;  %v4163_v60 = vadd.s32 %v4157_v45, %v4153_v33 }
 0x497   : > { %v4287_v55 = vmul.u32 %v4285_v7, %v7695_v3  ;;  %v4288_v59 = vmul.u32 %v4284_v12, %v7698_v19  ;;  %v4158_v63 = vshrl.u32 %v7700_v29, 16  ;;  %v4159_v42 = vshll.u32 %v7703_v21, 16 }
 0x498   : > { %v4269_v20 = vsel %vm4265_vm7, %v4249_v46, %v4252_v0  ;;  %v4270_v52 = vsel %vm4268_vm8, %v4258_v18, 2102212464  ;;  %v4147_v30 = vadd.s32 %v4146_v28, %v4136_v39  ;;  %v4160_v38 = vshrl.u32 %v7703_v21, 16 }
 0x499   : > { %vm3801_vm12 = vcmp.lt.s32.totalorder %v7540_v11, 2  ;;  %v4286_v33 = vmul.u32 %v4284_v12, %v7695_v3  ;;  %v4290_v32 = vshll.u32 %v4287_v55, 16  ;;  %v4309_v45 = vmul.u32 %v4307_v14, %v7695_v3 }
 0x49a   : > { %v4162_v29 = vsel %vm4161_vm0, 1, %v8622_v35  ;;  %v4289_v2 = vmul.u32 %v4285_v7, %v7698_v19  ;;  %v4310_v62 = vmul.u32 %v4306_v24, %v7698_v19  ;;  %vm4165_vm7 = vc.u32 %v4163_v60, %v4159_v42 }
 0x49b   : > { %v4164_v0 = vadd.s32 %v4162_v29, %v4156_v23  ;;  %v4292_v54 = vshll.u32 %v4288_v59, 16  ;;  %vm4294_vm8 = vc.u32 %v4286_v33, %v4290_v32  ;;  %v4296_v18 = vadd.s32 %v4290_v32, %v4286_v33 }
 0x49c   : > { %v4166_v21 = vsel %vm4165_vm7, 1, %v8622_v35  ;;  %v4295_v48 = vsel %vm4294_vm8, 1, %v8622_v35  ;;  %v4308_v40 = vmul.u32 %v4306_v24, %v7695_v3  ;;  %v7765_v58 = vadd.s32 %v4147_v30, %v4138_v34 }
 0x49d   : > { %v4168_v26 = vadd.s32 %v4166_v21, %v4164_v0  ;;  %v4297_v39 = vadd.s32 %v4295_v48, %v4289_v2  ;;  %v4311_v28 = vmul.u32 %v4307_v14, %v7698_v19  ;;  %vm4298_vm0 = vc.u32 %v4296_v18, %v4292_v54 }
 0x49e   : > { %v4312_v12 = vshll.u32 %v4309_v45, 16  ;;  %v7768_v7 = vadd.s32 %v4163_v60, %v4159_v42  ;;  %v4291_v46 = vshrl.u32 %v4287_v55, 16  ;;  %v4299_v33 = vsel %vm4298_vm0, 1, %v8622_v35 }
 0x49f   : > { %v4169_v23 = vadd.s32 %v4168_v26, %v4158_v63  ;;  %v4301_v32 = vadd.s32 %v4299_v33, %v4297_v39  ;;  %v4314_v29 = vshll.u32 %v4310_v62, 16  ;;  %v4271_v3 = vsel %vm4267_vm1, %v7718_v9, %v4270_v52 }
 0x4a0   : > { %vm4316_vm7 = vc.u32 %v4308_v40, %v4312_v12  ;;  %v4318_v10 = vadd.s32 %v4312_v12, %v4308_v40  ;;  %vm4173_vm8 = vc.u32 %v7765_v58, %v7768_v7  ;;  %v3811_v60 = vsel %vm3801_vm12, %v7589_v8, %v7606_v57 }
 0x4a1   : > { %v4170_v34 = vadd.s32 %v4169_v23, %v4160_v38  ;;  %v4317_v19 = vsel %vm4316_vm7, 1, %v8622_v35  ;;  %v4302_v14 = vadd.s32 %v4301_v32, %v4291_v46  ;;  %vm3958_vm0 = vcmp.lt.s32.totalorder %v7615_v61, 4 }
 0x4a2   : > { %v4319_v24 = vadd.s32 %v4317_v19, %v4311_v28  ;;  %vm4320_vm11 = vc.u32 %v4318_v10, %v4314_v29  ;;  %v4293_v63 = vshrl.u32 %v4288_v59, 16  ;;  %v3815_v42 = vsel %vm3801_vm12, %v7595_v27, %v7613_v15 }
 0x4a3   : > { %v4174_v55 = vadd.s32 1, %v4170_v34  ;;  %v4321_v9 = vsel %vm4320_vm11, 1, %v8622_v35  ;;  %v4313_v52 = vshrl.u32 %v4309_v45, 16  ;;  %v3819_v38 = vand.u32 65535, %v3815_v42 }
 0x4a4   : > { %v4323_v30 = vadd.s32 %v4321_v9, %v4319_v24  ;;  %v3820_v2 = vshrl.u32 %v3815_v42, 16  ;;  %v7789_v0 = vor.u32 %v7664_v49, %v7626_v43  ;;  %v7794_v57 = vadd.s32 %v4302_v14, %v4293_v63 }
 0x4a5   : > { %v4175_v8 = vsel %vm4173_vm8, %v4174_v55, %v4170_v34  ;;  %v3842_v59 = vshrl.u32 %v3811_v60, 16  ;;  %v3951_v54 = vor.u32 %v7680_v4, %v7629_v44  ;;  %vm3955_vm11 = vcmp.lt.s32.totalorder %v7615_v61, 1 }
 0x4a6   : > { %v8799_v15 = vmul.u32 %v7636_v41, %v7670_v22  ;;  %v4315_v45 = vshrl.u32 %v4310_v62, 16  ;;  %v4324_v18 = vadd.s32 %v4323_v30, %v4313_v52  ;;  %v4272_v43 = vsel %vm4266_vm10, %v4269_v20, %v4271_v3 }
 0x4a7   : > { %v7804_v49 = vadd.s32 %v4318_v10, %v4314_v29  ;;  %v3822_v21 = vmul.u32 %v3820_v2, %v7487_v1  ;;  %v7808_v48 = vmul.u32 %v3819_v38, %v7490_v37  ;;  %v3954_v44 = vor.u32 %v7684_v53, %v7632_v17 }
 0x4a8   : > { %v4176_v27 = vadd.s32 %v4175_v8, %v8799_v15  ;;  %vm3957_vm1 = vcmp.lt.s32.totalorder %v7615_v61, 3  ;;  %v4325_v41 = vadd.s32 %v4324_v18, %v4315_v45  ;;  %v7814_v22 = vmul.u32 %v3842_v59, %v7487_v1 }
 0x4a9   : > { %vm4328_vm10 = vc.u32 %v7794_v57, %v7804_v49  ;;  %v3821_v10 = vmul.u32 %v3819_v38, %v7487_v1  ;;  %v3825_v6 = vshll.u32 %v3822_v21, 16  ;;  %v3841_v20 = vand.u32 65535, %v3811_v60 }
 0x4aa   : > { %v4177_v4 = vadd.s32 536870912, %v4176_v27  ;;  %v4326_v62 = vmul.u32 %v7667_v56, %v4272_v43  ;;  %v4329_v26 = vadd.s32 1, %v4325_v41  ;;  %v3824_v17 = vmul.u32 %v3820_v2, %v7490_v37 }
 0x4ab   : > { %v3827_v53 = vshll.u32 %v7808_v48, 16  ;;  %vm3829_vm7 = vc.u32 %v3821_v10, %v3825_v6  ;;  %v3831_v39 = vadd.s32 %v3825_v6, %v3821_v10  ;;  %v3847_v28 = vshll.u32 %v7814_v22, 16 }
 0x4ac   : > { %v7820_v40 = vshrl.u32 %v4177_v4, 30  ;;  %v7827_v12 = vsel %vm3958_vm0, %v3951_v54, 920167782  ;;  %v4330_v46 = vsel %vm4328_vm10, %v4329_v26, %v4325_v41  ;;  %v3830_v56 = vsel %vm3829_vm7, 1, %v8622_v35 }
 0x4ad   : > { %v4331_v33 = vadd.s32 %v4330_v46, %v4326_v62  ;;  %v3832_v32 = vadd.s32 %v3830_v56, %v3824_v17  ;;  %vm3833_vm8 = vc.u32 %v3831_v39, %v3827_v53  ;;  %v3843_v29 = vmul.u32 %v3841_v20, %v7487_v1 }
 0x4ae   : > { %v4179_v23 = vshll.u32 %v7820_v40, 30  ;;  %v3968_v3 = vsel %vm3958_vm0, %v3954_v44, 1326507024  ;;  %v3834_v19 = vsel %vm3833_vm8, 1, %v8622_v35  ;;  %v3845_v14 = vmul.u32 %v3841_v20, %v7490_v37 }
 0x4af   : > { %v7840_v24 = vsel %vm3955_vm11, %v7689_v31, %v7789_v0  ;;  %v4332_v60 = vadd.s32 536870912, %v4331_v33  ;;  %v3846_v55 = vmul.u32 %v3842_v59, %v7490_v37  ;;  %vm3851_vm10 = vc.u32 %v3843_v29, %v3847_v28 }
 0x4b0   : > { %v4180_v34 = vsub.s32 %v4176_v27, %v4179_v23  ;;  %vm4080_vm7 = vcmp.lt.s32.totalorder %v7442_v51, 0  ;;  %v3836_v63 = vadd.s32 %v3834_v19, %v3832_v32  ;;  %v3852_v9 = vsel %vm3851_vm10, 1, %v8622_v35 }
 0x4b1   : > { %v3969_v42 = vsel %vm3957_vm1, %v3951_v54, %v3968_v3  ;;  %v4333_v52 = vshrl.u32 %v4332_v60, 30  ;;  %v3784_v30 = vshrl.u32 %v8623_v50, %v7498_v13  ;;  %v3853_v38 = vadd.s32 %v3847_v28, %v3843_v29 }
 0x4b2   : > { %vm4181_vm9 = vcmp.lt.s32.totalorder %v4180_v34, 0  ;;  %v4182_v1 = vsub.s32 0, %v4180_v34  ;;  %v3826_v8 = vshrl.u32 %v3822_v21, 16  ;;  %v3849_v15 = vshll.u32 %v3845_v14, 16 }
 0x4b3   : > { %v3854_v37 = vadd.s32 %v3852_v9, %v3846_v55  ;;  %vm4235_vm8 = vcmp.lt.s32.totalorder %v7601_v36, 0  ;;  %v8800_v59 = vand.u32 2147483647, %v7442_v51  ;;  %v4334_v18 = vshll.u32 %v4333_v52, 30 }
 0x4b4   : > { %v4183_v2 = vsel %vm4181_vm9, %v4182_v1, %v4180_v34  ;;  %v3805_v54 = vsel %vm3803_vm13, %v7555_v47, 2102212464  ;;  %v4172_v13 = vadd.s32 %v7768_v7, %v7765_v58  ;;  %v3804_v43 = vsel %vm3800_vm4, %v3784_v30, %v7551_v16 }
 0x4b5   : > { %vm7852_vm6 = vcmp.le.f32.partialorder %v8800_v59, 0.7853982  ;;  %v4184_v45 = vclz %v4183_v2  ;;  %v3837_v21 = vadd.s32 %v3836_v63, %v3826_v8  ;;  %vm3855_vm9 = vc.u32 %v3853_v38, %v3849_v15 }
 0x4b6   : > { %v4202_v4 = vsub.s32 4, %v7820_v40  ;;  %v4335_v41 = vsub.s32 %v4331_v33, %v4334_v18  ;;  %v3856_v10 = vsel %vm3855_vm9, 1, %v8622_v35  ;;  %v3806_v6 = vsel %vm3802_vm15, %v7553_v25, %v3805_v54 }
 0x4b7   : > { %v4640_v44 = vadd.s32 4294967294, %v4184_v45  ;;  %v3828_v47 = vshrl.u32 %v7808_v48, 16  ;;  %v3848_v58 = vshrl.u32 %v7814_v22, 16  ;;  %v3858_v7 = vadd.s32 %v3856_v10, %v3854_v37 }
 0x4b8   : > { %vm4336_vm10 = vcmp.lt.s32.totalorder %v4335_v41, 0  ;;  %v4337_v16 = vsub.s32 0, %v4335_v41  ;;  %v3850_v20 = vshrl.u32 %v3845_v14, 16  ;;  %v4357_v26 = vsub.s32 4, %v4333_v52 }
 0x4b9   : > { %vm4641_vm13 = vcmp.lt.s32.totalorder %v4640_v44, 0  ;;  %v3838_v17 = vadd.s32 %v3837_v21, %v3828_v47  ;;  %v3859_v53 = vadd.s32 %v3858_v7, %v3848_v58  ;;  %v4203_v23 = vsel %vm4080_vm7, %v4202_v4, %v7820_v40  ;;  %v8807_v4 = vld [vmem:[#allocation63_spill] sm:$0xff] }
 0x4ba   : > { %v4187_v62 = vsel %vm4641_vm13, 0, %v4640_v44  ;;  %v4338_v25 = vsel %vm4336_vm10, %v4337_v16, %v4335_v41  ;;  %v8803_v48 = vand.u32 2147483647, %v7601_v36  ;;  %v3857_v56 = vadd.s32 %v3853_v38, %v3849_v15 }
 0x4bb   : > { %v4188_v39 = vsub.s32 32, %v4187_v62  ;;  %v4192_v28 = vsub.s32 4294967266, %v4187_v62  ;;  %v4339_v46 = vclz %v4338_v25  ;;  %v3860_v33 = vadd.s32 %v3859_v53, %v3850_v20  ;;  %v8808_v20 = vld [vmem:[#allocation65_spill] sm:$0xff] }
 0x4bc   : > { %vm7876_vm4 = vcmp.le.f32.partialorder %v8803_v48, 0.7853982  ;;  %v4189_v32 = vshll.u32 %v4180_v34, %v4187_v62  ;;  %v3807_v19 = vsel %vm3801_vm12, %v3804_v43, %v3806_v6  ;;  %v4205_v14 = vsel %vm7852_vm6, 0, %v4203_v23 }
 0x4bd   : > { %v4190_v29 = vshrl.u32 %v4172_v13, %v4188_v39  ;;  %v4193_v3 = vadd.s32 127, %v4192_v28  ;;  %v4643_v40 = vadd.s32 4294967294, %v4339_v46  ;;  %v4358_v60 = vsel %vm4235_vm8, %v4357_v26, %v4333_v52  ;;  %v8809_v28 = vld [vmem:[#allocation64_spill] sm:$0xff] }
 0x4be   : > { %vm3863_vm15 = vc.u32 %v3838_v17, %v3857_v56  ;;  %v3864_v63 = vadd.s32 1, %v3860_v33  ;;  %vm3956_vm9 = vcmp.lt.s32.totalorder %v7615_v61, 2  ;;  %v4327_v34 = vadd.s32 %v7804_v49, %v7794_v57  ;;  %v8814_v61 = vld [vmem:[#allocation19_spill] sm:$0xff] }
 0x4bf   : > { %v4191_v55 = vor.u32 %v4190_v29, %v4189_v32  ;;  %v4194_v1 = vshll.u32 %v4193_v3, 23  ;;  %vm4644_vm13 = vcmp.lt.s32.totalorder %v4643_v40, 0  ;;  %v3861_v11 = vmul.u32 %v7448_v5, %v3807_v19 }
 0x4c0   : > { %v3970_v9 = vsel %vm3956_vm9, %v7840_v24, %v3969_v42  ;;  %v4222_v38 = vadd.s32 3, %v4205_v14  ;;  %v4342_v2 = vsel %vm4644_vm13, 0, %v4643_v40  ;;  %v3865_v52 = vsel %vm3863_vm15, %v3864_v63, %v3860_v33  ;;  %v8806_v24 = vld [vmem:[#allocation66_spill] sm:$0xff] }
 0x4c1   : > { %v4195_v30 = vor.u32 4788187, %v4194_v1  ;;  %v4343_v8 = vsub.s32 32, %v4342_v2  ;;  %v4347_v15 = vsub.s32 4294967266, %v4342_v2  ;;  %v4360_v37 = vsel %vm7876_vm4, 0, %v4358_v60 }
 0x4c2   : > { %v3866_v59 = vadd.s32 %v3865_v52, %v3861_v11  ;;  %v4198_v18 = vcvt.s32.f32 %v4191_v55  ;;  %v3974_v57 = vand.u32 65535, %v3970_v9  ;;  %v3975_v49 = vshrl.u32 %v3970_v9, 16 }
 0x4c3   : > { %v4196_v45 = vand.u32 2147483647, %v4195_v30  ;;  %v4344_v54 = vshll.u32 %v4335_v41, %v4342_v2  ;;  %v4345_v5 = vshrl.u32 %v4327_v34, %v4343_v8  ;;  %v4348_v13 = vadd.s32 127, %v4347_v15 }
 0x4c4   : > { %v3867_v43 = vadd.s32 536870912, %v3866_v59  ;;  %v3963_v42 = vsel %vm3955_vm11, %v8806_v24, %v7689_v31  ;;  %v3965_v21 = vsel %vm3957_vm1, %v7789_v0, %v7827_v12  ;;  %v7904_v10 = vmul.u32 %v3975_v49, %v8807_v4 }
 0x4c5   : > { %v4199_v44 = vmul.f32 %v4198_v18, %v4196_v45  ;;  %v4346_v6 = vor.u32 %v4345_v5, %v4344_v54  ;;  %v4349_v47 = vshll.u32 %v4348_v13, 23  ;;  %v4377_v41 = vadd.s32 3, %v4360_v37 }
 0x4c6   : > { %v7906_v58 = vshrl.u32 %v3867_v43, 30  ;;  %v3976_v16 = vmul.u32 %v3974_v57, %v8807_v4  ;;  %v7910_v62 = vmul.u32 %v3974_v57, %v8808_v20  ;;  %v3980_v26 = vshll.u32 %v7904_v10, 16 }
 0x4c7   : > { %v4200_v7 = vxor.u32 2147483648, %v4199_v44  ;;  %v7913_v53 = vand.u32 3, %v4222_v38  ;;  %v4350_v12 = vor.u32 4788187, %v4349_v47  ;;  %v3939_v23 = vshrl.u32 %v8623_v50, %v8809_v28 }
 0x4c8   : > { %v3869_v39 = vshll.u32 %v7906_v58, 30  ;;  %v4353_v48 = vcvt.s32.f32 %v4346_v6  ;;  %v3862_v46 = vadd.s32 %v3857_v56, %v3838_v17  ;;  %v3986_v33 = vadd.s32 %v3980_v26, %v3976_v16 }
 0x4c9   : > { %v4201_v25 = vsel %vm4080_vm7, %v4200_v7, %v4199_v44  ;;  %v4351_v29 = vand.u32 2147483647, %v4350_v12  ;;  %vm3984_vm12 = vc.u32 %v3976_v16, %v3980_v26  ;;  %v7929_v14 = vand.u32 3, %v4377_v41  ;;  %v8810_v16 = vld [vmem:[#allocation7_spill] sm:$0xff] }
 0x4ca   : > { %v7923_v32 = vsel %vm7852_vm6, %v7442_v51, %v4201_v25  ;;  %v7925_v3 = vsub.s32 %v3866_v59, %v3869_v39  ;;  %v7933_v40 = vsel %vm3956_vm9, %v3963_v42, %v3965_v21  ;;  %v3982_v17 = vshll.u32 %v7910_v62, 16 }
 0x4cb   : > { %v4206_v19 = vmul.f32 %v7923_v32, %v7923_v32  ;;  %v4354_v56 = vmul.f32 %v4353_v48, %v4351_v29  ;;  %v7941_v60 = vsel %vm3955_vm11, %v3939_v23, %v8806_v24  ;;  %v3985_v63 = vsel %vm3984_vm12, 1, %v8622_v35 }
 0x4cc   : > { %vm3871_vm7 = vcmp.lt.s32.totalorder %v7925_v3, 0  ;;  %v3872_v27 = vsub.s32 0, %v7925_v3  ;;  %vm3988_vm6 = vc.u32 %v3986_v33, %v3982_v17  ;;  %v3979_v9 = vmul.u32 %v3975_v49, %v8808_v20 }
 0x4cd   : > { %v4207_v55 = vmul.f32 -0.001358992, %v4206_v19  ;;  %v4214_v1 = vmul.f32 -0.00019511016, %v4206_v19  ;;  %v4355_v34 = vxor.u32 2147483648, %v4354_v56  ;;  %v3997_v30 = vshrl.u32 %v7933_v40, 16 }
 0x4ce   : > { %v3873_v11 = vsel %vm3871_vm7, %v3872_v27, %v7925_v3  ;;  %v3960_v8 = vsel %vm3958_vm0, %v7789_v0, 2102212464  ;;  %v3987_v37 = vadd.s32 %v3985_v63, %v3979_v9  ;;  %v3989_v59 = vsel %vm3988_vm6, 1, %v8622_v35 }
 0x4cf   : > { %v4208_v38 = vadd.f32 0.041655596, %v4207_v55  ;;  %v4215_v2 = vadd.f32 0.008332121, %v4214_v1  ;;  %v3874_v52 = vclz %v3873_v11  ;;  %v4356_v15 = vsel %vm4235_vm8, %v4355_v34, %v4354_v56 }
 0x4d0   : > { %v3996_v45 = vand.u32 65535, %v7933_v40  ;;  %v7957_v49 = vsel %vm7876_vm4, %v7601_v36, %v4356_v15  ;;  %v7964_v0 = vsel %vm3957_vm1, %v7689_v31, %v3960_v8  ;;  %v3981_v13 = vshrl.u32 %v7904_v10, 16 }
 0x4d1   : > { %v4209_v18 = vmul.f32 %v4208_v38, %v4206_v19  ;;  %v4216_v57 = vmul.f32 %v4215_v2, %v4206_v19  ;;  %v4634_v54 = vadd.s32 4294967294, %v3874_v52  ;;  %v4361_v5 = vmul.f32 %v7957_v49, %v7957_v49 }
 0x4d2   : > { %v7968_v43 = vmul.u32 %v3997_v30, %v8807_v4  ;;  %v3892_v22 = vsub.s32 4, %v7906_v58  ;;  %vm4225_vm11 = vcmp.eq.s32.totalorder %v7913_v53, 0  ;;  %vm4228_vm8 = vcmp.eq.s32.totalorder %v7913_v53, 2 }
 0x4d3   : > { %v4210_v24 = vadd.f32 -0.4999988, %v4209_v18  ;;  %v4217_v42 = vadd.f32 -0.16666654, %v4216_v57  ;;  %vm4635_vm0 = vcmp.lt.s32.totalorder %v4634_v54, 0  ;;  %v3991_v47 = vadd.s32 %v3989_v59, %v3987_v37 }
 0x4d4   : > { %v4362_v21 = vmul.f32 -0.001358992, %v4361_v5  ;;  %v4369_v44 = vmul.f32 -0.00019511016, %v4361_v5  ;;  %v3877_v6 = vsel %vm4635_vm0, 0, %v4634_v54  ;;  %vm4224_vm1 = vcmp.lt.s32.totalorder %v7913_v53, 2 }
 0x4d5   : > { %v4211_v31 = vmul.f32 %v4210_v24, %v4206_v19  ;;  %v4218_v41 = vmul.f32 %v4217_v42, %v4206_v19  ;;  %v3878_v10 = vsub.s32 32, %v3877_v6  ;;  %v7975_v7 = vmul.u32 %v3996_v45, %v8808_v20 }
 0x4d6   : > { %vm3770_vm10 = vcmp.lt.s32.totalorder %v8810_v16, 0  ;;  %vm4221_vm4 = vweird.f32 %v7442_v51  ;;  %v4363_v26 = vadd.f32 0.041655596, %v4362_v21  ;;  %v4370_v12 = vadd.f32 0.008332121, %v4369_v44 }
 0x4d7   : > { %v3882_v39 = vsub.s32 4294967266, %v3877_v6  ;;  %v4002_v28 = vshll.u32 %v7968_v43, 16  ;;  %v4212_v23 = vadd.f32 1.0, %v4211_v31  ;;  %v4219_v25 = vadd.f32 1.0, %v4218_v41 }
 0x4d8   : > { %v3879_v48 = vshll.u32 %v7925_v3, %v3877_v6  ;;  %v3880_v33 = vshrl.u32 %v3862_v46, %v3878_v10  ;;  %v4364_v29 = vmul.f32 %v4363_v26, %v4361_v5  ;;  %v4371_v19 = vmul.f32 %v4370_v12, %v4361_v5  ;;  %v8816_v12 = vld [vmem:[#allocation36_spill] sm:$0xff] }
 0x4d9   : > { %v3883_v40 = vadd.s32 127, %v3882_v39  ;;  %v3998_v17 = vmul.u32 %v3996_v45, %v8807_v4  ;;  %v4220_v56 = vmul.f32 %v4219_v25, %v7923_v32  ;;  %v4229_v27 = vxor.u32 2147483648, %v4212_v23 }
 0x4da   : > { %v8811_v55 = vand.u32 2147483647, %v8810_v16  ;;  %v3881_v63 = vor.u32 %v3880_v33, %v3879_v48  ;;  %v3992_v34 = vadd.s32 %v3991_v47, %v3981_v13  ;;  %v4365_v11 = vadd.f32 -0.4999988, %v4364_v29 }
 0x4db   : > { %v4372_v9 = vadd.f32 -0.16666654, %v4371_v19  ;;  %vm4383_vm13 = vcmp.eq.s32.totalorder %v7929_v14, 2  ;;  %v3884_v46 = vshll.u32 %v3883_v40, 23  ;;  %vm4006_vm12 = vc.u32 %v3998_v17, %v4002_v28 }
 0x4dc   : > { %vm7985_vm15 = vcmp.le.f32.partialorder %v8811_v55, 0.7853982  ;;  %v4226_v3 = vxor.u32 2147483648, %v4220_v56  ;;  %vm4380_vm7 = vcmp.eq.s32.totalorder %v7929_v14, 0  ;;  %v4001_v4 = vmul.u32 %v3997_v30, %v8808_v20 }
 0x4dd   : > { %v4004_v32 = vshll.u32 %v7975_v7, 16  ;;  %v4007_v38 = vsel %vm4006_vm12, 1, %v8622_v35  ;;  %v4366_v2 = vmul.f32 %v4365_v11, %v4361_v5  ;;  %v4373_v52 = vmul.f32 %v4372_v9, %v4361_v5 }
 0x4de   : > { %vm4379_vm6 = vcmp.lt.s32.totalorder %v7929_v14, 2  ;;  %v3885_v8 = vor.u32 4788187, %v3884_v46  ;;  %v4008_v15 = vadd.s32 %v4002_v28, %v3998_v17  ;;  %v4227_v37 = vsel %vm4225_vm11, %v4212_v23, %v4226_v3  ;;  %v8818_v28 = vld [vmem:[#allocation37_spill] sm:$0xff]  ;;  %v8823_v3 = vld [vmem:[#allocation59_spill] sm:$0xff] }
 0x4df   : > { %v4230_v59 = vsel %vm4228_vm8, %v4229_v27, %v4220_v56  ;;  %vm4376_vm0 = vweird.f32 %v7601_v36  ;;  %v3888_v45 = vcvt.s32.f32 %v3881_v63  ;;  %v4009_v20 = vadd.s32 %v4007_v38, %v4001_v4  ;;  %v8819_v56 = vld [vmem:[#allocation54_spill] sm:$0xff]  ;;  %v8820_v27 = vld [vmem:[#allocation53_spill] sm:$0xff]  ;;  %v8822_v63 = vld [vmem:[#allocation52_spill] sm:$0xff] }
 0x4e0   : > { %v4231_v30 = vsel %vm4224_vm1, %v4227_v37, %v4230_v59  ;;  %v4367_v18 = vadd.f32 1.0, %v4366_v2  ;;  %v4374_v57 = vadd.f32 1.0, %v4373_v52  ;;  %v3886_v54 = vand.u32 2147483647, %v3885_v8  ;;  %v8825_v52 = vld [vmem:[#allocation9_spill] sm:$0xff] }
 0x4e1   : > { %v4232_v5 = vsel %vm4221_vm4, nan, %v4231_v30  ;;  %v3893_v13 = vsel %vm3770_vm10, %v3892_v22, %v7906_v58  ;;  %v3983_v24 = vshrl.u32 %v7910_v62, 16  ;;  %vm4010_vm11 = vc.u32 %v4008_v15, %v4004_v32  ;;  %v8826_v30 = vld [vmem:[#allocation58_spill] sm:$0xff] }
 0x4e2   : > { %4410 = vmatpush.msra.mxu2 %v4232_v5  ;;  %v4375_v42 = vmul.f32 %v4374_v57, %v7957_v49  ;;  %v4384_v21 = vxor.u32 2147483648, %v4367_v18  ;;  %v3889_v44 = vmul.f32 %v3888_v45, %v3886_v54  ;;  %v4011_v53 = vsel %vm4010_vm11, 1, %v8622_v35 }
 0x4e3   : > { %v3962_v51 = vsel %vm3956_vm9, %v7941_v60, %v7964_v0  ;;  %v8014_v6 = vadd.s32 %v3992_v34, %v3983_v24  ;;  %v4003_v47 = vshrl.u32 %v7968_v43, 16  ;;  %v4013_v58 = vadd.s32 %v4011_v53, %v4009_v20  ;;  %v8815_v43 = vld [vmem:[#allocation38_spill] sm:$0xff] }
 0x4e4   : > { %v4381_v22 = vxor.u32 2147483648, %v4375_v42  ;;  %v3890_v62 = vxor.u32 2147483648, %v3889_v44  ;;  %v3895_v31 = vsel %vm7985_vm15, 0, %v3893_v13  ;;  %v4005_v49 = vshrl.u32 %v7975_v7, 16  ;;  %v8817_v7 = vld [vmem:[#allocation47_spill] sm:$0xff] }
 0x4e5   : > { %v4385_v41 = vsel %vm4383_vm13, %v4384_v21, %v4375_v42  ;;  %v8022_v10 = vadd.s32 %v4008_v15, %v4004_v32  ;;  %v4014_v26 = vadd.s32 %v4013_v58, %v4003_v47  ;;  %vm3491_vm9 = vcmp.lt.s32.totalorder %v8814_v61, 2  ;;  %v8824_v32 = vld [vmem:[#allocation11_spill] sm:$0xff] }
 0x4e6   : > { %v4382_v60 = vsel %vm4380_vm7, %v4367_v18, %v4381_v22  ;;  %v3891_v0 = vsel %vm3770_vm10, %v3890_v62, %v3889_v44  ;;  %v3501_v39 = vsel %vm3491_vm9, %v8816_v12, %v8815_v43  ;;  %v3505_v23 = vsel %vm3491_vm9, %v8818_v28, %v8817_v7  ;;  %v8827_v62 = vld [vmem:[#allocation12_spill] sm:$0xff]  ;;  %v8828_v12 = vld [vmem:[#allocation31_spill] sm:$0xff] }
 0x4e7   : > { %v4386_v25 = vsel %vm4379_vm6, %v4382_v60, %v4385_v41  ;;  %v3894_v48 = vsel %vm7985_vm15, %v8810_v16, %v3891_v0  ;;  %v4015_v33 = vadd.s32 %v4014_v26, %v4005_v49  ;;  %vm4018_vm8 = vc.u32 %v8014_v6, %v8022_v10 }
 0x4e8   : > { %v4387_v29 = vsel %vm4376_vm0, nan, %v4386_v25  ;;  %v3896_v19 = vmul.f32 %v3894_v48, %v3894_v48  ;;  %v3509_v40 = vand.u32 65535, %v3505_v23  ;;  %v3510_v17 = vshrl.u32 %v3505_v23, 16 }
 0x4e9   : > { %v8821_v55 = vor.u32 %v8819_v56, %v8820_v27  ;;  %4430 = vmatpush.msra.mxu3 %v4387_v29  ;;  %v3912_v34 = vadd.s32 3, %v3895_v31  ;;  %v4019_v1 = vadd.s32 1, %v4015_v33  ;;  %v3532_v11 = vshrl.u32 %v3501_v39, 16 }
 0x4ea   : > { %v3897_v9 = vmul.f32 -0.001358992, %v3896_v19  ;;  %v3904_v46 = vmul.f32 -0.00019511016, %v3896_v19  ;;  %v4016_v4 = vmul.u32 %v8823_v3, %v3962_v51  ;;  %v3512_v36 = vmul.u32 %v3510_v17, %v8824_v32 }
 0x4eb   : > { %v3658_v14 = vsel %vm3648_vm5, %v8821_v55, 1326507024  ;;  %v4020_v38 = vsel %vm4018_vm8, %v4019_v1, %v4015_v33  ;;  %v3511_v2 = vmul.u32 %v3509_v40, %v8824_v32  ;;  %v8055_v8 = vmul.u32 %v3509_v40, %v8825_v52 }
 0x4ec   : > { %v3531_v15 = vand.u32 65535, %v3501_v39  ;;  %v3898_v37 = vadd.f32 0.041655596, %v3897_v9  ;;  %v3905_v59 = vadd.f32 0.008332121, %v3904_v46  ;;  %v4021_v45 = vadd.s32 %v4020_v38, %v4016_v4  ;;  %v8829_v4 = vld [vmem:[#allocation28_spill] sm:$0xff] }
 0x4ed   : > { %v3515_v20 = vshll.u32 %v3512_v36, 16  ;;  %v8060_v18 = vsel %vm3647_vm14, %v8826_v30, %v3658_v14  ;;  %v3913_v57 = vand.u32 3, %v3912_v34  ;;  %v3514_v54 = vmul.u32 %v3510_v17, %v8825_v52 }
 0x4ee   : > { %v8064_v5 = vmul.u32 %v3532_v11, %v8824_v32  ;;  %v3899_v13 = vmul.f32 %v3898_v37, %v3896_v19  ;;  %v3906_v24 = vmul.f32 %v3905_v59, %v3896_v19  ;;  %v4022_v42 = vadd.s32 536870912, %v4021_v45 }
 0x4ef   : > { %vm3519_vm1 = vc.u32 %v3511_v2, %v3515_v20  ;;  %v3517_v21 = vshll.u32 %v8055_v8, 16  ;;  %v3521_v53 = vadd.s32 %v3515_v20, %v3511_v2  ;;  %v8069_v51 = vmul.u32 %v3531_v15, %v8825_v52 }
 0x4f0   : > { %v3520_v44 = vsel %vm3519_vm1, 1, %v8622_v35  ;;  %v3900_v47 = vadd.f32 -0.4999988, %v3899_v13  ;;  %v3907_v58 = vadd.f32 -0.16666654, %v3906_v24  ;;  %v8071_v22 = vshrl.u32 %v4022_v42, 30 }
 0x4f1   : > { %v3474_v31 = vshrl.u32 %v8623_v50, %v8827_v62  ;;  %v3522_v49 = vadd.s32 %v3520_v44, %v3514_v54  ;;  %vm3523_vm10 = vc.u32 %v3521_v53, %v3517_v21  ;;  %v3533_v41 = vmul.u32 %v3531_v15, %v8824_v32  ;;  %v8830_v32 = vld [vmem:[#allocation33_spill] sm:$0xff]  ;;  %v8833_v15 = vld [vmem:[#allocation35_spill] sm:$0xff]  ;;  %v8836_v62 = vld [vmem:[#allocation22_spill] sm:$0xff] }
 0x4f2   : > { %v3537_v26 = vshll.u32 %v8064_v5, 16  ;;  %v3901_v60 = vmul.f32 %v3900_v47, %v3896_v19  ;;  %v3908_v0 = vmul.f32 %v3907_v58, %v3896_v19  ;;  %v4024_v43 = vshll.u32 %v8071_v22, 30  ;;  %v8834_v53 = vld [vmem:[#allocation61_spill] sm:$0xff]  ;;  %v8835_v47 = vld [vmem:[#allocation60_spill] sm:$0xff] }
 0x4f3   : > { %v3495_v39 = vsel %vm3493_vm3, %v8828_v12, 2102212464  ;;  %v3524_v7 = vsel %vm3523_vm10, 1, %v8622_v35  ;;  %v3539_v28 = vshll.u32 %v8069_v51, 16  ;;  %v3516_v40 = vshrl.u32 %v3512_v36, 16  ;;  %v8831_v36 = vld [vmem:[#allocation30_spill] sm:$0xff] }
 0x4f4   : > { %vm3541_vm4 = vc.u32 %v3533_v41, %v3537_v26  ;;  %v3543_v23 = vadd.s32 %v3537_v26, %v3533_v41  ;;  %v3902_v25 = vadd.f32 1.0, %v3901_v60  ;;  %v3909_v33 = vadd.f32 1.0, %v3908_v0 }
 0x4f5   : > { %v8083_v29 = vsub.s32 %v4021_v45, %v4024_v43  ;;  %v3526_v17 = vadd.s32 %v3524_v7, %v3522_v49  ;;  %v3536_v19 = vmul.u32 %v3532_v11, %v8825_v52  ;;  %v3542_v56 = vsel %vm3541_vm4, 1, %v8622_v35  ;;  %v8837_v49 = vld [vmem:[#allocation62_spill] sm:$0xff] }
 0x4f6   : > { %vm3545_vm15 = vc.u32 %v3543_v23, %v3539_v28  ;;  %v3910_v27 = vmul.f32 %v3909_v33, %v3894_v48  ;;  %v3919_v55 = vxor.u32 2147483648, %v3902_v25  ;;  %vm3915_vm13 = vcmp.eq.s32.totalorder %v3913_v57, 0  ;;  %v8839_v33 = vld [vmem:[#allocation49_spill] sm:$0xff] }
 0x4f7   : > { %vm4026_vm3 = vcmp.lt.s32.totalorder %v8083_v29, 0  ;;  %v4027_v14 = vsub.s32 0, %v8083_v29  ;;  %v3527_v34 = vadd.s32 %v3526_v17, %v3516_v40  ;;  %v3544_v1 = vadd.s32 %v3542_v56, %v3536_v19 }
 0x4f8   : > { %v3546_v9 = vsel %vm3545_vm15, 1, %v8622_v35  ;;  %v3916_v46 = vxor.u32 2147483648, %v3910_v27  ;;  %vm3918_vm12 = vcmp.eq.s32.totalorder %v3913_v57, 2  ;;  %v3494_v11 = vsel %vm3490_vm2, %v3474_v31, %v8829_v4  ;;  %v8845_v4 = vld [vmem:[#allocation46_spill] sm:$0xff] }
 0x4f9   : > { %v4028_v3 = vsel %vm4026_vm3, %v4027_v14, %v8083_v29  ;;  %vm3925_vm7 = vcmp.lt.s32.totalorder %v8830_v32, 0  ;;  %vm8832_vm6 = vcmp.lt.s32.totalorder %v8814_v61, 3  ;;  %v3518_v2 = vshrl.u32 %v8055_v8, 16 }
 0x4fa   : > { %v4029_v48 = vclz %v4028_v3  ;;  %v3496_v38 = vsel %vm8832_vm6, %v8831_v36, %v3495_v39  ;;  %v3548_v52 = vadd.s32 %v3546_v9, %v3544_v1  ;;  %vm3337_vm0 = vcmp.lt.s32.totalorder %v8833_v15, 3  ;;  %v8838_v39 = vld [vmem:[#allocation44_spill] sm:$0xff] }
 0x4fb   : > { %vm3914_vm11 = vcmp.lt.s32.totalorder %v3913_v57, 2  ;;  %v3917_v37 = vsel %vm3915_vm13, %v3902_v25, %v3916_v46  ;;  %v3920_v59 = vsel %vm3918_vm12, %v3919_v55, %v3910_v27  ;;  %v3538_v45 = vshrl.u32 %v8064_v5, 16  ;;  %v8844_v55 = vld [vmem:[#allocation51_spill] sm:$0xff]  ;;  %v8850_v27 = vld [vmem:[#allocation56_spill] sm:$0xff] }
 0x4fc   : > { %vm3911_vm8 = vweird.f32 %v8810_v16  ;;  %v3921_v20 = vsel %vm3914_vm11, %v3917_v37, %v3920_v59  ;;  %v4637_v30 = vadd.s32 4294967294, %v4029_v48  ;;  %v8102_v54 = vadd.s32 %v3527_v34, %v3518_v2 }
 0x4fd   : > { %v3922_v13 = vsel %vm3911_vm8, nan, %v3921_v20  ;;  %v3497_v24 = vsel %vm3491_vm9, %v3494_v11, %v3496_v38  ;;  %v3540_v8 = vshrl.u32 %v8069_v51, 16  ;;  %v3549_v42 = vadd.s32 %v3548_v52, %v3538_v45 }
 0x4fe   : > { %4411 = vmatpush.msra.mxu2 %v3922_v13  ;;  %v4017_v57 = vadd.s32 %v8022_v10, %v8014_v6  ;;  %vm4638_vm2 = vcmp.lt.s32.totalorder %v4637_v30, 0  ;;  %v8109_v21 = vadd.s32 %v3543_v23, %v3539_v28  ;;  %vm3646_vm1 = vcmp.lt.s32.totalorder %v8822_v63, 2 }
 0x4ff   : > { %v4032_v16 = vsel %vm4638_vm2, 0, %v4637_v30  ;;  %v4047_v5 = vsub.s32 4, %v8071_v22  ;;  %v3550_v44 = vadd.s32 %v3549_v42, %v3540_v8  ;;  %v3656_v61 = vsel %vm3646_vm1, %v8835_v47, %v8834_v53 }
 0x500   : > { %v4033_v51 = vsub.s32 32, %v4032_v16  ;;  %v4037_v58 = vsub.s32 4294967266, %v4032_v16  ;;  %v3551_v31 = vmul.u32 %v8836_v62, %v3497_v24  ;;  %vm3553_vm9 = vc.u32 %v8102_v54, %v8109_v21 }
 0x501   : > { %v4034_v6 = vshll.u32 %v8083_v29, %v4032_v16  ;;  %v3554_v10 = vadd.s32 1, %v3550_v44  ;;  %v3660_v41 = vsel %vm3646_vm1, %v8837_v49, %v8060_v18  ;;  %v3686_v26 = vand.u32 65535, %v3656_v61  ;;  %v8840_v29 = vld [vmem:[#allocation43_spill] sm:$0xff]  ;;  %v8847_v49 = vld [vmem:[#allocation16_spill] sm:$0xff] }
 0x502   : > { %v4035_v60 = vshrl.u32 %v4017_v57, %v4033_v51  ;;  %v4038_v0 = vadd.s32 127, %v4037_v58  ;;  %v3664_v43 = vand.u32 65535, %v3660_v41  ;;  %v3665_v12 = vshrl.u32 %v3660_v41, 16 }
 0x503   : > { %v3663_v7 = vshrl.u32 %v8838_v39, 16  ;;  %v4048_v28 = vsel %vm3925_vm7, %v4047_v5, %v8071_v22  ;;  %v3555_v23 = vsel %vm3553_vm9, %v3554_v10, %v3550_v44  ;;  %v3687_v25 = vshrl.u32 %v3656_v61, 16 }
 0x504   : > { %v8133_v40 = vsel %vm3337_vm0, %v8840_v29, %v8839_v33  ;;  %v4036_v18 = vor.u32 %v4035_v60, %v4034_v6  ;;  %v4039_v17 = vshll.u32 %v4038_v0, 23  ;;  %v3556_v19 = vadd.s32 %v3555_v23, %v3551_v31  ;;  %v8846_v6 = vld [vmem:[#allocation57_spill] sm:$0xff] }
 0x505   : > { %v8841_v56 = vand.u32 2147483647, %v8830_v32  ;;  %v3667_v14 = vmul.u32 %v3665_v12, %v8844_v55  ;;  %v3668_v22 = vmul.u32 %v3664_v43, %v3663_v7  ;;  %v3689_v34 = vmul.u32 %v3687_v25, %v8844_v55 }
 0x506   : > { %v4040_v1 = vor.u32 4788187, %v4039_v17  ;;  %v3557_v46 = vadd.s32 536870912, %v3556_v19  ;;  %v3690_v3 = vmul.u32 %v3686_v26, %v3663_v7  ;;  %v3629_v11 = vshrl.u32 %v8623_v50, %v8845_v4 }
 0x507   : > { %vm8137_vm10 = vcmp.le.f32.partialorder %v8841_v56, 0.7853982  ;;  %v3666_v48 = vmul.u32 %v3664_v43, %v8844_v55  ;;  %v3670_v36 = vshll.u32 %v3667_v14, 16  ;;  %v3688_v38 = vmul.u32 %v3686_v26, %v8844_v55 }
 0x508   : > { %v4050_v9 = vsel %vm8137_vm10, 0, %v4048_v28  ;;  %v4041_v2 = vand.u32 2147483647, %v4040_v1  ;;  %v4043_v52 = vcvt.s32.f32 %v4036_v18  ;;  %v8149_v37 = vshrl.u32 %v3557_v46, 30  ;;  %v8851_v1 = vld [vmem:[#allocation39_spill] sm:$0xff] }
 0x509   : > { %v3692_v59 = vshll.u32 %v3689_v34, 16  ;;  %v3669_v45 = vmul.u32 %v3665_v12, %v3663_v7  ;;  %v3672_v20 = vshll.u32 %v3668_v22, 16  ;;  %vm3674_vm4 = vc.u32 %v3666_v48, %v3670_v36 }
 0x50a   : > { %v3676_v30 = vadd.s32 %v3670_v36, %v3666_v48  ;;  %v4044_v13 = vmul.f32 %v4043_v52, %v4041_v2  ;;  %v3559_v24 = vshll.u32 %v8149_v37, 30  ;;  %v3675_v8 = vsel %vm3674_vm4, 1, %v8622_v35 }
 0x50b   : > { %v3694_v42 = vshll.u32 %v3690_v3, 16  ;;  %v3677_v57 = vadd.s32 %v3675_v8, %v3669_v45  ;;  %vm3696_vm3 = vc.u32 %v3688_v38, %v3692_v59  ;;  %v3698_v16 = vadd.s32 %v3692_v59, %v3688_v38 }
 0x50c   : > { %vm3678_vm15 = vc.u32 %v3676_v30, %v3672_v20  ;;  %v4045_v5 = vxor.u32 2147483648, %v4044_v13  ;;  %v8153_v44 = vsub.s32 %v3556_v19, %v3559_v24  ;;  %v3691_v47 = vmul.u32 %v3687_v25, %v3663_v7  ;;  %v8848_v25 = vld [vmem:[#allocation55_spill] sm:$0xff] }
 0x50d   : > { %v3679_v53 = vsel %vm3678_vm15, 1, %v8622_v35  ;;  %v3671_v61 = vshrl.u32 %v3667_v14, 16  ;;  %v3697_v58 = vsel %vm3696_vm3, 1, %v8622_v35  ;;  %vm3700_vm13 = vc.u32 %v3698_v16, %v3694_v42 }
 0x50e   : > { %v3681_v51 = vadd.s32 %v3679_v53, %v3677_v57  ;;  %v4046_v62 = vsel %vm3925_vm7, %v4045_v5, %v4044_v13  ;;  %vm3561_vm12 = vcmp.lt.s32.totalorder %v8153_v44, 0  ;;  %v3562_v31 = vsub.s32 0, %v8153_v44 }
 0x50f   : > { %v3650_v10 = vsel %vm3648_vm5, %v8846_v6, 2102212464  ;;  %vm3460_vm6 = vcmp.lt.s32.totalorder %v8847_v49, 0  ;;  %v4049_v41 = vsel %vm8137_vm10, %v8830_v32, %v4046_v62  ;;  %v3699_v60 = vadd.s32 %v3697_v58, %v3691_v47 }
 0x510   : > { %v3682_v26 = vadd.s32 %v3681_v51, %v3671_v61  ;;  %v3701_v0 = vsel %vm3700_vm13, 1, %v8622_v35  ;;  %v4051_v43 = vmul.f32 %v4049_v41, %v4049_v41  ;;  %v4067_v12 = vadd.s32 3, %v4050_v9  ;;  %v8852_v9 = vld [vmem:[#allocation45_spill] sm:$0xff] }
 0x511   : > { %v3563_v7 = vsel %vm3561_vm12, %v3562_v31, %v8153_v44  ;;  %v3673_v28 = vshrl.u32 %v3668_v22, 16  ;;  %vm8849_vm7 = vcmp.lt.s32.totalorder %v8822_v63, 1  ;;  %v3693_v18 = vshrl.u32 %v3689_v34, 16 }
 0x512   : > { %v3564_v23 = vclz %v3563_v7  ;;  %v3649_v33 = vsel %vm8849_vm7, %v3629_v11, %v8848_v25  ;;  %v3703_v17 = vadd.s32 %v3701_v0, %v3699_v60  ;;  %v4052_v19 = vmul.f32 -0.001358992, %v4051_v43 }
 0x513   : > { %v4059_v56 = vmul.f32 -0.00019511016, %v4051_v43  ;;  %v3651_v55 = vsel %vm3647_vm14, %v8850_v27, %v3650_v10  ;;  %v8176_v14 = vadd.s32 %v3682_v26, %v3673_v28  ;;  %v8853_v46 = vor.u32 %v8851_v1, %v8852_v9  ;;  %v8859_v10 = vld [vmem:[#allocation13_spill] sm:$0xff] }
 0x514   : > { %vm8854_vm5 = vcmp.lt.s32.totalorder %v8833_v15, 4  ;;  %v4628_v4 = vadd.s32 4294967294, %v3564_v23  ;;  %v3695_v48 = vshrl.u32 %v3690_v3, 16  ;;  %v3704_v11 = vadd.s32 %v3703_v17, %v3693_v18 }
 0x515   : > { %v8183_v22 = vsel %vm8854_vm5, %v8853_v46, 1326507024  ;;  %v4053_v34 = vadd.f32 0.041655596, %v4052_v19  ;;  %v4060_v36 = vadd.f32 0.008332121, %v4059_v56  ;;  %v8186_v2 = vadd.s32 %v3698_v16, %v3694_v42 }
 0x516   : > { %v3582_v38 = vsub.s32 4, %v8149_v37  ;;  %v4068_v52 = vand.u32 3, %v4067_v12  ;;  %vm4629_vm14 = vcmp.lt.s32.totalorder %v4628_v4, 0  ;;  %v3652_v59 = vsel %vm3646_vm1, %v3649_v33, %v3651_v55  ;;  %v8861_v56 = vld [vmem:[#allocation20_spill] sm:$0xff]  ;;  %v8862_v55 = vld [vmem:[#allocation10_spill] sm:$0xff] }
 0x517   : > { %v3705_v45 = vadd.s32 %v3704_v11, %v3695_v48  ;;  %v4054_v20 = vmul.f32 %v4053_v34, %v4051_v43  ;;  %v4061_v30 = vmul.f32 %v4060_v36, %v4051_v43  ;;  %v3567_v13 = vsel %vm4629_vm14, 0, %v4628_v4  ;;  %v8863_v11 = vld [vmem:[#allocation14_spill] sm:$0xff]  ;;  %v8864_v34 = vld [vmem:[#allocation23_spill] sm:$0xff] }
 0x518   : > { %vm3708_vm11 = vc.u32 %v8176_v14, %v8186_v2  ;;  %v3552_v3 = vadd.s32 %v8109_v21, %v8102_v54  ;;  %v3568_v24 = vsub.s32 32, %v3567_v13  ;;  %v3572_v8 = vsub.s32 4294967266, %v3567_v13  ;;  %v8855_v54 = vld [vmem:[#allocation26_spill] sm:$0xff] }
 0x519   : > { %v3709_v57 = vadd.s32 1, %v3705_v45  ;;  %v4055_v42 = vadd.f32 -0.4999988, %v4054_v20  ;;  %v4062_v16 = vadd.f32 -0.16666654, %v4061_v30  ;;  %v3583_v63 = vsel %vm3460_vm6, %v3582_v38, %v8149_v37 }
 0x51a   : > { %v3706_v5 = vmul.u32 %v8838_v39, %v3652_v59  ;;  %v3569_v53 = vshll.u32 %v8153_v44, %v3567_v13  ;;  %v3570_v47 = vshrl.u32 %v3552_v3, %v3568_v24  ;;  %v3573_v61 = vadd.s32 127, %v3572_v8  ;;  %v8860_v44 = vld [vmem:[#allocation21_spill] sm:$0xff] }
 0x51b   : > { %v3710_v51 = vsel %vm3708_vm11, %v3709_v57, %v3705_v45  ;;  %v4056_v58 = vmul.f32 %v4055_v42, %v4051_v43  ;;  %v4063_v62 = vmul.f32 %v4062_v16, %v4051_v43  ;;  %vm3181_vm8 = vcmp.lt.s32.totalorder %v8855_v54, 2 }
 0x51c   : > { %v3711_v31 = vadd.s32 %v3710_v51, %v3706_v5  ;;  %vm4066_vm2 = vweird.f32 %v8830_v32  ;;  %v8856_v21 = vand.u32 2147483647, %v8847_v49  ;;  %v3571_v37 = vor.u32 %v3570_v47, %v3569_v53  ;;  %v8865_v53 = vld [vmem:[#allocation42_spill] sm:$0xff] }
 0x51d   : > { %v3574_v39 = vshll.u32 %v3573_v61, 23  ;;  %v3195_v26 = vsel %vm3181_vm8, %v8860_v44, %v8859_v10  ;;  %v4057_v60 = vadd.f32 1.0, %v4056_v58  ;;  %v4064_v0 = vadd.f32 1.0, %v4063_v62 }
 0x51e   : > { %vm8203_vm1 = vcmp.le.f32.partialorder %v8856_v21, 0.7853982  ;;  %v3712_v43 = vadd.s32 536870912, %v3711_v31  ;;  %v3199_v12 = vand.u32 65535, %v3195_v26  ;;  %vm4069_vm9 = vcmp.lt.s32.totalorder %v4068_v52, 2 }
 0x51f   : > { %v3575_v7 = vor.u32 4788187, %v3574_v39  ;;  %v3585_v28 = vsel %vm8203_vm1, 0, %v3583_v63  ;;  %v3200_v23 = vshrl.u32 %v3195_v26, 16  ;;  %v4065_v25 = vmul.f32 %v4064_v0, %v4049_v41  ;;  %v8867_v39 = vld [vmem:[#allocation18_spill] sm:$0xff] }
 0x520   : > { %vm4070_vm10 = vcmp.eq.s32.totalorder %v4068_v52, 0  ;;  %v4074_v33 = vxor.u32 2147483648, %v4057_v60  ;;  %v8213_v18 = vshrl.u32 %v3712_v43, 30  ;;  %v3578_v19 = vcvt.s32.f32 %v3571_v37  ;;  %v8866_v37 = vld [vmem:[#allocation25_spill] sm:$0xff] }
 0x521   : > { %v3576_v17 = vand.u32 2147483647, %v3575_v7  ;;  %v3202_v27 = vmul.u32 %v3200_v23, %v8861_v56  ;;  %v8217_v1 = vmul.u32 %v3199_v12, %v8862_v55  ;;  %v4071_v9 = vxor.u32 2147483648, %v4065_v25 }
 0x522   : > { %vm4073_vm4 = vcmp.eq.s32.totalorder %v4068_v52, 2  ;;  %v3602_v46 = vadd.s32 3, %v3585_v28  ;;  %v3714_v4 = vshll.u32 %v8213_v18, 30  ;;  %v3191_v41 = vsel %vm3181_vm8, %v8864_v34, %v8863_v11 }
 0x523   : > { %v3579_v48 = vmul.f32 %v3578_v19, %v3576_v17  ;;  %v3201_v36 = vmul.u32 %v3199_v12, %v8861_v56  ;;  %v3205_v38 = vshll.u32 %v3202_v27, 16  ;;  %v4072_v59 = vsel %vm4070_vm10, %v4057_v60, %v4071_v9  ;;  %v8869_v12 = vld [vmem:[#allocation17_spill] sm:$0xff] }
 0x524   : > { %v4075_v45 = vsel %vm4073_vm4, %v4074_v33, %v4065_v25  ;;  %v8225_v20 = vsub.s32 %v3711_v31, %v3714_v4  ;;  %v3204_v30 = vmul.u32 %v3200_v23, %v8862_v55  ;;  %v3207_v24 = vshll.u32 %v8217_v1, 16  ;;  %v8871_v9 = vld [vmem:[#allocation5_spill] sm:$0xff] }
 0x525   : > { %v4076_v13 = vsel %vm4069_vm9, %v4072_v59, %v4075_v45  ;;  %v3580_v3 = vxor.u32 2147483648, %v3579_v48  ;;  %vm3209_vm15 = vc.u32 %v3201_v36, %v3205_v38  ;;  %v3211_v63 = vadd.s32 %v3205_v38, %v3201_v36 }
 0x526   : > { %v4077_v8 = vsel %vm4066_vm2, nan, %v4076_v13  ;;  %vm3716_vm3 = vcmp.lt.s32.totalorder %v8225_v20, 0  ;;  %v3717_v57 = vsub.s32 0, %v8225_v20  ;;  %v3210_v42 = vsel %vm3209_vm15, 1, %v8622_v35 }
 0x527   : > { %4431 = vmatpush.msra.mxu3 %v4077_v8  ;;  %v3581_v16 = vsel %vm3460_vm6, %v3580_v3, %v3579_v48  ;;  %v3212_v52 = vadd.s32 %v3210_v42, %v3204_v30  ;;  %v3222_v5 = vshrl.u32 %v3191_v41, 16  ;;  %v8241_v47 = vsel %vm3337_vm0, %v8865_v53, %v8183_v22 }
 0x528   : > { %v8246_v32 = vsel %vm8203_vm1, %v8847_v49, %v3581_v16  ;;  %v3718_v61 = vsel %vm3716_vm3, %v3717_v57, %v8225_v20  ;;  %v3221_v51 = vand.u32 65535, %v3191_v41  ;;  %vm3213_vm13 = vc.u32 %v3211_v63, %v3207_v24  ;;  %v8873_v41 = vld [vmem:[#allocation24_spill] sm:$0xff] }
 0x529   : > { %v3586_v58 = vmul.f32 %v8246_v32, %v8246_v32  ;;  %v3719_v62 = vclz %v3718_v61  ;;  %v3224_v31 = vmul.u32 %v3222_v5, %v8861_v56  ;;  %v8252_v21 = vand.u32 3, %v3602_v46 }
 0x52a   : > { %v3164_v22 = vshrl.u32 %v8623_v50, %v8866_v37  ;;  %vm8868_vm12 = vcmp.lt.s32.totalorder %v8855_v54, 4  ;;  %v3214_v10 = vsel %vm3213_vm13, 1, %v8622_v35  ;;  %v3707_v43 = vadd.s32 %v8186_v2, %v8176_v14 }
 0x52b   : > { %v3185_v6 = vsel %vm8868_vm12, %v8867_v39, 2102212464  ;;  %v3587_v44 = vmul.f32 -0.001358992, %v3586_v58  ;;  %v3594_v26 = vmul.f32 -0.00019511016, %v3586_v58  ;;  %v3216_v0 = vadd.s32 %v3214_v10, %v3212_v52 }
 0x52c   : > { %v4631_v60 = vadd.s32 4294967294, %v3719_v62  ;;  %vm8870_vm6 = vcmp.lt.s32.totalorder %v8855_v54, 1  ;;  %v3225_v28 = vmul.u32 %v3221_v51, %v8862_v55  ;;  %v3227_v23 = vshll.u32 %v3224_v31, 16 }
 0x52d   : > { %v3184_v7 = vsel %vm8870_vm6, %v3164_v22, %v8869_v12  ;;  %v3588_v25 = vadd.f32 0.041655596, %v3587_v44  ;;  %v3595_v33 = vadd.f32 0.008332121, %v3594_v26  ;;  %v3206_v17 = vshrl.u32 %v3202_v27, 16 }
 0x52e   : > { %vm4632_vm7 = vcmp.lt.s32.totalorder %v4631_v60, 0  ;;  %vm8872_vm5 = vcmp.lt.s32.totalorder %v8855_v54, 3  ;;  %v3223_v4 = vmul.u32 %v3221_v51, %v8861_v56  ;;  %v3226_v14 = vmul.u32 %v3222_v5, %v8862_v55 }
 0x52f   : > { %v3722_v19 = vsel %vm4632_vm7, 0, %v4631_v60  ;;  %v3186_v46 = vsel %vm8872_vm5, %v8871_v9, %v3185_v6  ;;  %v3589_v2 = vmul.f32 %v3588_v25, %v3586_v58  ;;  %v3596_v48 = vmul.f32 %v3595_v33, %v3586_v58  ;;  %v8879_v25 = vld [vmem:[#allocation50_spill] sm:$0xff] }
 0x530   : > { %v3723_v11 = vsub.s32 32, %v3722_v19  ;;  %v3217_v34 = vadd.s32 %v3216_v0, %v3206_v17  ;;  %vm3615_vm14 = vcmp.lt.s32.totalorder %v8873_v41, 0  ;;  %v3727_v36 = vsub.s32 4294967266, %v3722_v19 }
 0x531   : > { %v3229_v38 = vshll.u32 %v3225_v28, 16  ;;  %vm3231_vm11 = vc.u32 %v3223_v4, %v3227_v23  ;;  %v3233_v59 = vadd.s32 %v3227_v23, %v3223_v4  ;;  %v3590_v27 = vadd.f32 -0.4999988, %v3589_v2 }
 0x532   : > { %v3597_v45 = vadd.f32 -0.16666654, %v3596_v48  ;;  %v3725_v30 = vshrl.u32 %v3707_v43, %v3723_v11  ;;  %v3232_v13 = vsel %vm3231_vm11, 1, %v8622_v35  ;;  %vm3605_vm2 = vcmp.eq.s32.totalorder %v8252_v21, 0  ;;  %v8880_v11 = vld [vmem:[#allocation29_spill] sm:$0xff] }
 0x533   : > { %v3724_v56 = vshll.u32 %v8225_v20, %v3722_v19  ;;  %v3728_v55 = vadd.s32 127, %v3727_v36  ;;  %v3234_v3 = vadd.s32 %v3232_v13, %v3226_v14  ;;  %vm3235_vm1 = vc.u32 %v3233_v59, %v3229_v38 }
 0x534   : > { %v3591_v24 = vmul.f32 %v3590_v27, %v3586_v58  ;;  %v3598_v8 = vmul.f32 %v3597_v45, %v3586_v58  ;;  %vm3604_vm9 = vcmp.lt.s32.totalorder %v8252_v21, 2  ;;  %v3208_v57 = vshrl.u32 %v8217_v1, 16 }
 0x535   : > { %v3236_v42 = vsel %vm3235_vm1, 1, %v8622_v35  ;;  %vm3601_vm10 = vweird.f32 %v8847_v49  ;;  %v8874_v16 = vand.u32 2147483647, %v8873_v41  ;;  %v3726_v20 = vor.u32 %v3725_v30, %v3724_v56 }
 0x536   : > { %v3729_v52 = vshll.u32 %v3728_v55, 23  ;;  %v3228_v5 = vshrl.u32 %v3224_v31, 16  ;;  %v3238_v53 = vadd.s32 %v3236_v42, %v3234_v3  ;;  %v3592_v61 = vadd.f32 1.0, %v3591_v24 }
 0x537   : > { %vm8281_vm4 = vcmp.le.f32.partialorder %v8874_v16, 0.7853982  ;;  %v3599_v51 = vadd.f32 1.0, %v3598_v8  ;;  %v3737_v58 = vsub.s32 4, %v8213_v18  ;;  %v8286_v62 = vadd.s32 %v3217_v34, %v3208_v57 }
 0x538   : > { %vm3608_vm15 = vcmp.eq.s32.totalorder %v8252_v21, 2  ;;  %v3730_v1 = vor.u32 4788187, %v3729_v52  ;;  %v3230_v37 = vshrl.u32 %v3225_v28, 16  ;;  %v3239_v22 = vadd.s32 %v3238_v53, %v3228_v5 }
 0x539   : > { %v3600_v39 = vmul.f32 %v3599_v51, %v8246_v32  ;;  %v3609_v6 = vxor.u32 2147483648, %v3592_v61  ;;  %v3187_v10 = vsel %vm3181_vm8, %v3184_v7, %v3186_v46  ;;  %v8292_v44 = vadd.s32 %v3233_v59, %v3229_v38  ;;  %v8877_v32 = vld [vmem:[#allocation48_spill] sm:$0xff]  ;;  %v8878_v7 = vld [vmem:[#allocation15_spill] sm:$0xff] }
 0x53a   : > { %v3731_v31 = vand.u32 2147483647, %v3730_v1  ;;  %v3733_v26 = vcvt.s32.f32 %v3726_v20  ;;  %v3240_v60 = vadd.s32 %v3239_v22, %v3230_v37  ;;  %vm3336_vm3 = vcmp.lt.s32.totalorder %v8833_v15, 2  ;;  %v8881_v38 = vld [vmem:[#allocation32_spill] sm:$0xff] }
 0x53b   : > { %v3606_v0 = vxor.u32 2147483648, %v3600_v39  ;;  %v3738_v43 = vsel %vm3615_vm14, %v3737_v58, %v8213_v18  ;;  %vm3243_vm13 = vc.u32 %v8286_v62, %v8292_v44  ;;  %v3346_v54 = vsel %vm3336_vm3, %v8877_v32, %v8133_v40 }
 0x53c   : > { %v3734_v12 = vmul.f32 %v3733_v26, %v3731_v31  ;;  %v3241_v28 = vmul.u32 %v8878_v7, %v3187_v10  ;;  %v3244_v23 = vadd.s32 1, %v3240_v60  ;;  %v3350_v33 = vsel %vm3336_vm3, %v8879_v25, %v8241_v47 }
 0x53d   : > { %v3607_v18 = vsel %vm3605_vm2, %v3592_v61, %v3606_v0  ;;  %v3610_v17 = vsel %vm3608_vm15, %v3609_v6, %v3600_v39  ;;  %v3354_v19 = vand.u32 65535, %v3350_v33  ;;  %v3355_v9 = vshrl.u32 %v3350_v33, 16 }
 0x53e   : > { %v3611_v40 = vsel %vm3604_vm9, %v3607_v18, %v3610_v17  ;;  %v3735_v46 = vxor.u32 2147483648, %v3734_v12  ;;  %v3245_v4 = vsel %vm3243_vm13, %v3244_v23, %v3240_v60  ;;  %v3377_v14 = vshrl.u32 %v3346_v54, 16 }
 0x53f   : > { %v3612_v2 = vsel %vm3601_vm10, nan, %v3611_v40  ;;  %v3740_v47 = vsel %vm8281_vm4, 0, %v3738_v43  ;;  %v3246_v48 = vadd.s32 %v3245_v4, %v3241_v28  ;;  %v3357_v34 = vmul.u32 %v3355_v9, %v8880_v11  ;;  %v8884_v4 = vld [vmem:[#allocation40_spill] sm:$0xff] }
 0x540   : > { %4412 = vmatpush.msra.mxu2 %v3612_v2  ;;  %v3736_v36 = vsel %vm3615_vm14, %v3735_v46, %v3734_v12  ;;  %v8323_v59 = vmul.u32 %v3354_v19, %v8881_v38  ;;  %v3356_v49 = vmul.u32 %v3354_v19, %v8880_v11  ;;  %v3757_v13 = vadd.s32 3, %v3740_v47  ;;  %v8886_v2 = vld [vmem:[#allocation41_spill] sm:$0xff] }
 0x541   : > { %v3739_v21 = vsel %vm8281_vm4, %v8873_v41, %v3736_v36  ;;  %v3247_v27 = vadd.s32 536870912, %v3246_v48  ;;  %v3360_v45 = vshll.u32 %v3357_v34, 16  ;;  %v3376_v56 = vand.u32 65535, %v3346_v54 }
 0x542   : > { %v3741_v30 = vmul.f32 %v3739_v21, %v3739_v21  ;;  %v8330_v55 = vmul.u32 %v3377_v14, %v8880_v11  ;;  %v3362_v24 = vshll.u32 %v8323_v59, 16  ;;  %v3359_v16 = vmul.u32 %v3355_v9, %v8881_v38 }
 0x543   : > { %v8332_v3 = vshrl.u32 %v3247_v27, 30  ;;  %vm3364_vm8 = vc.u32 %v3356_v49, %v3360_v45  ;;  %v3366_v8 = vadd.s32 %v3360_v45, %v3356_v49  ;;  %v3380_v1 = vmul.u32 %v3376_v56, %v8881_v38 }
 0x544   : > { %v3742_v57 = vmul.f32 -0.001358992, %v3741_v30  ;;  %v3749_v42 = vmul.f32 -0.00019511016, %v3741_v30  ;;  %v3365_v63 = vsel %vm3364_vm8, 1, %v8622_v35  ;;  %v3382_v61 = vshll.u32 %v8330_v55, 16 }
 0x545   : > { %v3249_v20 = vshll.u32 %v8332_v3, 30  ;;  %vm3368_vm12 = vc.u32 %v3366_v8, %v3362_v24  ;;  %v3367_v53 = vadd.s32 %v3365_v63, %v3359_v16  ;;  %v3758_v39 = vand.u32 3, %v3757_v13 }
 0x546   : > { %v3743_v52 = vadd.f32 0.041655596, %v3742_v57  ;;  %v3750_v5 = vadd.f32 0.008332121, %v3749_v42  ;;  %v3369_v58 = vsel %vm3368_vm12, 1, %v8622_v35  ;;  %v3378_v6 = vmul.u32 %v3376_v56, %v8880_v11 }
 0x547   : > { %v8339_v51 = vsub.s32 %v3246_v48, %v3249_v20  ;;  %vm8882_vm7 = vcmp.lt.s32.totalorder %v8833_v15, 4  ;;  %v3381_v26 = vmul.u32 %v3377_v14, %v8881_v38  ;;  %v3371_v43 = vadd.s32 %v3369_v58, %v3367_v53 }
 0x548   : > { %v3744_v37 = vmul.f32 %v3743_v52, %v3741_v30  ;;  %v3751_v22 = vmul.f32 %v3750_v5, %v3741_v30  ;;  %v3340_v31 = vsel %vm8882_vm7, %v8840_v29, 2102212464  ;;  %vm3386_vm5 = vc.u32 %v3378_v6, %v3382_v61  ;;  %v8883_v29 = vld [vmem:[#allocation34_spill] sm:$0xff]  ;;  %v8887_v5 = vld [vmem:[#allocation27_spill] sm:$0xff] }
 0x549   : > { %vm3251_vm6 = vcmp.lt.s32.totalorder %v8339_v51, 0  ;;  %v3252_v10 = vsub.s32 0, %v8339_v51  ;;  %v3384_v54 = vshll.u32 %v3380_v1, 16  ;;  %v3387_v12 = vsel %vm3386_vm5, 1, %v8622_v35 }
 0x54a   : > { %v3745_v60 = vadd.f32 -0.4999988, %v3744_v37  ;;  %v3752_v0 = vadd.f32 -0.16666654, %v3751_v22  ;;  %v3388_v7 = vadd.s32 %v3382_v61, %v3378_v6  ;;  %v3361_v33 = vshrl.u32 %v3357_v34, 16 }
 0x54b   : > { %v3253_v32 = vsel %vm3251_vm6, %v3252_v10, %v8339_v51  ;;  %vm3756_vm14 = vweird.f32 %v8873_v41  ;;  %vm3759_vm11 = vcmp.lt.s32.totalorder %v3758_v39, 2  ;;  %v3319_v18 = vshrl.u32 %v8623_v50, %v8883_v29 }
 0x54c   : > { %v3746_v28 = vmul.f32 %v3745_v60, %v3741_v30  ;;  %v3753_v23 = vmul.f32 %v3752_v0, %v3741_v30  ;;  %v3254_v25 = vclz %v3253_v32  ;;  %v3389_v17 = vadd.s32 %v3387_v12, %v3381_v26 }
 0x54d   : > { %vm3390_vm2 = vc.u32 %v3388_v7, %v3384_v54  ;;  %v3372_v46 = vadd.s32 %v3371_v43, %v3361_v33  ;;  %vm8885_vm1 = vcmp.lt.s32.totalorder %v8833_v15, 1  ;;  %v3341_v47 = vsel %vm3337_vm0, %v8886_v2, %v3340_v31  ;;  %v8888_v31 = vld [vmem:[#allocation8_spill] sm:$0xff] }
 0x54e   : > { %v3747_v19 = vadd.f32 1.0, %v3746_v28  ;;  %v3754_v9 = vadd.f32 1.0, %v3753_v23  ;;  %v4622_v40 = vadd.s32 4294967294, %v3254_v25  ;;  %v3339_v14 = vsel %vm8885_vm1, %v3319_v18, %v8884_v4 }
 0x54f   : > { %v3363_v48 = vshrl.u32 %v8323_v59, 16  ;;  %v3391_v11 = vsel %vm3390_vm2, 1, %v8622_v35  ;;  %vm3760_vm10 = vcmp.eq.s32.totalorder %v3758_v39, 0  ;;  %vm3763_vm4 = vcmp.eq.s32.totalorder %v3758_v39, 2 }
 0x550   : > { %v3755_v34 = vmul.f32 %v3754_v9, %v3739_v21  ;;  %v3764_v50 = vxor.u32 2147483648, %v3747_v19  ;;  %vm4623_vm9 = vcmp.lt.s32.totalorder %v4622_v40, 0  ;;  %v3393_v36 = vadd.s32 %v3391_v11, %v3389_v17 }
 0x551   : > { %v3257_v38 = vsel %vm4623_vm9, 0, %v4622_v40  ;;  %v3383_v27 = vshrl.u32 %v8330_v55, 16  ;;  %v3242_v45 = vadd.s32 %v8292_v44, %v8286_v62  ;;  %v3373_v13 = vadd.s32 %v3372_v46, %v3363_v48 }
 0x552   : > { %v3761_v49 = vxor.u32 2147483648, %v3755_v34  ;;  %v3258_v30 = vsub.s32 32, %v3257_v38  ;;  %v3262_v56 = vsub.s32 4294967266, %v3257_v38  ;;  %v3342_v59 = vsel %vm3336_vm3, %v3339_v14, %v3341_v47 }
 0x553   : > { %v3385_v35 = vshrl.u32 %v3380_v1, 16  ;;  %v3394_v21 = vadd.s32 %v3393_v36, %v3383_v27  ;;  %v3765_v8 = vsel %vm3763_vm4, %v3764_v50, %v3755_v34  ;;  %v3392_v42 = vadd.s32 %v3388_v7, %v3384_v54 }
 0x554   : > { %v3762_v24 = vsel %vm3760_vm10, %v3747_v19, %v3761_v49  ;;  %v3260_v57 = vshrl.u32 %v3242_v45, %v3258_v30  ;;  %v3259_v55 = vshll.u32 %v8339_v51, %v3257_v38  ;;  %v3263_v63 = vadd.s32 127, %v3262_v56 }
 0x555   : > { %v3766_v16 = vsel %vm3759_vm11, %v3762_v24, %v3765_v8  ;;  %v3395_v20 = vadd.s32 %v3394_v21, %v3385_v35  ;;  %vm3398_vm0 = vc.u32 %v3373_v13, %v3392_v42  ;;  %v3396_v53 = vmul.u32 %v8887_v5, %v3342_v59 }
 0x556   : > { %v3767_v62 = vsel %vm3756_vm14, nan, %v3766_v16  ;;  %v3261_v44 = vor.u32 %v3260_v57, %v3259_v55  ;;  %v3264_v15 = vshll.u32 %v3263_v63, 23  ;;  %vm3150_vm15 = vcmp.lt.s32.totalorder %v8888_v31, 0  ;;  %v4388_v63 = vld [vmem:[%s8448_s7] sm:$0xf] }
 0x557   : > { %4432 = vmatpush.msra.mxu3 %v3767_v62  ;;  %v3399_v52 = vadd.s32 1, %v3395_v20  ;;  %v8889_v26 = vand.u32 2147483647, %v8888_v31  ;;  %v3272_v43 = vsub.s32 4, %v8332_v3  ;;  %v3397_v34 = vadd.s32 %v3392_v42, %v3373_v13 }
 0x558   : > { %v3265_v61 = vor.u32 4788187, %v3264_v15  ;;  %v3268_v22 = vcvt.s32.f32 %v3261_v44  ;;  %vm3291_vm5 = vweird.f32 %v8888_v31  ;;  %vm8892_vm14 = vcmask 261120   ;;  %v8893_v15 = vld [vmem:[#allocation6_spill] sm:$0xff] }
 0x559   : > { %v3400_v58 = vsel %vm3398_vm0, %v3399_v52, %v3395_v20  ;;  %vm8379_vm3 = vcmp.le.f32.partialorder %v8889_v26, 0.7853982  ;;  %v3273_v25 = vsel %vm3150_vm15, %v3272_v43, %v8332_v3  ;;  %vm3305_vm11 = vcmp.lt.s32.totalorder %v8893_v15, 0  ;;  %vm8895_vm0 = vmmov %vm8892_vm14 }
 0x55a   : > { %v3401_v1 = vadd.s32 %v3400_v58, %v3396_v53  ;;  %v3266_v37 = vand.u32 2147483647, %v3265_v61  ;;  %v3275_v19 = vsel %vm8379_vm3, 0, %v3273_v25  ;;  %v8894_v52 = vand.u32 2147483647, %v8893_v15 }
 0x55b   : > { %v3292_v2 = vadd.s32 3, %v3275_v19  ;;  %vm3446_vm4 = vweird.f32 %v8893_v15 }
 0x55c   : > { %v3402_v39 = vadd.s32 536870912, %v3401_v1  ;;  %v3269_v6 = vmul.f32 %v3268_v22, %v3266_v37  ;;  %vm3304_vm2 = vcmp.le.f32.partialorder %v8894_v52, 0.7853982 }
 0x55d   : > { %v3293_v49 = vand.u32 3, %v3292_v2 }
 0x55e   : > { %v8373_v51 = vshrl.u32 %v3402_v39, 30  ;;  %v3270_v10 = vxor.u32 2147483648, %v3269_v6 }
 0x55f   : > { %vm3295_vm12 = vcmp.eq.s32.totalorder %v3293_v49, 0  ;;  %vm3298_vm6 = vcmp.eq.s32.totalorder %v3293_v49, 2  ;;  %vm3294_vm7 = vcmp.lt.s32.totalorder %v3293_v49, 2 }
 0x560   : > { %v3404_v41 = vshll.u32 %v8373_v51, 30  ;;  %v3271_v0 = vsel %vm3150_vm15, %v3270_v10, %v3269_v6  ;;  %v3427_v53 = vsub.s32 4, %v8373_v51  ;;  %vm8896_vm15 = vcmask 1043456  }
 0x561   : > { %v3274_v32 = vsel %vm8379_vm3, %v8888_v31, %v3271_v0 }
 0x562   : > { %v3405_v54 = vsub.s32 %v3401_v1, %v3404_v41  ;;  %v3276_v12 = vmul.f32 %v3274_v32, %v3274_v32  ;;  %v3428_v22 = vsel %vm3305_vm11, %v3427_v53, %v8373_v51 }
 0x563   : > { %v3430_v10 = vsel %vm3304_vm2, 0, %v3428_v22 }
 0x564   : > { %vm3406_vm13 = vcmp.lt.s32.totalorder %v3405_v54, 0  ;;  %v3407_v7 = vsub.s32 0, %v3405_v54  ;;  %v3277_v28 = vmul.f32 -0.001358992, %v3276_v12  ;;  %v3284_v23 = vmul.f32 -0.00019511016, %v3276_v12 }
 0x565   : > { %v3447_v0 = vadd.s32 3, %v3430_v10 }
 0x566   : > { %v3408_v33 = vsel %vm3406_vm13, %v3407_v7, %v3405_v54  ;;  %v3278_v29 = vadd.f32 0.041655596, %v3277_v28  ;;  %v3285_v18 = vadd.f32 0.008332121, %v3284_v23 }
 0x567   : > { %v3409_v17 = vclz %v3408_v33  ;;  %v3448_v7 = vand.u32 3, %v3447_v0 }
 0x568   : > { %v3279_v9 = vmul.f32 %v3278_v29, %v3276_v12  ;;  %v3286_v40 = vmul.f32 %v3285_v18, %v3276_v12 }
 0x569   : > { %v4625_v46 = vadd.s32 4294967294, %v3409_v17  ;;  %vm3450_vm1 = vcmp.eq.s32.totalorder %v3448_v7, 0  ;;  %vm3453_vm9 = vcmp.eq.s32.totalorder %v3448_v7, 2  ;;  %vm3449_vm10 = vcmp.lt.s32.totalorder %v3448_v7, 2  ;;  %v4393_v17 = vpop.permute.xlu0 %4392 }
 0x56a   : > { %v3280_v4 = vadd.f32 -0.4999988, %v3279_v9  ;;  %v3287_v14 = vadd.f32 -0.16666654, %v3286_v40 }
 0x56b   : > { %vm4626_vm8 = vcmp.lt.s32.totalorder %v4625_v46, 0 }
 0x56c   : > { %v3412_v47 = vsel %vm4626_vm8, 0, %v4625_v46  ;;  %v3281_v48 = vmul.f32 %v3280_v4, %v3276_v12  ;;  %v3288_v11 = vmul.f32 %v3287_v14, %v3276_v12 }
 0x56d   : > { %v3413_v50 = vsub.s32 32, %v3412_v47  ;;  %v3417_v3 = vsub.s32 4294967266, %v3412_v47  ;;  %v3414_v45 = vshll.u32 %v3405_v54, %v3412_v47 }
 0x56e   : > { %v3282_v36 = vadd.f32 1.0, %v3281_v48  ;;  %v3289_v38 = vadd.f32 1.0, %v3288_v11 }
 0x56f   : > { %v3415_v27 = vshrl.u32 %v3397_v34, %v3413_v50  ;;  %v3418_v30 = vadd.s32 127, %v3417_v3 }
 0x570   : > { %v3290_v56 = vmul.f32 %v3289_v38, %v3274_v32  ;;  %v3299_v59 = vxor.u32 2147483648, %v3282_v36 }
 0x571   : > { %v3416_v35 = vor.u32 %v3415_v27, %v3414_v45  ;;  %v3419_v21 = vshll.u32 %v3418_v30, 23 }
 0x572   : > { %v3296_v24 = vxor.u32 2147483648, %v3290_v56  ;;  %v3300_v16 = vsel %vm3298_vm6, %v3299_v59, %v3290_v56 }
 0x573   : > { %v3420_v8 = vor.u32 4788187, %v3419_v21  ;;  %v3423_v55 = vcvt.s32.f32 %v3416_v35 }
 0x574   : > { %v3297_v57 = vsel %vm3295_vm12, %v3282_v36, %v3296_v24 }
 0x575   : > { %v3301_v13 = vsel %vm3294_vm7, %v3297_v57, %v3300_v16  ;;  %v3421_v42 = vand.u32 2147483647, %v3420_v8 }
 0x576   : > { %v3302_v20 = vsel %vm3291_vm5, nan, %v3301_v13 }
 0x577   : > { %4413 = vmatpush.msra.mxu2 %v3302_v20  ;;  %v3424_v62 = vmul.f32 %v3423_v55, %v3421_v42 }
 0x578   : > { %4645 = vmatmul.msk.f32.vlgmr.msra.gmra.mxu2 %vm8892_vm14, %v4388_v63 }
 0x579   : > { %v3425_v44 = vxor.u32 2147483648, %v3424_v62 }
 0x57b   : > { %v3426_v5 = vsel %vm3305_vm11, %v3425_v44, %v3424_v62 }
 0x57c   : > { %v3429_v61 = vsel %vm3304_vm2, %v8893_v15, %v3426_v5 }
 0x57d   : > { %v3431_v58 = vmul.f32 %v3429_v61, %v3429_v61 }
 0x57f   : > { %v3432_v1 = vmul.f32 -0.001358992, %v3431_v58  ;;  %v3439_v37 = vmul.f32 -0.00019511016, %v3431_v58 }
 0x581   : > { %v3433_v39 = vadd.f32 0.041655596, %v3432_v1  ;;  %v3440_v6 = vadd.f32 0.008332121, %v3439_v37 }
 0x583   : > { %v3434_v31 = vmul.f32 %v3433_v39, %v3431_v58  ;;  %v3441_v41 = vmul.f32 %v3440_v6, %v3431_v58 }
 0x585   : > { %v3435_v26 = vadd.f32 -0.4999988, %v3434_v31  ;;  %v3442_v60 = vadd.f32 -0.16666654, %v3441_v41 }
 0x587   : > { %v3436_v43 = vmul.f32 %v3435_v26, %v3431_v58  ;;  %v3443_v32 = vmul.f32 %v3442_v60, %v3431_v58 }
 0x589   : > { %v3437_v54 = vadd.f32 1.0, %v3436_v43  ;;  %v3444_v12 = vadd.f32 1.0, %v3443_v32 }
 0x58b   : > { %v3445_v28 = vmul.f32 %v3444_v12, %v3429_v61  ;;  %v3454_v23 = vxor.u32 2147483648, %v3437_v54 }
 0x58d   : > { %v3451_v25 = vxor.u32 2147483648, %v3445_v28  ;;  %v3455_v33 = vsel %vm3453_vm9, %v3454_v23, %v3445_v28 }
 0x58f   : > { %v3452_v51 = vsel %vm3450_vm1, %v3437_v54, %v3451_v25 }
 0x590   : > { %v3456_v29 = vsel %vm3449_vm10, %v3452_v51, %v3455_v33 }
 0x591   : > { %v3457_v18 = vsel %vm3446_vm4, nan, %v3456_v29 }
 0x592   : > { %4433 = vmatpush.msra.mxu3 %v3457_v18 }
 0x593   : > { %4646 = vmatmul.msk.f32.vlgmr.msra.gmra.mxu3 %vm8895_vm0, %v4388_v63 }
 0x5fb   : > { %v4415_v19 = vpop.f32.mrf.mxu2 }
 0x5fc   : > { %v4416_v46 = vadd.f32 %v4415_v19, %v4393_v17 }
 0x616   : > { %v4435_v9 = vpop.f32.mrf.mxu3 }
 0x617   : > { %v4436_v40 = vadd.f32 %v4435_v9, %v4393_v17 }
 0x619   : > { %v4440_v4 = vrot.slane %v4436_v40, 4 }
 0x61b   : > { %v4441_v14 = vsel %vm8896_vm15, %v4416_v46, %v4440_v4 }
 0x61c   : > { %4443 = vst [vmem:[%s350_s16] sm:$0xff] %v4441_v14 }
 0x61d   : > { %4748 = shalt.err (!%p4745_p5)
}
 0x61e   : > { %4656 = dma.vmem_to_hbm [thread:$0]  (%p4898_p4), %s4461_s18, 128, %s4463_s20, %s4445_s12  }
 0x61f PF: > { %p4662_p6 = scmp.ge.s32.totalorder %s4799_s14, 2  ;;  %s4474_s25 = sand.u32 1, %s4779_s30  }
 0x620   : > { %s4475_s16 = scalar_lea.sflag [#allocation3], %s4474_s25 }
 0x621   : > { %p4659_p7 = pnand %p4662_p6, %p4905_p8 }
 0x623   : > { %p4660_p9 = pneg %p4659_p7 }
 0x625   : > { %4774 = dma.done.wait (%p4660_p9), %s4475_s16, 128  }
 0x626   : > { %4776 = vsyncadd (%p4660_p9), %s4475_s16, 4294967168  ;;  %s22_s14 = sadd.s32 1, %s4799_s14   ;;  %s8897_s30 = smov %s4783_s10 }
 0x627   : > { %p19_p10 = scmp.ge.s32.totalorder %s22_s14, 4   ;;  %s8898_s10 = smov %s4787_s11 }
 0x628   : > { %s8899_s11 = smov %s4911_s22  ;;  %s8900_s12 = smov %s4795_s13 }
 0x629   : > { %s8901_s13 = smov %s8903_s17  ;;  %21 = sbr.rel (!%p19_p10) target bundleno = 4 (0x4), region = 91 }
 0x62e   :  { %4481 = vsyncpa [#allocation3], 1 }
 0x62f   :  { %4483 = vsyncpa [#allocation3 + $0x1], 1 }

</bundles_post_ra>
